<compile_context>
chip_gen: v7x
topology: tpu7x:2x2x1
jax: 0.10.0
libtpu: 0.0.40
codegen_flags: <defaults>
</compile_context>

<pallas_src>
import jax
import jax.numpy as jnp
from jax.experimental import pallas as pl
from jax.experimental.pallas import tpu as pltpu


def _mlp_kernel(x_ref, w1_ref, b1_ref, w2_ref, b2_ref, w3_ref, b3_ref,
                o_ref, h1_ref, acc_ref):
    # TODO(synk): training-mode dropout (p=0.1 mask + 1/0.9 rescale via
    # pltpu.prng_seed/prng_random_bits) is omitted; this matches module.eval().
    j = pl.program_id(1)

    @pl.when(j == 0)
    def _():
        # Layer 1 runs once per batch tile; h1 is kept in bf16 VMEM scratch
        # and reused across the w2-column (reduction) axis.
        x = x_ref[...].astype(jnp.bfloat16)
        h1 = jnp.dot(x, w1_ref[...], preferred_element_type=jnp.float32)
        h1_ref[...] = jnp.maximum(h1 + b1_ref[...], 0.0).astype(jnp.bfloat16)
        acc_ref[...] = jnp.zeros_like(acc_ref)

    # Layer 2 on one tn-column slab of w2; that slab is the K-dim chunk of
    # layer 3, so its contribution is accumulated in f32 scratch.
    h2 = jnp.dot(h1_ref[...], w2_ref[...], preferred_element_type=jnp.float32)
    h2 = jnp.maximum(h2 + b2_ref[...], 0.0)
    acc_ref[...] += jnp.dot(h2.astype(jnp.bfloat16), w3_ref[...],
                            preferred_element_type=jnp.float32)

    @pl.when(j == pl.num_programs(1) - 1)
    def _():
        o_ref[...] = jnp.maximum(acc_ref[...] + b3_ref[...],
                                 0.0).astype(o_ref.dtype)


def next_measurement_forward(x, params, *, tn=1024, tb=None):
    """x: [B, hidden_dim] f32. params: bf16 weights ([in,out]) + f32 biases ([1,out]).

    Returns [B, feat_dim] float32.
    """
    w1, b1, w2, b2, w3, b3 = params
    B, hidden_dim = x.shape
    n_mid = w2.shape[1]        # 2048
    feat_dim = w3.shape[1]

    if tb is None:
        tb = B if B <= 512 else 512
    assert B % tb == 0 and n_mid % tn == 0

    n_batch_tiles = B // tb
    grid = (n_batch_tiles, n_mid // tn)

    flops = 2 * B * (hidden_dim * w1.shape[1] + w2.shape[0] * n_mid
                     + w3.shape[0] * feat_dim)
    # x / w1 / b1 / b3 are streamed once (constant-across-j index maps, and
    # (0,0) maps never change so they are not re-fetched when i advances);
    # w2 / b2 / w3 are re-streamed once per batch tile.
    once_bytes = sum(int(a.size) * a.dtype.itemsize for a in (x, w1, b1, b3))
    per_tile_bytes = sum(int(a.size) * a.dtype.itemsize for a in (w2, b2, w3))
    bytes_accessed = once_bytes + n_batch_tiles * per_tile_bytes
    bytes_accessed += B * feat_dim * 4  # output

    return pl.pallas_call(
        _mlp_kernel,
        out_shape=jax.ShapeDtypeStruct((B, feat_dim), jnp.float32),
        grid_spec=pltpu.PrefetchScalarGridSpec(
            num_scalar_prefetch=0,
            grid=grid,
            in_specs=[
                pl.BlockSpec((tb, hidden_dim), lambda i, j: (i, 0)),   # x
                pl.BlockSpec(w1.shape, lambda i, j: (0, 0)),           # w1 (resident)
                pl.BlockSpec(b1.shape, lambda i, j: (0, 0)),           # b1 (resident)
                pl.BlockSpec((w2.shape[0], tn), lambda i, j: (0, j)),  # w2 column slab
                pl.BlockSpec((1, tn), lambda i, j: (0, j)),            # b2 slab
                pl.BlockSpec((tn, feat_dim), lambda i, j: (j, 0)),     # w3 row slab
                pl.BlockSpec(b3.shape, lambda i, j: (0, 0)),           # b3 (resident)
            ],
            out_specs=pl.BlockSpec((tb, feat_dim), lambda i, j: (i, 0)),
            scratch_shapes=[
                pltpu.VMEM((tb, n_mid), jnp.bfloat16),    # h1 (layer-1 output)
                pltpu.VMEM((tb, feat_dim), jnp.float32),  # layer-3 accumulator
            ],
        ),
        compiler_params=pltpu.CompilerParams(
            # Batch axis kept single-core: megacore sharding would duplicate
            # the dominant w2/w3 HBM stream on a weight-bandwidth-bound kernel.
            dimension_semantics=("arbitrary", "arbitrary"),
            vmem_limit_bytes=32 << 20,
        ),
        cost_estimate=pl.CostEstimate(flops=flops, transcendentals=0,
                                      bytes_accessed=bytes_accessed),
    )(x, w1, b1, w2, b2, w3, b3)


def init_params(key, feat_dim, hidden_dim):
    """Deterministic synthetic f32 parameters matching nn.Linear shapes.

    Weights stored as [in, out] (transposed relative to PyTorch's [out, in]),
    biases as [1, out] for clean 2-D broadcasting inside the kernel.
    """
    ks = jax.random.split(key, 6)

    def linear(kw, kb, fan_in, fan_out):
        bound = 1.0 / jnp.sqrt(fan_in)
        w = jax.random.uniform(kw, (fan_in, fan_out), jnp.float32, -bound, bound)
        b = jax.random.uniform(kb, (1, fan_out), jnp.float32, -bound, bound)
        return w, b

    w1, b1 = linear(ks[0], ks[1], hidden_dim, 2048)
    w2, b2 = linear(ks[2], ks[3], 2048, 2048)
    w3, b3 = linear(ks[4], ks[5], 2048, feat_dim)
    return (w1, b1, w2, b2, w3, b3)


def to_kernel_params(params):
    """Cast weights to bf16 once, caller-side (halves HBM weight traffic)."""
    w1, b1, w2, b2, w3, b3 = params
    bf = jnp.bfloat16
    return (w1.astype(bf), b1, w2.astype(bf), b2, w3.astype(bf), b3)


def _reference(x, params):
    w1, b1, w2, b2, w3, b3 = params
    h = jnp.maximum(x @ w1 + b1, 0.0)
    h = jnp.maximum(h @ w2 + b2, 0.0)
    return jnp.maximum(h @ w3 + b3, 0.0)


if __name__ == "__main__":
    B = 8            # batch (sublane-aligned)
    hidden_dim = 32  # GRU hidden size feeding this head
    feat_dim = 128   # predicted measurement dimension (lane-aligned)

    key = jax.random.PRNGKey(0)
    k_x, k_p = jax.random.split(key)
    x = jax.random.normal(k_x, (B, hidden_dim), jnp.float32)

    params_f32 = init_params(k_p, feat_dim, hidden_dim)
    kparams = to_kernel_params(params_f32)   # bf16 weights, f32 biases

    out = next_measurement_forward(x, kparams)
    out = jax.block_until_ready(out)

    ref = _reference(x, params_f32)          # f32 reference
    assert out.shape == (B, feat_dim)
    # bf16 weight/activation quantization vs. the f32 reference -> relaxed tol.
    assert jnp.allclose(out, ref, atol=5e-2, rtol=5e-2), "mismatch vs JAX reference"

    print("KERNEL_OK")
</pallas_src>

<mosaic_0001>
module attributes {stable_mosaic.version = 11 : i64} {
  func.func @_mlp_kernel(%arg0: i32, %arg1: i32, %arg2: memref<8x32xf32, #tpu.memory_space<vmem>>, %arg3: memref<32x2048xbf16, #tpu.memory_space<vmem>>, %arg4: memref<1x2048xf32, #tpu.memory_space<vmem>>, %arg5: memref<2048x1024xbf16, #tpu.memory_space<vmem>>, %arg6: memref<1x1024xf32, #tpu.memory_space<vmem>>, %arg7: memref<1024x128xbf16, #tpu.memory_space<vmem>>, %arg8: memref<1x128xf32, #tpu.memory_space<vmem>>, %arg9: memref<8x128xf32, #tpu.memory_space<vmem>>, %arg10: memref<8x2048xbf16, #tpu.memory_space<vmem>>, %arg11: memref<8x128xf32, #tpu.memory_space<vmem>>) attributes {dimension_semantics = [#tpu.dimension_semantics<arbitrary>, #tpu.dimension_semantics<arbitrary>], iteration_bounds = array<i64: 1, 2>, scalar_prefetch = 0 : i64, scratch_operands = 2 : i64, tpu.core_type = #tpu.core_type<tc>, window_params = [{transform_indices = @transform_0, window_bounds = array<i64: 8, 32>}, {pipeline_mode = #tpu.pipeline_mode<synchronous>, transform_indices = @transform_1, window_bounds = array<i64: 32, 2048>}, {pipeline_mode = #tpu.pipeline_mode<synchronous>, transform_indices = @transform_2, window_bounds = array<i64: 1, 2048>}, {transform_indices = @transform_3, window_bounds = array<i64: 2048, 1024>}, {transform_indices = @transform_4, window_bounds = array<i64: 1, 1024>}, {transform_indices = @transform_5, window_bounds = array<i64: 1024, 128>}, {pipeline_mode = #tpu.pipeline_mode<synchronous>, transform_indices = @transform_6, window_bounds = array<i64: 1, 128>}, {transform_indices = @transform_7, window_bounds = array<i64: 8, 128>}]} {
    %c0_i32 = arith.constant 0 : i32
    %0 = arith.cmpi eq, %arg1, %c0_i32 : i32
    %1 = arith.extui %0 : i1 to i32
    %c0_i32_0 = arith.constant 0 : i32
    %2 = arith.cmpi ne, %1, %c0_i32_0 : i32
    scf.if %2 {
      %c0_15 = arith.constant 0 : index
      %c0_16 = arith.constant 0 : index
      %20 = vector.load %arg2[%c0_15, %c0_16] : memref<8x32xf32, #tpu.memory_space<vmem>>, vector<8x32xf32>
      %21 = arith.truncf %20 : vector<8x32xf32> to vector<8x32xbf16>
      %c0_17 = arith.constant 0 : index
      %c0_18 = arith.constant 0 : index
      %22 = vector.load %arg3[%c0_17, %c0_18] : memref<32x2048xbf16, #tpu.memory_space<vmem>>, vector<32x2048xbf16>
      %cst_19 = arith.constant dense<0.000000e+00> : vector<8x2048xf32>
      %23 = tpu.matmul %21, %22, %cst_19 {dimension_numbers = #tpu.dot_dimension_numbers<[1], [0], [0], [1], [0, 0, 1, 1], [], []>} : vector<8x32xbf16>, vector<32x2048xbf16>, vector<8x2048xf32> -> vector<8x2048xf32>
      %c0_20 = arith.constant 0 : index
      %c0_21 = arith.constant 0 : index
      %24 = vector.load %arg4[%c0_20, %c0_21] : memref<1x2048xf32, #tpu.memory_space<vmem>>, vector<1x2048xf32>
      %25 = vector.broadcast %24 : vector<1x2048xf32> to vector<8x2048xf32>
      %26 = arith.addf %23, %25 : vector<8x2048xf32>
      %cst_22 = arith.constant 0.000000e+00 : f32
      %27 = vector.broadcast %cst_22 : f32 to vector<8x2048xf32>
      %28 = arith.maximumf %26, %27 : vector<8x2048xf32>
      %29 = arith.truncf %28 : vector<8x2048xf32> to vector<8x2048xbf16>
      %c0_23 = arith.constant 0 : index
      %c0_24 = arith.constant 0 : index
      %30 = vector.load %arg10[%c0_23, %c0_24] : memref<8x2048xbf16, #tpu.memory_space<vmem>>, vector<8x2048xbf16>
      tpu.vector_store %arg10[%c0_23, %c0_24], %29 {strides = array<i32>} : memref<8x2048xbf16, #tpu.memory_space<vmem>>, vector<8x2048xbf16>,
      %cst_25 = arith.constant 0.000000e+00 : f32
      %31 = vector.broadcast %cst_25 : f32 to vector<8x128xf32>
      %c0_26 = arith.constant 0 : index
      %c0_27 = arith.constant 0 : index
      %32 = vector.load %arg11[%c0_26, %c0_27] : memref<8x128xf32, #tpu.memory_space<vmem>>, vector<8x128xf32>
      tpu.vector_store %arg11[%c0_26, %c0_27], %31 {strides = array<i32>} : memref<8x128xf32, #tpu.memory_space<vmem>>, vector<8x128xf32>,
    } else {
    }
    %c0 = arith.constant 0 : index
    %c0_1 = arith.constant 0 : index
    %3 = vector.load %arg10[%c0, %c0_1] : memref<8x2048xbf16, #tpu.memory_space<vmem>>, vector<8x2048xbf16>
    %c0_2 = arith.constant 0 : index
    %c0_3 = arith.constant 0 : index
    %4 = vector.load %arg5[%c0_2, %c0_3] : memref<2048x1024xbf16, #tpu.memory_space<vmem>>, vector<2048x1024xbf16>
    %cst = arith.constant dense<0.000000e+00> : vector<8x1024xf32>
    %5 = tpu.matmul %3, %4, %cst {dimension_numbers = #tpu.dot_dimension_numbers<[1], [0], [0], [1], [0, 0, 1, 1], [], []>} : vector<8x2048xbf16>, vector<2048x1024xbf16>, vector<8x1024xf32> -> vector<8x1024xf32>
    %c0_4 = arith.constant 0 : index
    %c0_5 = arith.constant 0 : index
    %6 = vector.load %arg6[%c0_4, %c0_5] : memref<1x1024xf32, #tpu.memory_space<vmem>>, vector<1x1024xf32>
    %7 = vector.broadcast %6 : vector<1x1024xf32> to vector<8x1024xf32>
    %8 = arith.addf %5, %7 : vector<8x1024xf32>
    %cst_6 = arith.constant 0.000000e+00 : f32
    %9 = vector.broadcast %cst_6 : f32 to vector<8x1024xf32>
    %10 = arith.maximumf %8, %9 : vector<8x1024xf32>
    %c0_7 = arith.constant 0 : index
    %c0_8 = arith.constant 0 : index
    %11 = vector.load %arg11[%c0_7, %c0_8] : memref<8x128xf32, #tpu.memory_space<vmem>>, vector<8x128xf32>
    %12 = arith.truncf %10 : vector<8x1024xf32> to vector<8x1024xbf16>
    %c0_9 = arith.constant 0 : index
    %c0_10 = arith.constant 0 : index
    %13 = vector.load %arg7[%c0_9, %c0_10] : memref<1024x128xbf16, #tpu.memory_space<vmem>>, vector<1024x128xbf16>
    %cst_11 = arith.constant dense<0.000000e+00> : vector<8x128xf32>
    %14 = tpu.matmul %12, %13, %cst_11 {dimension_numbers = #tpu.dot_dimension_numbers<[1], [0], [0], [1], [0, 0, 1, 1], [], []>} : vector<8x1024xbf16>, vector<1024x128xbf16>, vector<8x128xf32> -> vector<8x128xf32>
    %15 = arith.addf %11, %14 : vector<8x128xf32>
    %c0_12 = arith.constant 0 : index
    %c0_13 = arith.constant 0 : index
    %16 = vector.load %arg11[%c0_12, %c0_13] : memref<8x128xf32, #tpu.memory_space<vmem>>, vector<8x128xf32>
    tpu.vector_store %arg11[%c0_12, %c0_13], %15 {strides = array<i32>} : memref<8x128xf32, #tpu.memory_space<vmem>>, vector<8x128xf32>,
    %c1_i32 = arith.constant 1 : i32
    %17 = arith.cmpi eq, %arg1, %c1_i32 : i32
    %18 = arith.extui %17 : i1 to i32
    %c0_i32_14 = arith.constant 0 : i32
    %19 = arith.cmpi ne, %18, %c0_i32_14 : i32
    scf.if %19 {
      %c0_15 = arith.constant 0 : index
      %c0_16 = arith.constant 0 : index
      %20 = vector.load %arg11[%c0_15, %c0_16] : memref<8x128xf32, #tpu.memory_space<vmem>>, vector<8x128xf32>
      %c0_17 = arith.constant 0 : index
      %c0_18 = arith.constant 0 : index
      %21 = vector.load %arg8[%c0_17, %c0_18] : memref<1x128xf32, #tpu.memory_space<vmem>>, vector<1x128xf32>
      %22 = vector.broadcast %21 : vector<1x128xf32> to vector<8x128xf32>
      %23 = arith.addf %20, %22 : vector<8x128xf32>
      %cst_19 = arith.constant 0.000000e+00 : f32
      %24 = vector.broadcast %cst_19 : f32 to vector<8x128xf32>
      %25 = arith.maximumf %23, %24 : vector<8x128xf32>
      %c0_20 = arith.constant 0 : index
      %c0_21 = arith.constant 0 : index
      %26 = vector.load %arg9[%c0_20, %c0_21] : memref<8x128xf32, #tpu.memory_space<vmem>>, vector<8x128xf32>
      tpu.vector_store %arg9[%c0_20, %c0_21], %25 {strides = array<i32>} : memref<8x128xf32, #tpu.memory_space<vmem>>, vector<8x128xf32>,
    } else {
    }
    return
  }
  func.func @transform_0(%arg0: i32, %arg1: i32) -> (i32, i32) {
    %c0_i32 = arith.constant 0 : i32
    %c0_i32_0 = arith.constant 0 : i32
    return %arg0, %c0_i32 : i32, i32
  }
  func.func @transform_1(%arg0: i32, %arg1: i32) -> (i32, i32) {
    %c0_i32 = arith.constant 0 : i32
    %c0_i32_0 = arith.constant 0 : i32
    %c0_i32_1 = arith.constant 0 : i32
    return %c0_i32, %c0_i32_0 : i32, i32
  }
  func.func @transform_2(%arg0: i32, %arg1: i32) -> (i32, i32) {
    %c0_i32 = arith.constant 0 : i32
    %c0_i32_0 = arith.constant 0 : i32
    %c0_i32_1 = arith.constant 0 : i32
    return %c0_i32, %c0_i32_0 : i32, i32
  }
  func.func @transform_3(%arg0: i32, %arg1: i32) -> (i32, i32) {
    %c0_i32 = arith.constant 0 : i32
    %c0_i32_0 = arith.constant 0 : i32
    return %c0_i32, %arg1 : i32, i32
  }
  func.func @transform_4(%arg0: i32, %arg1: i32) -> (i32, i32) {
    %c0_i32 = arith.constant 0 : i32
    %c0_i32_0 = arith.constant 0 : i32
    return %c0_i32, %arg1 : i32, i32
  }
  func.func @transform_5(%arg0: i32, %arg1: i32) -> (i32, i32) {
    %c0_i32 = arith.constant 0 : i32
    %c0_i32_0 = arith.constant 0 : i32
    return %arg1, %c0_i32 : i32, i32
  }
  func.func @transform_6(%arg0: i32, %arg1: i32) -> (i32, i32) {
    %c0_i32 = arith.constant 0 : i32
    %c0_i32_0 = arith.constant 0 : i32
    %c0_i32_1 = arith.constant 0 : i32
    return %c0_i32, %c0_i32_0 : i32, i32
  }
  func.func @transform_7(%arg0: i32, %arg1: i32) -> (i32, i32) {
    %c0_i32 = arith.constant 0 : i32
    %c0_i32_0 = arith.constant 0 : i32
    return %arg0, %c0_i32 : i32, i32
  }
}

</mosaic_0001>

<bundles_post_ra>
// kernel: tpu_custom_call.1
= control target key start
LH: loop header
LB: loop body
LE: loop exit
PB: predicated region body
PF: predicated region fallthrough
CT: control target
= control target key end

     0   :  { %s13163_s0 = inlined_call_operand.hbm [shape: f32[8,32], index: 0, kind: input, shape index: {}]   ;;  %s13164_s1 = inlined_call_operand.hbm [shape: bf16[32,2048], index: 1, kind: input, shape index: {}]   ;;  %s13165_s2 = inlined_call_operand.hbm [shape: f32[1,2048], index: 2, kind: input, shape index: {}]   ;;  %s13166_s3 = inlined_call_operand.hbm [shape: bf16[2048,2048], index: 3, kind: input, shape index: {}]   ;;  %s13167_s4 = inlined_call_operand.hbm [shape: f32[1,2048], index: 4, kind: input, shape index: {}]   ;;  %s13168_s5 = inlined_call_operand.hbm [shape: bf16[2048,128], index: 5, kind: input, shape index: {}]   ;;  %s13169_s6 = inlined_call_operand.hbm [shape: f32[1,128], index: 6, kind: input, shape index: {}]   ;;  %s13170_s7 = inlined_call_operand.hbm [shape: f32[8,128], index: 7, kind: output, shape index: {}]  }
   0x1   :  { %13188 = sst [smem:[#allocation26_spill]] %s13164_s1 }
   0x2   :  { %13189 = sst [smem:[#allocation27_spill]] %s13166_s3 }
   0x3   :  { %13190 = sst [smem:[#allocation28_spill]] %s13169_s6 }
   0x4   :  { %13191 = sst [smem:[#allocation29_spill]] %s13170_s7 }
   0x5   :  { %12 = vsyncpa [#allocation5], 0 }
   0x6   :  { %13 = vsyncpa [#allocation8], 0 }
   0x7   :  { %14 = vsyncpa [#allocation11], 0 }
   0x8   :  { %16 = vsyncpa [#allocation11 + $0x1], 0 }
   0x9   :  { %17 = vsyncpa [#allocation14], 0 }
   0xa   :  { %19 = vsyncpa [#allocation14 + $0x1], 0 }
   0xb   :  { %20 = vsyncpa [#allocation6], 0  ;;  %s11523_s24 = smov 0   ;;  %s11525_s25 = smov 0  }
   0xc   :  { %s11527_s26 = smov 0   ;;  %s11529_s27 = smov 0  }
   0xd   :  { %s11531_s28 = smov 0   ;;  %s11533_s29 = smov 0  }
   0xe LB: > { %13192 = sst [smem:[#allocation23_spill]] %s11454_s26  ;;  %s11552_s30 = sadd.s32 4294967295, %s11466_s29   ;;  %s11466_s29 = sphi %s11533_s29, %s26_s29   ;;  %s11462_s28 = sphi %s11531_s28, %s13226_s28   ;;  %s11458_s27 = sphi %s11529_s27, %s13225_s27   ;;  %s11454_s26 = sphi %s11527_s26, %s13221_s26   ;;  %s11450_s25 = sphi %s11525_s25, %s13224_s25   ;;  %s11446_s24 = sphi %s11523_s24, %s13223_s24  }
   0xf   : > { %p126_p0 = scmp.ne.s32.totalorder %s11450_s25, %s11446_s24  ;;  %p13171_p1 = scmp.eq.s32.totalorder %s11552_s30, 0 }
  0x10   : > { %p9567_p2 = scmp.ge.s32.totalorder %s11466_s29, 1  ;;  %p236_p3 = scmp.lt.s32.totalorder %s11466_s29, 3 }
  0x11   : > { %p11560_p4 = por %p13171_p1, %p126_p0  ;;  %s11468_s10 = smov [#allocation7]  }
  0x12   : > { %p11564_p5 = pnand %p9567_p2, %p236_p3  ;;  %s261_s11 = sshll.u32 %s11468_s10, 4  ;;  %s262_s11 = int_to_ptr.vmem [resolvable:$true] %s261_s11 }
  0x13   : > { %s13193_s8 = scalar_select %p11560_p4, 1, 0 }
  0x14   : > { %s13194_s9 = scalar_select %p11564_p5, 1, 0 }
  0x15   : > { %p10994_p6 = pneg %p11564_p5  ;;  %s11469_s13 = smov [#allocation15]  }
  0x16   : > { %s286_s14 = sshll.u32 %s11469_s13, 4  ;;  %s13196_s1 = sld [smem:[#allocation26_spill]]  ;;  %s11576_s14 = int_to_ptr.vmem [resolvable:$true] %s286_s14 }
  0x17   : > { %p11572_p7 = pnand %p10994_p6, %p13171_p1 }
  0x19   : > { %s13195_s12 = scalar_select %p11572_p7, 1, 0 }
  0x1a   : > { %p11586_p9 = pneg %p11572_p7 }
  0x1c   : > { %s11168_s17 = scalar_lea.hbm %s13196_s1, 4096 }
  0x1d   : > { %p11169_p8 = scmp.ne.s32.totalorder %s13196_s1, %s11168_s17  ;;  %p11175_p12 = scmp.lt.u32.totalorder %s11168_s17, %s13196_s1 }
  0x1e   : > { %s13197_s20 = scalar_select %p11586_p9, 1, 0 }
  0x1f   : > { %p11171_p10 = pnand %p11586_p9, %p11169_p8 }
  0x21   : > { %p11172_p11 = pneg %p11171_p10 }
  0x23   : > { %p11177_p13 = pnand %p11175_p12, %p11172_p11 }
  0x25   : > { %11180 = shalt.err (!%p11177_p13)
}
  0x26   : > { %s11181_s23 = scalar_lea.vmem %s262_s11, 4096  ;;  %p11189_p6 = scmp.lt.s32.totalorder %s262_s11, %s262_s11 }
  0x27   : > { %p11182_p0 = scmp.ne.s32.totalorder %s262_s11, %s11181_s23  ;;  %p11190_p1 = scmp.lt.s32.totalorder %s11181_s23, %s11181_s23 }
  0x29   : > { %p11184_p2 = pnand %p11182_p0, %p11586_p9  ;;  %p11191_p4 = por %p11190_p1, %p11189_p6 }
  0x2b   : > { %p11185_p3 = pneg %p11184_p2 }
  0x2d   : > { %p11192_p5 = pnand %p11191_p4, %p11185_p3 }
  0x2f   : > { %11195 = shalt.err (!%p11192_p5)
}
  0x30   : > { %s13175_s24 = smov 1024   ;;  %s13174_s10 = smov 64  }
  0x31   : > { %11000 = dma.hbm_to_vmem [thread:$0]  (!%p11572_p7), %s13196_s1, 4096, %s262_s11, [#allocation8], %s13175_s24, %s13175_s24, %s13174_s10  }
  0x32   : > { %s13198_s6 = sld [smem:[#allocation28_spill]] }
  0x38   : > { %s11196_s18 = scalar_lea.hbm %s13198_s6, 16 }
  0x39   : > { %p11197_p1 = scmp.ne.s32.totalorder %s13198_s6, %s11196_s18  ;;  %p11203_p8 = scmp.lt.u32.totalorder %s11196_s18, %s13198_s6 }
  0x3b   : > { %p11199_p4 = pnand %p11197_p1, %p11586_p9 }
  0x3d   : > { %p11200_p5 = pneg %p11199_p4 }
  0x3f   : > { %p11205_p10 = pnand %p11203_p8, %p11200_p5 }
  0x41   : > { %11208 = shalt.err (!%p11205_p10)
}
  0x42   : > { %s11209_s11 = scalar_lea.vmem %s11576_s14, 16  ;;  %s11216_s13 = scalar_lea.vmem %s11576_s14, 32 }
  0x43   : > { %p11210_p11 = scmp.ne.s32.totalorder %s11576_s14, %s11209_s11  ;;  %p11217_p0 = scmp.lt.s32.totalorder %s11576_s14, %s11576_s14 }
  0x44   : > { %p11218_p2 = scmp.lt.s32.totalorder %s11216_s13, %s11209_s11 }
  0x45   : > { %p11212_p12 = pnand %p11210_p11, %p11586_p9 }
  0x46   : > { %p11219_p3 = por %p11218_p2, %p11217_p0 }
  0x47   : > { %p11213_p13 = pneg %p11212_p12 }
  0x49   : > { %p11220_p6 = pnand %p11219_p3, %p11213_p13 }
  0x4b   : > { %11223 = shalt.err (!%p11220_p6)
}
  0x4c   : > { %11006 = dma.hbm_to_vmem [thread:$0]  (!%p11572_p7), %s13198_s6, 16, %s11576_s14, [#allocation14]  }
  0x4d   : > { %s35_s17 = sadd.s32 1, %s11462_s28  ;;  %s113_s18 = sadd.s32 1, %s11454_s26 }
  0x4e   : > { %p36_p1 = scmp.ge.s32.totalorder %s35_s17, 2  ;;  %p120_p4 = scmp.ne.s32.totalorder %s11454_s26, %s11450_s25 }
  0x4f   : > { %p121_p5 = scmp.eq.s32.totalorder %s11466_s29, 0  ;;  %p11021_p8 = scmp.lt.s32.totalorder %s11466_s29, 2 }
  0x50   : > { %s13228_s17 = smov (%p36_p1, %s35_s17), 0  ;;  %s13176_s19 = sand.u32 1, %s11466_s29  }
  0x51   : > { %13199 = sst [smem:[#allocation24_spill]] %s13228_s17  ;;  %p122_p10 = por %p121_p5, %p120_p4 }
  0x52   : > { %s110_s21 = ssub.s32 %s11462_s28, %s13228_s17  ;;  %s11641_s22 = sand.u32 1, %s11454_s26  }
  0x53   : > { %p111_p11 = scmp.eq.s32.totalorder %s110_s21, 0  ;;  %s9573_s23 = sshll.u32 %s11641_s22, 13 }
  0x54   : > { %s10749_s14 = sshll.u32 %s11462_s28, 9  ;;  %s13201_s3 = sld [smem:[#allocation27_spill]] }
  0x55   : > { %s11646_s11 = scalar_select %p111_p11, %s11454_s26, %s113_s18  }
  0x56   : > { %s301_s10 = scalar_lea.vmem [#allocation10], %s9573_s23  ;;  %p11655_p12 = pnand %p11021_p8, %p122_p10 }
  0x57   : > { %13200 = sst [smem:[#allocation25_spill]] %s11646_s11  ;;  %s308_s24 = sshll.u32 %s301_s10, 4  ;;  %s11659_s24 = int_to_ptr.vmem [resolvable:$true] %s308_s24 }
  0x58   : > { %s13202_s21 = scalar_select %p11655_p12, 1, 0 }
  0x59   : > { %s11663_s18 = scalar_lea.sflag [#allocation11], %s13176_s19  ;;  %p11669_p0 = pneg %p11655_p12 }
  0x5a   : > { %s11651_s16 = scalar_lea.hbm %s13201_s3, %s10749_s14  ;;  %s11229_s15 = scalar_lea.hbm %s13201_s3, 262144 }
  0x5b   : > { %s11224_s13 = scalar_lea.hbm %s11651_s16, 131072  ;;  %p11230_p6 = scmp.lt.u32.totalorder %s11651_s16, %s13201_s3 }
  0x5c   : > { %p11225_p13 = scmp.ne.s32.totalorder %s11651_s16, %s11224_s13  ;;  %p11231_p1 = scmp.lt.u32.totalorder %s11229_s15, %s11224_s13 }
  0x5d   : > { %s13203_s14 = scalar_select %p11669_p0, 1, 0 }
  0x5e   : > { %p11227_p2 = pnand %p11669_p0, %p11225_p13  ;;  %p11232_p4 = por %p11231_p1, %p11230_p6 }
  0x5f   : > { %p11233_p5 = scmp.lt.u32.totalorder %s11224_s13, %s11651_s16 }
  0x60   : > { %p11228_p3 = pneg %p11227_p2 }
  0x61   : > { %p11234_p8 = por %p11233_p5, %p11232_p4 }
  0x63   : > { %p11235_p10 = pnand %p11234_p8, %p11228_p3 }
  0x65   : > { %11238 = shalt.err (!%p11235_p10)
}
  0x66   : > { %s11239_s19 = scalar_lea.vmem %s11659_s24, 131072  ;;  %s11472_s10 = smov [#allocation10]  }
  0x67   : > { %p11240_p11 = scmp.ne.s32.totalorder %s11659_s24, %s11239_s19  ;;  %s11244_s23 = sshll.u32 %s11472_s10, 4  ;;  %s11245_s23 = int_to_ptr.vmem [resolvable:$false] %s11244_s23 }
  0x68   : > { %s11246_s1 = scalar_lea.vmem %s11245_s23, 262144  ;;  %p11247_p7 = scmp.lt.s32.totalorder %s11659_s24, %s11245_s23 }
  0x69   : > { %p11242_p13 = pnand %p11240_p11, %p11669_p0  ;;  %p11248_p9 = scmp.lt.s32.totalorder %s11246_s1, %s11239_s19 }
  0x6b   : > { %p11243_p2 = pneg %p11242_p13  ;;  %p11249_p6 = por %p11248_p9, %p11247_p7 }
  0x6d   : > { %p11250_p1 = pnand %p11249_p6, %p11243_p2 }
  0x6f   : > { %11253 = shalt.err (!%p11250_p1)
}
  0x70   : > { %s11473_s6 = smov 512   ;;  %s11474_s13 = smov 32  }
  0x71   : > { %s13204_s15 = smov 1024   ;;  %s11475_s3 = smov [#allocation4]  }
  0x72   : > { %11010 = dma.hbm_to_vmem [thread:$0]  (!%p11655_p12), %s11651_s16, 131072, %s11659_s24, %s11663_s18, %s13204_s15, %s11473_s6, %s11474_s13  }
  0x73   : > { %s251_s17 = sshll.u32 %s11475_s3, 4  ;;  %s11254_s19 = scalar_lea.hbm %s13163_s0, 128  ;;  %s252_s17 = int_to_ptr.vmem [resolvable:$true] %s251_s17 }
  0x74   : > { %p11255_p7 = scmp.ne.s32.totalorder %s13163_s0, %s11254_s19  ;;  %p13205_p9 = scmp.ne.s32.totalorder %s13197_s20, 0 }
  0x75   : > { %p11261_p5 = scmp.lt.u32.totalorder %s11254_s19, %s13163_s0 }
  0x76   : > { %p11257_p3 = pnand %p11255_p7, %p13205_p9 }
  0x78   : > { %p11258_p4 = pneg %p11257_p3 }
  0x7a   : > { %p11263_p8 = pnand %p11261_p5, %p11258_p4 }
  0x7c   : > { %11266 = shalt.err (!%p11263_p8)
}
  0x7d   : > { %s11267_s24 = scalar_lea.vmem %s252_s17, 128  ;;  %p11275_p2 = scmp.lt.s32.totalorder %s252_s17, %s252_s17 }
  0x7e   : > { %p11268_p10 = scmp.ne.s32.totalorder %s252_s17, %s11267_s24  ;;  %p11276_p6 = scmp.lt.s32.totalorder %s11267_s24, %s11267_s24 }
  0x80   : > { %p11270_p11 = pnand %p11268_p10, %p13205_p9  ;;  %p11277_p1 = por %p11276_p6, %p11275_p2 }
  0x82   : > { %p11271_p13 = pneg %p11270_p11 }
  0x84   : > { %p11278_p12 = pnand %p11277_p1, %p11271_p13 }
  0x86   : > { %11281 = shalt.err (!%p11278_p12)
}
  0x87   : > { %p13206_p7 = scmp.ne.s32.totalorder %s13195_s12, 0  ;;  %s11476_s7 = smov [#allocation9]  }
  0x88   : > { %s275_s26 = sshll.u32 %s11476_s7, 4  ;;  %s9576_s16 = sshll.u32 %s11641_s22, 3  ;;  %s276_s26 = int_to_ptr.vmem [resolvable:$true] %s275_s26 }
  0x89   : > { %10997 = dma.hbm_to_vmem [thread:$0]  (!%p13206_p7), %s13163_s0, 128, %s252_s17, [#allocation5]  }
  0x8a   : > { %s11282_s15 = scalar_lea.hbm %s13165_s2, 256 }
  0x8b   : > { %p11283_p12 = scmp.ne.s32.totalorder %s13165_s2, %s11282_s15  ;;  %p11289_p5 = scmp.lt.u32.totalorder %s11282_s15, %s13165_s2 }
  0x8d   : > { %p11285_p3 = pnand %p11283_p12, %p13205_p9 }
  0x8f   : > { %p11286_p4 = pneg %p11285_p3 }
  0x91   : > { %p11291_p8 = pnand %p11289_p5, %p11286_p4 }
  0x93   : > { %11294 = shalt.err (!%p11291_p8)
}
  0x94   : > { %s11295_s17 = scalar_lea.vmem %s276_s26, 256  ;;  %p11303_p2 = scmp.lt.s32.totalorder %s276_s26, %s276_s26 }
  0x95   : > { %p11296_p10 = scmp.ne.s32.totalorder %s276_s26, %s11295_s17  ;;  %p11304_p6 = scmp.lt.s32.totalorder %s11295_s17, %s11295_s17 }
  0x97   : > { %p11298_p11 = pnand %p11296_p10, %p13205_p9  ;;  %p11305_p1 = por %p11304_p6, %p11303_p2 }
  0x99   : > { %p11299_p13 = pneg %p11298_p11 }
  0x9b   : > { %p11306_p0 = pnand %p11305_p1, %p11299_p13 }
  0x9d   : > { %11309 = shalt.err (!%p11306_p0)
}
  0x9e   : > { %11003 = dma.hbm_to_vmem [thread:$0]  (!%p13206_p7), %s13165_s2, 256, %s276_s26, [#allocation8]  }
  0x9f   : > { %s10750_s11 = sshll.u32 %s11462_s28, 7  ;;  %s322_s7 = scalar_lea.vmem [#allocation12], %s9576_s16 }
  0xa0   : > { %s330_s6 = sshll.u32 %s322_s7, 4  ;;  %s328_s15 = scalar_lea.hbm %s13167_s4, %s10750_s11  ;;  %s331_s6 = int_to_ptr.vmem [resolvable:$true] %s330_s6 }
  0xa1   : > { %s11310_s10 = scalar_lea.hbm %s328_s15, 128  ;;  %p13207_p12 = scmp.ne.s32.totalorder %s13203_s14, 0 }
  0xa2   : > { %p11311_p9 = scmp.ne.s32.totalorder %s328_s15, %s11310_s10  ;;  %s11315_s23 = scalar_lea.hbm %s13167_s4, 256 }
  0xa3   : > { %p11316_p7 = scmp.lt.u32.totalorder %s328_s15, %s13167_s4  ;;  %p11317_p4 = scmp.lt.u32.totalorder %s11315_s23, %s11310_s10 }
  0xa4   : > { %p11313_p0 = pnand %p11311_p9, %p13207_p12  ;;  %p11319_p8 = scmp.lt.u32.totalorder %s11310_s10, %s328_s15 }
  0xa5   : > { %p11318_p5 = por %p11317_p4, %p11316_p7 }
  0xa6   : > { %p11314_p3 = pneg %p11313_p0 }
  0xa7   : > { %p11320_p10 = por %p11319_p8, %p11318_p5 }
  0xa9   : > { %p11321_p11 = pnand %p11320_p10, %p11314_p3 }
  0xab   : > { %11324 = shalt.err (!%p11321_p11)
}
  0xac   : > { %s11325_s26 = scalar_lea.vmem %s331_s6, 128  ;;  %s11477_s16 = smov [#allocation12]  }
  0xad   : > { %p11326_p13 = scmp.ne.s32.totalorder %s331_s6, %s11325_s26  ;;  %s11330_s24 = sshll.u32 %s11477_s16, 4  ;;  %s11331_s24 = int_to_ptr.vmem [resolvable:$false] %s11330_s24 }
  0xae   : > { %s11332_s3 = scalar_lea.vmem %s11331_s24, 256  ;;  %p11333_p1 = scmp.lt.s32.totalorder %s331_s6, %s11331_s24 }
  0xaf   : > { %p11328_p2 = pnand %p11326_p13, %p13207_p12  ;;  %p11334_p9 = scmp.lt.s32.totalorder %s11332_s3, %s11325_s26 }
  0xb1   : > { %p11329_p6 = pneg %p11328_p2  ;;  %p11335_p0 = por %p11334_p9, %p11333_p1 }
  0xb3   : > { %p11336_p4 = pnand %p11335_p0, %p11329_p6 }
  0xb5   : > { %11339 = shalt.err (!%p11336_p4)
}
  0xb6   : > { %p13208_p7 = scmp.ne.s32.totalorder %s13202_s21, 0  ;;  %s9579_s11 = sshll.u32 %s11641_s22, 9 }
  0xb7   : > { %s10751_s7 = sshll.u32 %s11462_s28, 13  ;;  %s341_s12 = scalar_lea.vmem [#allocation13], %s9579_s11 }
  0xb8   : > { %11013 = dma.hbm_to_vmem [thread:$0]  (!%p13208_p7), %s328_s15, 128, %s331_s6, %s11663_s18  }
  0xb9   : > { %s11753_s10 = scalar_lea.hbm %s13168_s5, %s10751_s7  ;;  %s348_s19 = sshll.u32 %s341_s12, 4  ;;  %s11755_s19 = int_to_ptr.vmem [resolvable:$true] %s348_s19 }
  0xba   : > { %s13209_s23 = sand.u32 1, %s11466_s29   ;;  %s11340_s17 = scalar_lea.hbm %s11753_s10, 8192 }
  0xbb   : > { %s11759_s1 = scalar_lea.sflag [#allocation14], %s13209_s23  ;;  %p11341_p3 = scmp.ne.s32.totalorder %s11753_s10, %s11340_s17 }
  0xbc   : > { %s11345_s6 = scalar_lea.hbm %s13168_s5, 16384  ;;  %p11346_p10 = scmp.lt.u32.totalorder %s11753_s10, %s13168_s5 }
  0xbd   : > { %p11343_p5 = pnand %p11341_p3, %p13207_p12  ;;  %p11347_p11 = scmp.lt.u32.totalorder %s11345_s6, %s11340_s17 }
  0xbe   : > { %p11349_p2 = scmp.lt.u32.totalorder %s11340_s17, %s11753_s10 }
  0xbf   : > { %p11344_p8 = pneg %p11343_p5  ;;  %p11348_p13 = por %p11347_p11, %p11346_p10 }
  0xc1   : > { %p11350_p6 = por %p11349_p2, %p11348_p13 }
  0xc3   : > { %p11351_p1 = pnand %p11350_p6, %p11344_p8 }
  0xc5   : > { %11354 = shalt.err (!%p11351_p1)
}
  0xc6   : > { %s11355_s16 = scalar_lea.vmem %s11755_s19, 8192  ;;  %s11478_s24 = smov [#allocation13]  }
  0xc7   : > { %p11356_p9 = scmp.ne.s32.totalorder %s11755_s19, %s11355_s16  ;;  %s11360_s3 = sshll.u32 %s11478_s24, 4  ;;  %s11361_s3 = int_to_ptr.vmem [resolvable:$false] %s11360_s3 }
  0xc8   : > { %s11362_s11 = scalar_lea.vmem %s11361_s3, 16384  ;;  %p11363_p3 = scmp.lt.s32.totalorder %s11755_s19, %s11361_s3 }
  0xc9   : > { %p11358_p0 = pnand %p11356_p9, %p13207_p12  ;;  %p11364_p5 = scmp.lt.s32.totalorder %s11362_s11, %s11355_s16 }
  0xcb   : > { %p11359_p4 = pneg %p11358_p0  ;;  %p11365_p10 = por %p11364_p5, %p11363_p3 }
  0xcd   : > { %p11366_p11 = pnand %p11365_p10, %p11359_p4 }
  0xcf   : > { %11369 = shalt.err (!%p11366_p11)
}
  0xd0   : > { %s11479_s7 = smov 4   ;;  %s13210_s13 = smov 64  }
  0xd1   : > { %11016 = dma.hbm_to_vmem [thread:$0]  (!%p13208_p7), %s11753_s10, 8192, %s11755_s19, %s11759_s1, %s13210_s13, %s13210_s13, %s11479_s7  }
  0xd2   : > { %p13211_p12 = scmp.ne.s32.totalorder %s13194_s9, 0 }
  0xd3   : > { %p13212_p8 = scmp.eq.s32.totalorder (!%p13211_p12), %s11552_s30, 0 }
  0xd4   : > { %360 = sbr.rel (%p13211_p12) target bundleno = 2005 (0x7d5), region = 48 }
  0xdb   : > { %11421 = dma.done.wait (%p13212_p8), [#allocation5], 128   ;;  %p13213_p13 = pmov %p13212_p8 }
  0xdc   : > { %p13214_p2 = pmov %p13212_p8 }
  0xdd   : > { %11423 = vsyncadd (%p13213_p13), [#allocation5], 4294967168 }
  0xde   : > { %11425 = dma.done.wait (%p13214_p2), [#allocation8], 4352   ;;  %p13215_p6 = pmov %p13214_p2 }
  0xdf   : > { %s374_s21 = sand.u32 1, %s11552_s30   ;;  %s376_s14 = sand.u32 1, %s11450_s25  }
  0xe0   : > { %11427 = vsyncadd (%p13215_p6), [#allocation8], 4294962944  ;;  %s9586_s20 = sshll.u32 %s376_s14, 13  ;;  %s375_s9 = scalar_lea.sflag [#allocation11], %s374_s21 }
  0xe1   : > { %s11797_s10 = scalar_lea.vmem [#allocation10], %s9586_s20  ;;  %p13216_p7 = scmp.ne.s32.totalorder %s13193_s8, 0 }
  0xe3   : > { %11429 = dma.done.wait (%p13216_p7), %s375_s9, 131200  }
  0xe4   : > { %11431 = vsyncadd (%p13216_p7), %s375_s9, 4294836096  ;;  %s9587_s12 = sshll.u32 %s376_s14, 3  ;;  %s9588_s19 = sshll.u32 %s376_s14, 9 }
  0xe5   : > { %s11803_s23 = scalar_lea.vmem [#allocation12], %s9587_s12  ;;  %s393_s1 = scalar_lea.sflag [#allocation14], %s374_s21 }
  0xe6   : > { %s11805_s17 = scalar_lea.vmem [#allocation13], %s9588_s19 }
  0xe7   : > { %11433 = dma.done.wait (%p13216_p7), %s393_s1, 8192  }
  0xe8   : > { %11435 = vsyncadd (%p13216_p7), %s393_s1, 4294959104  ;;  %p13217_p1 = pmov %p13214_p2 }
  0xea   : > { %11437 = dma.done.wait (%p13217_p1), [#allocation14], 16   ;;  %p13218_p9 = pmov %p13217_p1 }
  0xeb   : > { %p9590_p0 = scmp.ne.s32.totalorder %s11458_s27, 0 }
  0xec   : > { %11439 = vsyncadd (%p13218_p9), [#allocation14], 4294967280  ;;  %v446_v0 = vld [vmem:[#allocation7] sm:$0xff] (!%p9590_p0)  ;;  %v447_v2 = vld [vmem:[#allocation7 + $0x8] sm:$0xff] (!%p9590_p0)  ;;  %v11480_v8 = vmov (!%p9590_p0), 0   ;;  %vm722_vm0 = vcmask (!%p9590_p0), 261120  }
  0xed   : > { %443 = sbr.rel (%p9590_p0) target bundleno = 492 (0x1ec), region = 80  ;;  %v454_v1 = vld [vmem:[#allocation7 + $0x40] sm:$0xff] (!%p9590_p0)  ;;  %v455_v4 = vld [vmem:[#allocation7 + $0x48] sm:$0xff] (!%p9590_p0)  ;;  %758 = vmatprep.mubr.bf16.mxu0 (!%p9590_p0), %v11480_v8  ;;  %799 = vmatprep.mubr.bf16.mxu1 (!%p9590_p0), %v11480_v8  ;;  %v448_v15 = vld [vmem:[#allocation7 + $0x10] sm:$0xff] (!%p9590_p0) }
  0xee   : > { %v9592_v3 = vcombine.high (!%p9590_p0), %v446_v0, %v454_v1  ;;  %v9591_v5 = vcombine.low (!%p9590_p0), %v446_v0, %v454_v1  ;;  %v462_v6 = vld [vmem:[#allocation7 + $0x80] sm:$0xff] (!%p9590_p0)  ;;  %v9594_v9 = vcombine.high (!%p9590_p0), %v447_v2, %v455_v4  ;;  %v9593_v10 = vcombine.low (!%p9590_p0), %v447_v2, %v455_v4  ;;  %v463_v12 = vld [vmem:[#allocation7 + $0x88] sm:$0xff] (!%p9590_p0)  ;;  %v456_v16 = vld [vmem:[#allocation7 + $0x50] sm:$0xff] (!%p9590_p0) }
  0xef   : > { %v470_v7 = vld [vmem:[#allocation7 + $0xc0] sm:$0xff] (!%p9590_p0)  ;;  %v471_v13 = vld [vmem:[#allocation7 + $0xc8] sm:$0xff] (!%p9590_p0)  ;;  %v449_v17 = vld [vmem:[#allocation7 + $0x18] sm:$0xff] (!%p9590_p0)  ;;  %v9596_v22 = vcombine.high (!%p9590_p0), %v448_v15, %v456_v16  ;;  %v9595_v29 = vcombine.low (!%p9590_p0), %v448_v15, %v456_v16  ;;  %v482_v4 = vlaneseq (!%p9590_p0) }
  0xf0   : > { %v9608_v11 = vcombine.high (!%p9590_p0), %v462_v6, %v470_v7  ;;  %726 = vmatprep.subr.bf16.mxu0 (!%p9590_p0), %v9592_v3  ;;  %v9610_v14 = vcombine.high (!%p9590_p0), %v463_v12, %v471_v13  ;;  %767 = vmatprep.subr.bf16.mxu1 (!%p9590_p0), %v9594_v9  ;;  %v9607_v18 = vcombine.low (!%p9590_p0), %v462_v6, %v470_v7  ;;  %v444_v19 = vld [vmem:[#allocation4] sm:$0xff] (!%p9590_p0)  ;;  %v464_v24 = vld [vmem:[#allocation7 + $0x90] sm:$0xff] (!%p9590_p0)  ;;  %v450_v33 = vld [vmem:[#allocation7 + $0x20] sm:$0xff] (!%p9590_p0)  ;;  %v11481_v3 = vmov (!%p9590_p0), 0.0  }
  0xf1   : > { %727 = vmatpush1.bf16.msra.mxu0 (!%p9590_p0), %v9591_v5  ;;  %v457_v20 = vld [vmem:[#allocation7 + $0x58] sm:$0xff] (!%p9590_p0)  ;;  %768 = vmatpush1.bf16.msra.mxu1 (!%p9590_p0), %v9593_v10  ;;  %v9609_v21 = vcombine.low (!%p9590_p0), %v463_v12, %v471_v13  ;;  %v472_v25 = vld [vmem:[#allocation7 + $0xd0] sm:$0xff] (!%p9590_p0)  ;;  %v11818_v26 = vpack.c.bf16 (!%p9590_p0), %v444_v19, %v444_v19  ;;  %v458_v34 = vld [vmem:[#allocation7 + $0x60] sm:$0xff] (!%p9590_p0)  ;;  %1142 = vst [vmem:[#allocation3] sm:$0xff] (!%p9590_p0), %v11481_v3  ;;  %v11842_v5 = vshrl.u32 (!%p9590_p0), %v482_v4, 7 }
  0xf2   : > { %728 = vmatprep.subr.bf16.mxu0 (!%p9590_p0), %v9608_v11  ;;  %769 = vmatprep.subr.bf16.mxu1 (!%p9590_p0), %v9610_v14  ;;  %v9598_v23 = vcombine.high (!%p9590_p0), %v449_v17, %v457_v20  ;;  %v465_v27 = vld [vmem:[#allocation7 + $0x98] sm:$0xff] (!%p9590_p0)  ;;  %v9597_v30 = vcombine.low (!%p9590_p0), %v449_v17, %v457_v20  ;;  %v9612_v31 = vcombine.high (!%p9590_p0), %v464_v24, %v472_v25  ;;  %v451_v35 = vld [vmem:[#allocation7 + $0x28] sm:$0xff] (!%p9590_p0)  ;;  %v466_v41 = vld [vmem:[#allocation7 + $0xa0] sm:$0xff] (!%p9590_p0) }
  0xf3   : > { %v473_v28 = vld [vmem:[#allocation7 + $0xd8] sm:$0xff] (!%p9590_p0)  ;;  %v459_v36 = vld [vmem:[#allocation7 + $0x68] sm:$0xff] (!%p9590_p0)  ;;  %v9611_v37 = vcombine.low (!%p9590_p0), %v464_v24, %v472_v25  ;;  %v9600_v39 = vcombine.high (!%p9590_p0), %v450_v33, %v458_v34  ;;  %v474_v42 = vld [vmem:[#allocation7 + $0xe0] sm:$0xff] (!%p9590_p0)  ;;  %v9599_v45 = vcombine.low (!%p9590_p0), %v450_v33, %v458_v34  ;;  %v484_v6 = vsub.s32 (!%p9590_p0), 0, %v11842_v5 }
  0xf4   : > { %v9614_v32 = vcombine.high %v465_v27, %v473_v28  ;;  %v9613_v38 = vcombine.low %v465_v27, %v473_v28  ;;  %v9602_v40 = vcombine.high %v451_v35, %v459_v36  ;;  %v467_v43 = vld [vmem:[#allocation7 + $0xa8] sm:$0xff]  ;;  %v9601_v46 = vcombine.low %v451_v35, %v459_v36  ;;  %v452_v49 = vld [vmem:[#allocation7 + $0x30] sm:$0xff]  ;;  %v453_v51 = vld [vmem:[#allocation7 + $0x38] sm:$0xff] }
  0xf5   : > { %729 = vmatpush1.bf16.msra.mxu0 %v9607_v18  ;;  %770 = vmatpush1.bf16.msra.mxu1 %v9609_v21  ;;  %v475_v44 = vld [vmem:[#allocation7 + $0xe8] sm:$0xff]  ;;  %v9616_v47 = vcombine.high %v466_v41, %v474_v42  ;;  %v460_v50 = vld [vmem:[#allocation7 + $0x70] sm:$0xff]  ;;  %v461_v52 = vld [vmem:[#allocation7 + $0x78] sm:$0xff]  ;;  %v9615_v53 = vcombine.low %v466_v41, %v474_v42  ;;  %v492_v9 = vsub.s32 2, %v11842_v5  ;;  %v496_v10 = vsub.s32 3, %v11842_v5 }
  0xf6   : > { %808 = vmatprep.subr.bf16.mxu0 %v9596_v22  ;;  %849 = vmatprep.subr.bf16.mxu1 %v9598_v23  ;;  %v9618_v48 = vcombine.high %v467_v43, %v475_v44  ;;  %v9617_v54 = vcombine.low %v467_v43, %v475_v44  ;;  %v9604_v55 = vcombine.high %v452_v49, %v460_v50  ;;  %v468_v57 = vld [vmem:[#allocation7 + $0xb0] sm:$0xff]  ;;  %v469_v59 = vld [vmem:[#allocation7 + $0xb8] sm:$0xff]  ;;  %v478_v7 = vld [vmem:[#allocation9] sm:$0xff]  ;;  %v500_v19 = vsub.s32 4, %v11842_v5 }
  0xf7   : > { %v9606_v56 = vcombine.high %v453_v51, %v461_v52  ;;  %v476_v58 = vld [vmem:[#allocation7 + $0xf0] sm:$0xff]  ;;  %v477_v60 = vld [vmem:[#allocation7 + $0xf8] sm:$0xff]  ;;  %v9603_v61 = vcombine.low %v452_v49, %v460_v50  ;;  %v9605_v62 = vcombine.low %v453_v51, %v461_v52  ;;  %v485_v11 = vrot.slane %v478_v7, %v484_v6  ;;  %v479_v49 = vld [vmem:[#allocation9 + $0x8] sm:$0xff] }
  0xf8   : > { %9623 = vmatmul.mubr.msk.bf16.vlgmr.msra.gmra.mrb[0].mxu0 %vm722_vm0, %v11818_v26  ;;  %9624 = vmatmul.mubr.msk.bf16.vlgmr.msra.gmra.mrb[0].mxu1 %vm722_vm0, %v11818_v26  ;;  %v9620_v63 = vcombine.high %v468_v57, %v476_v58  ;;  %v9622_v0 = vcombine.high %v469_v59, %v477_v60  ;;  %v9619_v1 = vcombine.low %v468_v57, %v476_v58  ;;  %v508_v24 = vsub.s32 6, %v11842_v5 }
  0xf9   : > { %809 = vmatpush1.bf16.msra.mxu0 %v9595_v29  ;;  %850 = vmatpush1.bf16.msra.mxu1 %v9597_v30  ;;  %v9621_v2 = vcombine.low %v469_v59, %v477_v60  ;;  %v493_v12 = vrot.slane %v478_v7, %v492_v9  ;;  %v497_v14 = vrot.slane %v478_v7, %v496_v10  ;;  %v504_v25 = vsub.s32 5, %v11842_v5 }
  0xfa   : > { %810 = vmatprep.subr.bf16.mxu0 %v9612_v31  ;;  %851 = vmatprep.subr.bf16.mxu1 %v9614_v32  ;;  %v512_v30 = vsub.s32 7, %v11842_v5  ;;  %v501_v35 = vrot.slane %v478_v7, %v500_v19  ;;  %v517_v58 = vrot.slane %v479_v49, %v484_v6  ;;  %v525_v60 = vrot.slane %v479_v49, %v492_v9 }
  0xfb   : > { %840 = vmatprep.mubr.bf16.mxu0 %v11480_v8  ;;  %881 = vmatprep.mubr.bf16.mxu1 %v11480_v8 }
  0xfd   : > { %811 = vmatpush1.bf16.msra.mxu0 %v9611_v37  ;;  %852 = vmatpush1.bf16.msra.mxu1 %v9613_v38  ;;  %v509_v37 = vrot.slane %v478_v7, %v508_v24  ;;  %v505_v38 = vrot.slane %v478_v7, %v504_v25 }
  0xfe   : > { %890 = vmatprep.subr.bf16.mxu0 %v9600_v39  ;;  %931 = vmatprep.subr.bf16.mxu1 %v9602_v40  ;;  %v513_v40 = vrot.slane %v478_v7, %v512_v30 }
 0x100   : > { %9625 = vmatmul.mubr.msk.bf16.vlgmr.msra.gmra.mrb[4].mxu0 %vm722_vm0, %v11818_v26  ;;  %9626 = vmatmul.mubr.msk.bf16.vlgmr.msra.gmra.mrb[4].mxu1 %vm722_vm0, %v11818_v26 }
 0x101   : > { %891 = vmatpush1.bf16.msra.mxu0 %v9599_v45  ;;  %932 = vmatpush1.bf16.msra.mxu1 %v9601_v46 }
 0x102   : > { %892 = vmatprep.subr.bf16.mxu0 %v9616_v47  ;;  %933 = vmatprep.subr.bf16.mxu1 %v9618_v48 }
 0x103   : > { %922 = vmatprep.mubr.bf16.mxu0 %v11480_v8  ;;  %963 = vmatprep.mubr.bf16.mxu1 %v11480_v8 }
 0x105   : > { %893 = vmatpush1.bf16.msra.mxu0 %v9615_v53  ;;  %934 = vmatpush1.bf16.msra.mxu1 %v9617_v54 }
 0x106   : > { %972 = vmatprep.subr.bf16.mxu0 %v9604_v55  ;;  %1013 = vmatprep.subr.bf16.mxu1 %v9606_v56 }
 0x108   : > { %9627 = vmatmul.mubr.msk.bf16.vlgmr.msra.gmra.mrb[8].mxu0 %vm722_vm0, %v11818_v26  ;;  %9628 = vmatmul.mubr.msk.bf16.vlgmr.msra.gmra.mrb[8].mxu1 %vm722_vm0, %v11818_v26 }
 0x109   : > { %973 = vmatpush1.bf16.msra.mxu0 %v9603_v61  ;;  %1014 = vmatpush1.bf16.msra.mxu1 %v9605_v62 }
 0x10a   : > { %974 = vmatprep.subr.bf16.mxu0 %v9620_v63  ;;  %1015 = vmatprep.subr.bf16.mxu1 %v9622_v0  ;;  %v529_v63 = vrot.slane %v479_v49, %v496_v10  ;;  %v533_v10 = vrot.slane %v479_v49, %v500_v19 }
 0x10b   : > { %1004 = vmatprep.mubr.bf16.mxu0 %v11480_v8  ;;  %1045 = vmatprep.mubr.bf16.mxu1 %v11480_v8  ;;  %v488_v8 = vsub.s32 1, %v11842_v5 }
 0x10d   : > { %975 = vmatpush1.bf16.msra.mxu0 %v9619_v1  ;;  %1016 = vmatpush1.bf16.msra.mxu1 %v9621_v2  ;;  %v489_v13 = vrot.slane %v478_v7, %v488_v8  ;;  %v521_v61 = vrot.slane %v479_v49, %v488_v8 }
 0x110   : > { %9629 = vmatmul.mubr.msk.bf16.vlgmr.msra.gmra.mrb[12].mxu0 %vm722_vm0, %v11818_v26  ;;  %9630 = vmatmul.mubr.msk.bf16.vlgmr.msra.gmra.mrb[12].mxu1 %vm722_vm0, %v11818_v26 }
 0x1cb   : > { %v760_v15 = vpop.f32.mrb[0].mxu0  ;;  %v801_v17 = vpop.f32.mrb[0].mxu1 }
 0x1cc   : > { %v761_v16 = vadd.f32 %v760_v15, %v485_v11  ;;  %v762_v18 = vpop.f32.mrb[1].mxu0  ;;  %v802_v20 = vadd.f32 %v801_v17, %v493_v12  ;;  %v803_v22 = vpop.f32.mrb[1].mxu1 }
 0x1cd   : > { %v763_v21 = vadd.f32 %v762_v18, %v489_v13  ;;  %v764_v23 = vpop.f32.mrb[2].mxu0  ;;  %v804_v27 = vadd.f32 %v803_v22, %v497_v14  ;;  %v805_v28 = vpop.f32.mrb[2].mxu1 }
 0x1ce   : > { %v1054_v26 = vmax.f32 %v761_v16, 0.0  ;;  %v765_v29 = vpop.f32.mrb[3].mxu0  ;;  %v1056_v31 = vmax.f32 %v802_v20, 0.0  ;;  %v806_v33 = vpop.f32.mrb[3].mxu1  ;;  %v541_v20 = vrot.slane %v479_v49, %v508_v24  ;;  %v545_v23 = vrot.slane %v479_v49, %v512_v30 }
 0x1cf   : > { %v1055_v32 = vmax.f32 %v763_v21, 0.0  ;;  %v1057_v34 = vmax.f32 %v804_v27, 0.0  ;;  %v537_v21 = vrot.slane %v479_v49, %v504_v25 }
 0x1d1   : > { %v10752_v36 = vpack.c.bf16 %v1055_v32, %v1054_v26  ;;  %v10753_v39 = vpack.c.bf16 %v1057_v34, %v1056_v31 }
 0x1d3   : > { %1134 = vst [vmem:[#allocation2] sm:$0xff] %v10752_v36  ;;  %v842_v41 = vpop.f32.mrb[4].mxu0  ;;  %1135 = vst [vmem:[#allocation2 + $0x8] sm:$0xff] %v10753_v39  ;;  %v883_v43 = vpop.f32.mrb[4].mxu1 }
 0x1d4   : > { %v843_v42 = vadd.f32 %v842_v41, %v501_v35  ;;  %v844_v44 = vpop.f32.mrb[5].mxu0  ;;  %v884_v45 = vadd.f32 %v883_v43, %v509_v37  ;;  %v885_v47 = vpop.f32.mrb[5].mxu1 }
 0x1d5   : > { %v845_v46 = vadd.f32 %v844_v44, %v505_v38  ;;  %v846_v48 = vpop.f32.mrb[6].mxu0  ;;  %v886_v51 = vadd.f32 %v885_v47, %v513_v40  ;;  %v887_v52 = vpop.f32.mrb[6].mxu1 }
 0x1d6   : > { %v1058_v50 = vmax.f32 %v843_v42, 0.0  ;;  %v847_v53 = vpop.f32.mrb[7].mxu0  ;;  %v1060_v54 = vmax.f32 %v884_v45, 0.0  ;;  %v888_v56 = vpop.f32.mrb[7].mxu1 }
 0x1d7   : > { %v1059_v55 = vmax.f32 %v845_v46, 0.0  ;;  %v1061_v57 = vmax.f32 %v886_v51, 0.0 }
 0x1d9   : > { %v10754_v59 = vpack.c.bf16 %v1059_v55, %v1058_v50  ;;  %v10755_v62 = vpack.c.bf16 %v1061_v57, %v1060_v54 }
 0x1db   : > { %1136 = vst [vmem:[#allocation2 + $0x10] sm:$0xff] %v10754_v59  ;;  %v924_v0 = vpop.f32.mrb[8].mxu0  ;;  %1137 = vst [vmem:[#allocation2 + $0x18] sm:$0xff] %v10755_v62  ;;  %v965_v2 = vpop.f32.mrb[8].mxu1 }
 0x1dc   : > { %v925_v1 = vadd.f32 %v924_v0, %v517_v58  ;;  %v926_v3 = vpop.f32.mrb[9].mxu0  ;;  %v966_v4 = vadd.f32 %v965_v2, %v525_v60  ;;  %v967_v11 = vpop.f32.mrb[9].mxu1 }
 0x1dd   : > { %v927_v7 = vadd.f32 %v926_v3, %v521_v61  ;;  %v928_v12 = vpop.f32.mrb[10].mxu0  ;;  %v968_v14 = vadd.f32 %v967_v11, %v529_v63  ;;  %v969_v15 = vpop.f32.mrb[10].mxu1 }
 0x1de   : > { %v1062_v13 = vmax.f32 %v925_v1, 0.0  ;;  %v929_v16 = vpop.f32.mrb[11].mxu0  ;;  %v1064_v6 = vmax.f32 %v966_v4, 0.0  ;;  %v970_v9 = vpop.f32.mrb[11].mxu1 }
 0x1df   : > { %v1063_v17 = vmax.f32 %v927_v7, 0.0  ;;  %v1065_v8 = vmax.f32 %v968_v14, 0.0 }
 0x1e1   : > { %v10756_v18 = vpack.c.bf16 %v1063_v17, %v1062_v13  ;;  %v10757_v22 = vpack.c.bf16 %v1065_v8, %v1064_v6 }
 0x1e3   : > { %1138 = vst [vmem:[#allocation2 + $0x20] sm:$0xff] %v10756_v18  ;;  %v1006_v26 = vpop.f32.mrb[12].mxu0  ;;  %1139 = vst [vmem:[#allocation2 + $0x28] sm:$0xff] %v10757_v22  ;;  %v1047_v28 = vpop.f32.mrb[12].mxu1 }
 0x1e4   : > { %v1007_v27 = vadd.f32 %v1006_v26, %v533_v10  ;;  %v1008_v29 = vpop.f32.mrb[13].mxu0  ;;  %v1048_v31 = vadd.f32 %v1047_v28, %v541_v20  ;;  %v1049_v33 = vpop.f32.mrb[13].mxu1 }
 0x1e5   : > { %v1009_v32 = vadd.f32 %v1008_v29, %v537_v21  ;;  %v1010_v34 = vpop.f32.mrb[14].mxu0  ;;  %v1050_v36 = vadd.f32 %v1049_v33, %v545_v23  ;;  %v1051_v37 = vpop.f32.mrb[14].mxu1 }
 0x1e6   : > { %v1066_v35 = vmax.f32 %v1007_v27, 0.0  ;;  %v1011_v5 = vpop.f32.mrb[15].mxu0  ;;  %v1068_v19 = vmax.f32 %v1048_v31, 0.0  ;;  %v1052_v24 = vpop.f32.mrb[15].mxu1 }
 0x1e7   : > { %v1067_v38 = vmax.f32 %v1009_v32, 0.0  ;;  %v1069_v25 = vmax.f32 %v1050_v36, 0.0 }
 0x1e9   : > { %v10758_v39 = vpack.c.bf16 %v1067_v38, %v1066_v35  ;;  %v10759_v30 = vpack.c.bf16 %v1069_v25, %v1068_v19 }
 0x1eb   : > { %1140 = vst [vmem:[#allocation2 + $0x30] sm:$0xff] %v10758_v39  ;;  %1141 = vst [vmem:[#allocation2 + $0x38] sm:$0xff] %v10759_v30 }
 0x1ec PF: > { %v1151_v40 = vld [vmem:[%s11797_s10] sm:$0xff]  ;;  %v1152_v42 = vld [vmem:[%s11797_s10 + $0x8] sm:$0xff]  ;;  %p10743_p4 = scmp.ne.s32.totalorder %s11458_s27, 1 }
 0x1ed   : > { %v1155_v41 = vld [vmem:[%s11797_s10 + $0x20] sm:$0xff]  ;;  %v1156_v44 = vld [vmem:[%s11797_s10 + $0x28] sm:$0xff] }
 0x1ee   : > { %v9656_v43 = vcombine.high %v1151_v40, %v1155_v41  ;;  %v9655_v45 = vcombine.low %v1151_v40, %v1155_v41  ;;  %v1159_v46 = vld [vmem:[%s11797_s10 + $0x40] sm:$0xff]  ;;  %v9658_v48 = vcombine.high %v1152_v42, %v1156_v44  ;;  %v9657_v49 = vcombine.low %v1152_v42, %v1156_v44  ;;  %v1160_v51 = vld [vmem:[%s11797_s10 + $0x48] sm:$0xff] }
 0x1ef   : > { %v1163_v47 = vld [vmem:[%s11797_s10 + $0x60] sm:$0xff]  ;;  %v1164_v52 = vld [vmem:[%s11797_s10 + $0x68] sm:$0xff] }
 0x1f0   : > { %v9664_v50 = vcombine.high %v1159_v46, %v1163_v47  ;;  %v1167_v53 = vld [vmem:[%s11797_s10 + $0x80] sm:$0xff]  ;;  %7393 = vmatprep.subr.bf16.mxu0 %v9656_v43  ;;  %v9666_v54 = vcombine.high %v1160_v51, %v1164_v52  ;;  %v1168_v56 = vld [vmem:[%s11797_s10 + $0x88] sm:$0xff]  ;;  %7721 = vmatprep.subr.bf16.mxu1 %v9658_v48  ;;  %v9663_v58 = vcombine.low %v1159_v46, %v1163_v47 }
 0x1f1   : > { %v1171_v55 = vld [vmem:[%s11797_s10 + $0xa0] sm:$0xff]  ;;  %v1172_v57 = vld [vmem:[%s11797_s10 + $0xa8] sm:$0xff]  ;;  %7394 = vmatpush1.bf16.msra.mxu0 %v9655_v45  ;;  %7722 = vmatpush1.bf16.msra.mxu1 %v9657_v49  ;;  %v9665_v59 = vcombine.low %v1160_v51, %v1164_v52 }
 0x1f2   : > { %7395 = vmatprep.subr.bf16.mxu0 %v9664_v50  ;;  %v9672_v60 = vcombine.high %v1167_v53, %v1171_v55  ;;  %7723 = vmatprep.subr.bf16.mxu1 %v9666_v54  ;;  %v9674_v61 = vcombine.high %v1168_v56, %v1172_v57  ;;  %v1175_v62 = vld [vmem:[%s11797_s10 + $0xc0] sm:$0xff]  ;;  %v1176_v0 = vld [vmem:[%s11797_s10 + $0xc8] sm:$0xff]  ;;  %v9671_v2 = vcombine.low %v1167_v53, %v1171_v55 }
 0x1f3   : > { %v1179_v63 = vld [vmem:[%s11797_s10 + $0xe0] sm:$0xff]  ;;  %v1180_v1 = vld [vmem:[%s11797_s10 + $0xe8] sm:$0xff]  ;;  %v9673_v3 = vcombine.low %v1168_v56, %v1172_v57 }
 0x1f4   : > { %v9680_v4 = vcombine.high %v1175_v62, %v1179_v63  ;;  %v9682_v7 = vcombine.high %v1176_v0, %v1180_v1  ;;  %v1183_v11 = vld [vmem:[%s11797_s10 + $0x100] sm:$0xff]  ;;  %v1184_v13 = vld [vmem:[%s11797_s10 + $0x108] sm:$0xff]  ;;  %v9679_v15 = vcombine.low %v1175_v62, %v1179_v63  ;;  %v9681_v16 = vcombine.low %v1176_v0, %v1180_v1 }
 0x1f5   : > { %7396 = vmatpush1.bf16.msra.mxu0 %v9663_v58  ;;  %7724 = vmatpush1.bf16.msra.mxu1 %v9665_v59  ;;  %v1187_v12 = vld [vmem:[%s11797_s10 + $0x120] sm:$0xff]  ;;  %v1188_v14 = vld [vmem:[%s11797_s10 + $0x128] sm:$0xff] }
 0x1f6   : > { %7397 = vmatprep.subr.bf16.mxu0 %v9672_v60  ;;  %7725 = vmatprep.subr.bf16.mxu1 %v9674_v61  ;;  %v9688_v6 = vcombine.high %v1183_v11, %v1187_v12  ;;  %v9690_v17 = vcombine.high %v1184_v13, %v1188_v14  ;;  %v1191_v9 = vld [vmem:[%s11797_s10 + $0x140] sm:$0xff]  ;;  %v1192_v10 = vld [vmem:[%s11797_s10 + $0x148] sm:$0xff]  ;;  %v9687_v20 = vcombine.low %v1183_v11, %v1187_v12 }
 0x1f7   : > { %v1195_v8 = vld [vmem:[%s11797_s10 + $0x160] sm:$0xff]  ;;  %v1196_v18 = vld [vmem:[%s11797_s10 + $0x168] sm:$0xff]  ;;  %v9689_v21 = vcombine.low %v1184_v13, %v1188_v14 }
 0x1f8   : > { %v9696_v22 = vcombine.high %v1191_v9, %v1195_v8  ;;  %v9698_v23 = vcombine.high %v1192_v10, %v1196_v18  ;;  %v1199_v26 = vld [vmem:[%s11797_s10 + $0x180] sm:$0xff]  ;;  %v1200_v28 = vld [vmem:[%s11797_s10 + $0x188] sm:$0xff]  ;;  %v9695_v31 = vcombine.low %v1191_v9, %v1195_v8  ;;  %v9697_v32 = vcombine.low %v1192_v10, %v1196_v18 }
 0x1f9   : > { %7398 = vmatpush1.bf16.msra.mxu0 %v9671_v2  ;;  %7726 = vmatpush1.bf16.msra.mxu1 %v9673_v3  ;;  %v1203_v27 = vld [vmem:[%s11797_s10 + $0x1a0] sm:$0xff]  ;;  %v1204_v29 = vld [vmem:[%s11797_s10 + $0x1a8] sm:$0xff] }
 0x1fa   : > { %7399 = vmatprep.subr.bf16.mxu0 %v9680_v4  ;;  %7727 = vmatprep.subr.bf16.mxu1 %v9682_v7  ;;  %v9704_v33 = vcombine.high %v1199_v26, %v1203_v27  ;;  %v11884_v34 = vld [vmem:[#allocation2] sm:$0xff]  ;;  %v9706_v35 = vcombine.high %v1200_v28, %v1204_v29  ;;  %v1208_v19 = vld [vmem:[%s11797_s10 + $0x1c8] sm:$0xff]  ;;  %v9703_v24 = vcombine.low %v1199_v26, %v1203_v27 }
 0x1fb   : > { %v1207_v36 = vld [vmem:[%s11797_s10 + $0x1c0] sm:$0xff]  ;;  %v11890_v5 = vcombine.high %v11884_v34, %v11884_v34  ;;  %v1212_v38 = vld [vmem:[%s11797_s10 + $0x1e8] sm:$0xff]  ;;  %v9705_v25 = vcombine.low %v1200_v28, %v1204_v29 }
 0x1fc   : > { %v1211_v37 = vld [vmem:[%s11797_s10 + $0x1e0] sm:$0xff]  ;;  %v9714_v30 = vcombine.high %v1208_v19, %v1212_v38  ;;  %v1216_v42 = vld [vmem:[%s11797_s10 + $0x208] sm:$0xff]  ;;  %v9713_v45 = vcombine.low %v1208_v19, %v1212_v38 }
 0x1fd   : > { %7400 = vmatpush1.bf16.msra.mxu0 %v9679_v15  ;;  %7728 = vmatpush1.bf16.msra.mxu1 %v9681_v16  ;;  %v9712_v39 = vcombine.high %v1207_v36, %v1211_v37  ;;  %v1215_v40 = vld [vmem:[%s11797_s10 + $0x200] sm:$0xff]  ;;  %v1220_v43 = vld [vmem:[%s11797_s10 + $0x228] sm:$0xff]  ;;  %v9711_v44 = vcombine.low %v1207_v36, %v1211_v37 }
 0x1fe   : > { %7401 = vmatprep.subr.bf16.mxu0 %v9688_v6  ;;  %7729 = vmatprep.subr.bf16.mxu1 %v9690_v17  ;;  %v1219_v41 = vld [vmem:[%s11797_s10 + $0x220] sm:$0xff]  ;;  %v9722_v47 = vcombine.high %v1216_v42, %v1220_v43  ;;  %v1224_v50 = vld [vmem:[%s11797_s10 + $0x248] sm:$0xff]  ;;  %v9721_v53 = vcombine.low %v1216_v42, %v1220_v43 }
 0x1ff   : > { %7425 = vmatprep.mubr.bf16.mxu0 %v11890_v5  ;;  %7753 = vmatprep.mubr.bf16.mxu1 %v11890_v5  ;;  %v9720_v46 = vcombine.high %v1215_v40, %v1219_v41  ;;  %v1223_v48 = vld [vmem:[%s11797_s10 + $0x240] sm:$0xff]  ;;  %v1228_v51 = vld [vmem:[%s11797_s10 + $0x268] sm:$0xff]  ;;  %v9719_v52 = vcombine.low %v1215_v40, %v1219_v41 }
 0x200   : > { %v1227_v49 = vld [vmem:[%s11797_s10 + $0x260] sm:$0xff]  ;;  %v9730_v55 = vcombine.high %v1224_v50, %v1228_v51  ;;  %v1232_v58 = vld [vmem:[%s11797_s10 + $0x288] sm:$0xff]  ;;  %v9729_v61 = vcombine.low %v1224_v50, %v1228_v51 }
 0x201   : > { %7402 = vmatpush1.bf16.msra.mxu0 %v9687_v20  ;;  %7730 = vmatpush1.bf16.msra.mxu1 %v9689_v21  ;;  %v9728_v54 = vcombine.high %v1223_v48, %v1227_v49  ;;  %v1231_v56 = vld [vmem:[%s11797_s10 + $0x280] sm:$0xff]  ;;  %v1236_v59 = vld [vmem:[%s11797_s10 + $0x2a8] sm:$0xff]  ;;  %v9727_v60 = vcombine.low %v1223_v48, %v1227_v49 }
 0x202   : > { %7403 = vmatprep.subr.bf16.mxu0 %v9696_v22  ;;  %7731 = vmatprep.subr.bf16.mxu1 %v9698_v23  ;;  %v1235_v57 = vld [vmem:[%s11797_s10 + $0x2a0] sm:$0xff]  ;;  %v9738_v63 = vcombine.high %v1232_v58, %v1236_v59  ;;  %v1240_v2 = vld [vmem:[%s11797_s10 + $0x2c8] sm:$0xff]  ;;  %v9737_v7 = vcombine.low %v1232_v58, %v1236_v59 }
 0x203   : > { %v9736_v62 = vcombine.high %v1231_v56, %v1235_v57  ;;  %v1239_v0 = vld [vmem:[%s11797_s10 + $0x2c0] sm:$0xff]  ;;  %v1244_v3 = vld [vmem:[%s11797_s10 + $0x2e8] sm:$0xff]  ;;  %v9735_v4 = vcombine.low %v1231_v56, %v1235_v57 }
 0x204   : > { %v1243_v1 = vld [vmem:[%s11797_s10 + $0x2e0] sm:$0xff]  ;;  %v9746_v12 = vcombine.high %v1240_v2, %v1244_v3  ;;  %v1248_v15 = vld [vmem:[%s11797_s10 + $0x308] sm:$0xff]  ;;  %v9745_v17 = vcombine.low %v1240_v2, %v1244_v3 }
 0x205   : > { %7404 = vmatpush1.bf16.msra.mxu0 %v9695_v31  ;;  %7732 = vmatpush1.bf16.msra.mxu1 %v9697_v32  ;;  %v9744_v11 = vcombine.high %v1239_v0, %v1243_v1  ;;  %v1247_v13 = vld [vmem:[%s11797_s10 + $0x300] sm:$0xff]  ;;  %v1252_v16 = vld [vmem:[%s11797_s10 + $0x328] sm:$0xff]  ;;  %v9743_v6 = vcombine.low %v1239_v0, %v1243_v1 }
 0x206   : > { %7405 = vmatprep.subr.bf16.mxu0 %v9704_v33  ;;  %7733 = vmatprep.subr.bf16.mxu1 %v9706_v35  ;;  %v1251_v14 = vld [vmem:[%s11797_s10 + $0x320] sm:$0xff]  ;;  %v9754_v8 = vcombine.high %v1248_v15, %v1252_v16  ;;  %v1256_v20 = vld [vmem:[%s11797_s10 + $0x348] sm:$0xff]  ;;  %v9753_v23 = vcombine.low %v1248_v15, %v1252_v16 }
 0x207   : > { %v9752_v9 = vcombine.high %v1247_v13, %v1251_v14  ;;  %v1255_v10 = vld [vmem:[%s11797_s10 + $0x340] sm:$0xff]  ;;  %v1260_v21 = vld [vmem:[%s11797_s10 + $0x368] sm:$0xff]  ;;  %v9751_v22 = vcombine.low %v1247_v13, %v1251_v14 }
 0x208   : > { %v1259_v18 = vld [vmem:[%s11797_s10 + $0x360] sm:$0xff]  ;;  %v9762_v27 = vcombine.high %v1256_v20, %v1260_v21  ;;  %v1264_v31 = vld [vmem:[%s11797_s10 + $0x388] sm:$0xff]  ;;  %v9761_v35 = vcombine.low %v1256_v20, %v1260_v21 }
 0x209   : > { %7406 = vmatpush1.bf16.msra.mxu0 %v9703_v24  ;;  %7734 = vmatpush1.bf16.msra.mxu1 %v9705_v25  ;;  %v9760_v26 = vcombine.high %v1255_v10, %v1259_v18  ;;  %v1263_v28 = vld [vmem:[%s11797_s10 + $0x380] sm:$0xff]  ;;  %v1268_v32 = vld [vmem:[%s11797_s10 + $0x3a8] sm:$0xff]  ;;  %v9759_v33 = vcombine.low %v1255_v10, %v1259_v18 }
 0x20a   : > { %7407 = vmatprep.subr.bf16.mxu0 %v9712_v39  ;;  %7735 = vmatprep.subr.bf16.mxu1 %v9714_v30  ;;  %v1267_v29 = vld [vmem:[%s11797_s10 + $0x3a0] sm:$0xff]  ;;  %v9770_v37 = vcombine.high %v1264_v31, %v1268_v32  ;;  %v1272_v24 = vld [vmem:[%s11797_s10 + $0x3c8] sm:$0xff]  ;;  %v9769_v30 = vcombine.low %v1264_v31, %v1268_v32 }
 0x20b   : > { %v9768_v36 = vcombine.high %v1263_v28, %v1267_v29  ;;  %v1271_v19 = vld [vmem:[%s11797_s10 + $0x3c0] sm:$0xff]  ;;  %v1276_v25 = vld [vmem:[%s11797_s10 + $0x3e8] sm:$0xff]  ;;  %v9767_v39 = vcombine.low %v1263_v28, %v1267_v29 }
 0x20c   : > { %v1275_v38 = vld [vmem:[%s11797_s10 + $0x3e0] sm:$0xff]  ;;  %v9778_v41 = vcombine.high %v1272_v24, %v1276_v25 }
 0x20d   : > { %7408 = vmatpush1.bf16.msra.mxu0 %v9711_v44  ;;  %7736 = vmatpush1.bf16.msra.mxu1 %v9713_v45  ;;  %v9776_v40 = vcombine.high %v1271_v19, %v1275_v38  ;;  %v1279_v42 = vld [vmem:[%s11797_s10 + $0x400] sm:$0xff]  ;;  %v1280_v44 = vld [vmem:[%s11797_s10 + $0x408] sm:$0xff] }
 0x20e   : > { %7409 = vmatprep.subr.bf16.mxu0 %v9720_v46  ;;  %7737 = vmatprep.subr.bf16.mxu1 %v9722_v47  ;;  %v1283_v43 = vld [vmem:[%s11797_s10 + $0x420] sm:$0xff]  ;;  %v1284_v45 = vld [vmem:[%s11797_s10 + $0x428] sm:$0xff]  ;;  %v9775_v46 = vcombine.low %v1271_v19, %v1275_v38  ;;  %v9777_v47 = vcombine.low %v1272_v24, %v1276_v25 }
 0x20f   : > { %v9784_v48 = vcombine.high %v1279_v42, %v1283_v43  ;;  %v9786_v49 = vcombine.high %v1280_v44, %v1284_v45  ;;  %v1287_v50 = vld [vmem:[%s11797_s10 + $0x440] sm:$0xff]  ;;  %v9783_v56 = vcombine.low %v1279_v42, %v1283_v43  ;;  %v9785_v57 = vcombine.low %v1280_v44, %v1284_v45 }
 0x210   : > { %v1291_v51 = vld [vmem:[%s11797_s10 + $0x460] sm:$0xff] }
 0x211   : > { %7410 = vmatpush1.bf16.msra.mxu0 %v9719_v52  ;;  %7738 = vmatpush1.bf16.msra.mxu1 %v9721_v53  ;;  %v11936_v52 = vcombine.low %v11884_v34, %v11884_v34  ;;  %v1288_v53 = vld [vmem:[%s11797_s10 + $0x448] sm:$0xff]  ;;  %v9792_v58 = vcombine.high %v1287_v50, %v1291_v51  ;;  %v1295_v59 = vld [vmem:[%s11797_s10 + $0x480] sm:$0xff]  ;;  %v9791_v0 = vcombine.low %v1287_v50, %v1291_v51 }
 0x212   : > { %7411 = vmatprep.subr.bf16.mxu0 %v9728_v54  ;;  %7739 = vmatprep.subr.bf16.mxu1 %v9730_v55  ;;  %v1292_v54 = vld [vmem:[%s11797_s10 + $0x468] sm:$0xff]  ;;  %v1303_v3 = vld [vmem:[%s11797_s10 + $0x4c0] sm:$0xff] }
 0x213   : > { %v11940_v55 = vld [vmem:[#allocation2 + $0x8] sm:$0xff]  ;;  %v9793_v1 = vcombine.low %v1288_v53, %v1292_v54  ;;  %v1311_v16 = vld [vmem:[%s11797_s10 + $0x500] sm:$0xff] }
 0x214   : > { %v1300_v34 = vld [vmem:[%s11797_s10 + $0x4a8] sm:$0xff]  ;;  %v1319_v21 = vld [vmem:[%s11797_s10 + $0x540] sm:$0xff] }
 0x215   : > { %7412 = vmatpush1.bf16.msra.mxu0 %v9727_v60  ;;  %7740 = vmatpush1.bf16.msra.mxu1 %v9729_v61  ;;  %v1299_v60 = vld [vmem:[%s11797_s10 + $0x4a0] sm:$0xff]  ;;  %v9794_v61 = vcombine.high %v1288_v53, %v1292_v54 }
 0x216   : > { %7413 = vmatprep.subr.bf16.mxu0 %v9736_v62  ;;  %7741 = vmatprep.subr.bf16.mxu1 %v9738_v63  ;;  %v1296_v62 = vld [vmem:[%s11797_s10 + $0x488] sm:$0xff]  ;;  %v11948_v63 = vcombine.high %v11940_v55, %v11940_v55  ;;  %v9800_v2 = vcombine.high %v1295_v59, %v1299_v60  ;;  %v9799_v13 = vcombine.low %v1295_v59, %v1299_v60  ;;  %v1327_v32 = vld [vmem:[%s11797_s10 + $0x580] sm:$0xff] }
 0x217   : > { %v9801_v14 = vcombine.low %v1296_v62, %v1300_v34  ;;  %v1335_v25 = vld [vmem:[%s11797_s10 + $0x5c0] sm:$0xff]  ;;  %v1356_v59 = vld [vmem:[%s11797_s10 + $0x668] sm:$0xff] }
 0x218   : > { %v1343_v45 = vld [vmem:[%s11797_s10 + $0x600] sm:$0xff] }
 0x219   : > { %7414 = vmatpush1.bf16.msra.mxu0 %v9735_v4  ;;  %7742 = vmatpush1.bf16.msra.mxu1 %v9737_v7  ;;  %v1307_v4 = vld [vmem:[%s11797_s10 + $0x4e0] sm:$0xff]  ;;  %v1304_v7 = vld [vmem:[%s11797_s10 + $0x4c8] sm:$0xff] }
 0x21a   : > { %7415 = vmatprep.subr.bf16.mxu0 %v9744_v11  ;;  %7743 = vmatprep.subr.bf16.mxu1 %v9746_v12  ;;  %v9802_v11 = vcombine.high %v1296_v62, %v1300_v34  ;;  %v1308_v12 = vld [vmem:[%s11797_s10 + $0x4e8] sm:$0xff]  ;;  %v9808_v15 = vcombine.high %v1303_v3, %v1307_v4  ;;  %v9807_v10 = vcombine.low %v1303_v3, %v1307_v4  ;;  %v1351_v54 = vld [vmem:[%s11797_s10 + $0x640] sm:$0xff] }
 0x21b   : > { %v9809_v18 = vcombine.low %v1304_v7, %v1308_v12  ;;  %v1359_v34 = vld [vmem:[%s11797_s10 + $0x680] sm:$0xff]  ;;  %v1364_v3 = vld [vmem:[%s11797_s10 + $0x6a8] sm:$0xff] }
 0x21d   : > { %7416 = vmatpush1.bf16.msra.mxu0 %v9743_v6  ;;  %7744 = vmatpush1.bf16.msra.mxu1 %v9745_v17  ;;  %v1315_v6 = vld [vmem:[%s11797_s10 + $0x520] sm:$0xff]  ;;  %v1312_v17 = vld [vmem:[%s11797_s10 + $0x508] sm:$0xff] }
 0x21e   : > { %7417 = vmatprep.subr.bf16.mxu0 %v9752_v9  ;;  %7745 = vmatprep.subr.bf16.mxu1 %v9754_v8  ;;  %v9810_v9 = vcombine.high %v1304_v7, %v1308_v12  ;;  %v1316_v8 = vld [vmem:[%s11797_s10 + $0x528] sm:$0xff]  ;;  %v9816_v20 = vcombine.high %v1311_v16, %v1315_v6  ;;  %v9815_v28 = vcombine.low %v1311_v16, %v1315_v6  ;;  %v1367_v12 = vld [vmem:[%s11797_s10 + $0x6c0] sm:$0xff] }
 0x21f   : > { %v9817_v29 = vcombine.low %v1312_v17, %v1316_v8  ;;  %v1372_v16 = vld [vmem:[%s11797_s10 + $0x6e8] sm:$0xff] }
 0x221   : > { %7418 = vmatpush1.bf16.msra.mxu0 %v9751_v22  ;;  %7746 = vmatpush1.bf16.msra.mxu1 %v9753_v23  ;;  %v1323_v22 = vld [vmem:[%s11797_s10 + $0x560] sm:$0xff]  ;;  %v1320_v23 = vld [vmem:[%s11797_s10 + $0x548] sm:$0xff] }
 0x222   : > { %7419 = vmatprep.subr.bf16.mxu0 %v9760_v26  ;;  %7747 = vmatprep.subr.bf16.mxu1 %v9762_v27  ;;  %v9818_v26 = vcombine.high %v1312_v17, %v1316_v8  ;;  %v1324_v27 = vld [vmem:[%s11797_s10 + $0x568] sm:$0xff]  ;;  %v9824_v31 = vcombine.high %v1319_v21, %v1323_v22  ;;  %v9823_v19 = vcombine.low %v1319_v21, %v1323_v22  ;;  %v1375_v8 = vld [vmem:[%s11797_s10 + $0x700] sm:$0xff] }
 0x223   : > { %v9825_v38 = vcombine.low %v1320_v23, %v1324_v27  ;;  %v1380_v21 = vld [vmem:[%s11797_s10 + $0x728] sm:$0xff] }
 0x225   : > { %7420 = vmatpush1.bf16.msra.mxu0 %v9759_v33  ;;  %7748 = vmatpush1.bf16.msra.mxu1 %v9761_v35  ;;  %v1331_v33 = vld [vmem:[%s11797_s10 + $0x5a0] sm:$0xff]  ;;  %v1328_v35 = vld [vmem:[%s11797_s10 + $0x588] sm:$0xff] }
 0x226   : > { %7421 = vmatprep.subr.bf16.mxu0 %v9768_v36  ;;  %7749 = vmatprep.subr.bf16.mxu1 %v9770_v37  ;;  %v9826_v36 = vcombine.high %v1320_v23, %v1324_v27  ;;  %v1332_v37 = vld [vmem:[%s11797_s10 + $0x5a8] sm:$0xff]  ;;  %v9832_v24 = vcombine.high %v1327_v32, %v1331_v33  ;;  %v9831_v42 = vcombine.low %v1327_v32, %v1331_v33  ;;  %v1383_v27 = vld [vmem:[%s11797_s10 + $0x740] sm:$0xff] }
 0x227   : > { %v9833_v43 = vcombine.low %v1328_v35, %v1332_v37  ;;  %v1388_v32 = vld [vmem:[%s11797_s10 + $0x768] sm:$0xff] }
 0x229   : > { %7422 = vmatpush1.bf16.msra.mxu0 %v9767_v39  ;;  %7750 = vmatpush1.bf16.msra.mxu1 %v9769_v30  ;;  %v1339_v39 = vld [vmem:[%s11797_s10 + $0x5e0] sm:$0xff]  ;;  %v1336_v30 = vld [vmem:[%s11797_s10 + $0x5c8] sm:$0xff] }
 0x22a   : > { %7423 = vmatprep.subr.bf16.mxu0 %v9776_v40  ;;  %7751 = vmatprep.subr.bf16.mxu1 %v9778_v41  ;;  %v9834_v40 = vcombine.high %v1328_v35, %v1332_v37  ;;  %v1340_v41 = vld [vmem:[%s11797_s10 + $0x5e8] sm:$0xff]  ;;  %v9840_v44 = vcombine.high %v1335_v25, %v1339_v39  ;;  %v9839_v50 = vcombine.low %v1335_v25, %v1339_v39  ;;  %v1391_v37 = vld [vmem:[%s11797_s10 + $0x780] sm:$0xff] }
 0x22b   : > { %v9841_v51 = vcombine.low %v1336_v30, %v1340_v41  ;;  %v1396_v25 = vld [vmem:[%s11797_s10 + $0x7a8] sm:$0xff] }
 0x22d   : > { %7424 = vmatpush1.bf16.msra.mxu0 %v9775_v46  ;;  %7752 = vmatpush1.bf16.msra.mxu1 %v9777_v47  ;;  %v1347_v46 = vld [vmem:[%s11797_s10 + $0x620] sm:$0xff]  ;;  %v1344_v47 = vld [vmem:[%s11797_s10 + $0x608] sm:$0xff] }
 0x22e   : > { %7434 = vmatprep.subr.bf16.mxu0 %v9784_v48  ;;  %7762 = vmatprep.subr.bf16.mxu1 %v9786_v49  ;;  %v9842_v48 = vcombine.high %v1336_v30, %v1340_v41  ;;  %v1348_v49 = vld [vmem:[%s11797_s10 + $0x628] sm:$0xff]  ;;  %v9848_v53 = vcombine.high %v1343_v45, %v1347_v46  ;;  %v9847_v60 = vcombine.low %v1343_v45, %v1347_v46  ;;  %v1399_v41 = vld [vmem:[%s11797_s10 + $0x7c0] sm:$0xff] }
 0x22f   : > { %v1404_v45 = vld [vmem:[%s11797_s10 + $0x7e8] sm:$0xff] }
 0x230   : > { %7426 = vmatmul.mubr.bf16.vlgmr.msra.gmra.mrb[0].mxu0 %v11936_v52  ;;  %7754 = vmatmul.mubr.bf16.vlgmr.msra.gmra.mrb[0].mxu1 %v11936_v52 }
 0x231   : > { %7435 = vmatpush1.bf16.msra.mxu0 %v9783_v56  ;;  %7763 = vmatpush1.bf16.msra.mxu1 %v9785_v57  ;;  %v1355_v56 = vld [vmem:[%s11797_s10 + $0x660] sm:$0xff]  ;;  %v1352_v57 = vld [vmem:[%s11797_s10 + $0x648] sm:$0xff] }
 0x232   : > { %7436 = vmatprep.subr.bf16.mxu0 %v9792_v58  ;;  %7764 = vmatprep.subr.bf16.mxu1 %v9794_v61  ;;  %v9850_v58 = vcombine.high %v1344_v47, %v1348_v49  ;;  %v9849_v61 = vcombine.low %v1344_v47, %v1348_v49  ;;  %v9856_v62 = vcombine.high %v1351_v54, %v1355_v56  ;;  %v1407_v49 = vld [vmem:[%s11797_s10 + $0x800] sm:$0xff] }
 0x233   : > { %7466 = vmatprep.mubr.bf16.mxu0 %v11948_v63  ;;  %7794 = vmatprep.mubr.bf16.mxu1 %v11948_v63  ;;  %v9855_v4 = vcombine.low %v1351_v54, %v1355_v56  ;;  %v9857_v7 = vcombine.low %v1352_v57, %v1356_v59  ;;  %v1412_v54 = vld [vmem:[%s11797_s10 + $0x828] sm:$0xff] }
 0x235   : > { %7437 = vmatpush1.bf16.msra.mxu0 %v9791_v0  ;;  %7765 = vmatpush1.bf16.msra.mxu1 %v9793_v1  ;;  %v1363_v0 = vld [vmem:[%s11797_s10 + $0x6a0] sm:$0xff]  ;;  %v1360_v1 = vld [vmem:[%s11797_s10 + $0x688] sm:$0xff] }
 0x236   : > { %7438 = vmatprep.subr.bf16.mxu0 %v9800_v2  ;;  %7766 = vmatprep.subr.bf16.mxu1 %v9802_v11  ;;  %v9858_v2 = vcombine.high %v1352_v57, %v1356_v59  ;;  %v9864_v11 = vcombine.high %v1359_v34, %v1363_v0  ;;  %v9863_v6 = vcombine.low %v1359_v34, %v1363_v0  ;;  %v1415_v57 = vld [vmem:[%s11797_s10 + $0x840] sm:$0xff]  ;;  %v12014_v0 = vld [vmem:[#allocation2 + $0x10] sm:$0xff] }
 0x237   : > { %v9865_v17 = vcombine.low %v1360_v1, %v1364_v3 }
 0x239   : > { %7439 = vmatpush1.bf16.msra.mxu0 %v9799_v13  ;;  %7767 = vmatpush1.bf16.msra.mxu1 %v9801_v14  ;;  %v1371_v13 = vld [vmem:[%s11797_s10 + $0x6e0] sm:$0xff]  ;;  %v1368_v14 = vld [vmem:[%s11797_s10 + $0x6c8] sm:$0xff] }
 0x23a   : > { %7440 = vmatprep.subr.bf16.mxu0 %v9808_v15  ;;  %7768 = vmatprep.subr.bf16.mxu1 %v9810_v9  ;;  %v9866_v15 = vcombine.high %v1360_v1, %v1364_v3  ;;  %v9872_v9 = vcombine.high %v1367_v12, %v1371_v13  ;;  %v9871_v22 = vcombine.low %v1367_v12, %v1371_v13  ;;  %v1427_v12 = vld [vmem:[%s11797_s10 + $0x8a0] sm:$0xff] }
 0x23b   : > { %v9873_v23 = vcombine.low %v1368_v14, %v1372_v16  ;;  %v12018_v1 = vcombine.low %v11940_v55, %v11940_v55  ;;  %v12024_v13 = vcombine.high %v12014_v0, %v12014_v0  ;;  %v1424_v55 = vld [vmem:[%s11797_s10 + $0x888] sm:$0xff] }
 0x23d   : > { %7441 = vmatpush1.bf16.msra.mxu0 %v9807_v10  ;;  %7769 = vmatpush1.bf16.msra.mxu1 %v9809_v18  ;;  %v1379_v10 = vld [vmem:[%s11797_s10 + $0x720] sm:$0xff]  ;;  %v1376_v18 = vld [vmem:[%s11797_s10 + $0x708] sm:$0xff] }
 0x23e   : > { %7442 = vmatprep.subr.bf16.mxu0 %v9816_v20  ;;  %7770 = vmatprep.subr.bf16.mxu1 %v9818_v26  ;;  %v9874_v20 = vcombine.high %v1368_v14, %v1372_v16  ;;  %v9880_v26 = vcombine.high %v1375_v8, %v1379_v10  ;;  %v9879_v33 = vcombine.low %v1375_v8, %v1379_v10  ;;  %v1428_v14 = vld [vmem:[%s11797_s10 + $0x8a8] sm:$0xff]  ;;  %v1435_v8 = vld [vmem:[%s11797_s10 + $0x8e0] sm:$0xff] }
 0x23f   : > { %v9881_v35 = vcombine.low %v1376_v18, %v1380_v21  ;;  %v1432_v10 = vld [vmem:[%s11797_s10 + $0x8c8] sm:$0xff] }
 0x241   : > { %7443 = vmatpush1.bf16.msra.mxu0 %v9815_v28  ;;  %7771 = vmatpush1.bf16.msra.mxu1 %v9817_v29  ;;  %v1387_v28 = vld [vmem:[%s11797_s10 + $0x760] sm:$0xff]  ;;  %v1384_v29 = vld [vmem:[%s11797_s10 + $0x748] sm:$0xff] }
 0x242   : > { %7444 = vmatprep.subr.bf16.mxu0 %v9824_v31  ;;  %7772 = vmatprep.subr.bf16.mxu1 %v9826_v36  ;;  %v9882_v31 = vcombine.high %v1376_v18, %v1380_v21  ;;  %v9888_v36 = vcombine.high %v1383_v27, %v1387_v28  ;;  %v9887_v39 = vcombine.low %v1383_v27, %v1387_v28  ;;  %v1436_v18 = vld [vmem:[%s11797_s10 + $0x8e8] sm:$0xff]  ;;  %v1443_v27 = vld [vmem:[%s11797_s10 + $0x920] sm:$0xff] }
 0x243   : > { %v9889_v30 = vcombine.low %v1384_v29, %v1388_v32  ;;  %v9929_v21 = vcombine.low %v1424_v55, %v1428_v14  ;;  %v1440_v28 = vld [vmem:[%s11797_s10 + $0x908] sm:$0xff] }
 0x245   : > { %7445 = vmatpush1.bf16.msra.mxu0 %v9823_v19  ;;  %7773 = vmatpush1.bf16.msra.mxu1 %v9825_v38  ;;  %v1395_v19 = vld [vmem:[%s11797_s10 + $0x7a0] sm:$0xff]  ;;  %v1392_v38 = vld [vmem:[%s11797_s10 + $0x788] sm:$0xff] }
 0x246   : > { %7446 = vmatprep.subr.bf16.mxu0 %v9832_v24  ;;  %7774 = vmatprep.subr.bf16.mxu1 %v9834_v40  ;;  %v9890_v24 = vcombine.high %v1384_v29, %v1388_v32  ;;  %v9896_v40 = vcombine.high %v1391_v37, %v1395_v19  ;;  %v9895_v46 = vcombine.low %v1391_v37, %v1395_v19  ;;  %v1444_v29 = vld [vmem:[%s11797_s10 + $0x928] sm:$0xff]  ;;  %v1451_v37 = vld [vmem:[%s11797_s10 + $0x960] sm:$0xff] }
 0x247   : > { %v9897_v47 = vcombine.low %v1392_v38, %v1396_v25  ;;  %v9937_v32 = vcombine.low %v1432_v10, %v1436_v18  ;;  %v1448_v19 = vld [vmem:[%s11797_s10 + $0x948] sm:$0xff] }
 0x249   : > { %7447 = vmatpush1.bf16.msra.mxu0 %v9831_v42  ;;  %7775 = vmatpush1.bf16.msra.mxu1 %v9833_v43  ;;  %v1403_v42 = vld [vmem:[%s11797_s10 + $0x7e0] sm:$0xff]  ;;  %v1400_v43 = vld [vmem:[%s11797_s10 + $0x7c8] sm:$0xff] }
 0x24a   : > { %7448 = vmatprep.subr.bf16.mxu0 %v9840_v44  ;;  %7776 = vmatprep.subr.bf16.mxu1 %v9842_v48  ;;  %v9898_v44 = vcombine.high %v1392_v38, %v1396_v25  ;;  %v9904_v48 = vcombine.high %v1399_v41, %v1403_v42  ;;  %v9903_v56 = vcombine.low %v1399_v41, %v1403_v42  ;;  %v1452_v38 = vld [vmem:[%s11797_s10 + $0x968] sm:$0xff]  ;;  %v1459_v41 = vld [vmem:[%s11797_s10 + $0x9a0] sm:$0xff] }
 0x24b   : > { %v9945_v25 = vcombine.low %v1440_v28, %v1444_v29  ;;  %v1456_v42 = vld [vmem:[%s11797_s10 + $0x988] sm:$0xff] }
 0x24d   : > { %7449 = vmatpush1.bf16.msra.mxu0 %v9839_v50  ;;  %7777 = vmatpush1.bf16.msra.mxu1 %v9841_v51  ;;  %v1411_v50 = vld [vmem:[%s11797_s10 + $0x820] sm:$0xff]  ;;  %v1408_v51 = vld [vmem:[%s11797_s10 + $0x808] sm:$0xff] }
 0x24e   : > { %7450 = vmatprep.subr.bf16.mxu0 %v9848_v53  ;;  %7778 = vmatprep.subr.bf16.mxu1 %v9850_v58  ;;  %v9906_v53 = vcombine.high %v1400_v43, %v1404_v45  ;;  %v9905_v58 = vcombine.low %v1400_v43, %v1404_v45  ;;  %v9912_v59 = vcombine.high %v1407_v49, %v1411_v50  ;;  %v1460_v43 = vld [vmem:[%s11797_s10 + $0x9a8] sm:$0xff] }
 0x24f   : > { %v9914_v34 = vcombine.high %v1408_v51, %v1412_v54  ;;  %v9913_v3 = vcombine.low %v1408_v51, %v1412_v54  ;;  %v9953_v45 = vcombine.low %v1448_v19, %v1452_v38  ;;  %v1468_v51 = vld [vmem:[%s11797_s10 + $0x9e8] sm:$0xff]  ;;  %v9961_v54 = vcombine.low %v1456_v42, %v1460_v43 }
 0x251   : > { %7451 = vmatpush1.bf16.msra.mxu0 %v9847_v60  ;;  %7779 = vmatpush1.bf16.msra.mxu1 %v9849_v61  ;;  %v1419_v60 = vld [vmem:[%s11797_s10 + $0x860] sm:$0xff]  ;;  %v1416_v61 = vld [vmem:[%s11797_s10 + $0x848] sm:$0xff] }
 0x252   : > { %7452 = vmatprep.subr.bf16.mxu0 %v9856_v62  ;;  %7780 = vmatprep.subr.bf16.mxu1 %v9858_v2  ;;  %v1420_v62 = vld [vmem:[%s11797_s10 + $0x868] sm:$0xff]  ;;  %v9911_v2 = vcombine.low %v1407_v49, %v1411_v50  ;;  %v1467_v49 = vld [vmem:[%s11797_s10 + $0x9e0] sm:$0xff] }
 0x253   : > { %v9921_v16 = vcombine.low %v1416_v61, %v1420_v62  ;;  %v1464_v50 = vld [vmem:[%s11797_s10 + $0x9c8] sm:$0xff] }
 0x255   : > { %7453 = vmatpush1.bf16.msra.mxu0 %v9855_v4  ;;  %7781 = vmatpush1.bf16.msra.mxu1 %v9857_v7  ;;  %v9920_v4 = vcombine.high %v1415_v57, %v1419_v60  ;;  %v9922_v7 = vcombine.high %v1416_v61, %v1420_v62  ;;  %v1476_v61 = vld [vmem:[%s11797_s10 + $0xa28] sm:$0xff] }
 0x256   : > { %7454 = vmatprep.subr.bf16.mxu0 %v9864_v11  ;;  %7782 = vmatprep.subr.bf16.mxu1 %v9866_v15  ;;  %v1423_v11 = vld [vmem:[%s11797_s10 + $0x880] sm:$0xff]  ;;  %v9919_v15 = vcombine.low %v1415_v57, %v1419_v60  ;;  %v9970_v57 = vcombine.high %v1464_v50, %v1468_v51  ;;  %v1472_v60 = vld [vmem:[%s11797_s10 + $0xa08] sm:$0xff] }
 0x259   : > { %7455 = vmatpush1.bf16.msra.mxu0 %v9863_v6  ;;  %7783 = vmatpush1.bf16.msra.mxu1 %v9865_v17  ;;  %v9928_v6 = vcombine.high %v1423_v11, %v1427_v12  ;;  %v9930_v17 = vcombine.high %v1424_v55, %v1428_v14  ;;  %v9977_v14 = vcombine.low %v1472_v60, %v1476_v61 }
 0x25a   : > { %7456 = vmatprep.subr.bf16.mxu0 %v9872_v9  ;;  %7784 = vmatprep.subr.bf16.mxu1 %v9874_v20  ;;  %v1431_v9 = vld [vmem:[%s11797_s10 + $0x8c0] sm:$0xff]  ;;  %v9927_v20 = vcombine.low %v1423_v11, %v1427_v12  ;;  %v1480_v11 = vld [vmem:[%s11797_s10 + $0xa48] sm:$0xff] }
 0x25b   : > { %v1484_v12 = vld [vmem:[%s11797_s10 + $0xa68] sm:$0xff] }
 0x25d   : > { %7457 = vmatpush1.bf16.msra.mxu0 %v9871_v22  ;;  %7785 = vmatpush1.bf16.msra.mxu1 %v9873_v23  ;;  %v9936_v22 = vcombine.high %v1431_v9, %v1435_v8  ;;  %v9938_v23 = vcombine.high %v1432_v10, %v1436_v18  ;;  %v9985_v18 = vcombine.low %v1480_v11, %v1484_v12 }
 0x25e   : > { %7458 = vmatprep.subr.bf16.mxu0 %v9880_v26  ;;  %7786 = vmatprep.subr.bf16.mxu1 %v9882_v31  ;;  %v1439_v26 = vld [vmem:[%s11797_s10 + $0x900] sm:$0xff]  ;;  %v9935_v31 = vcombine.low %v1431_v9, %v1435_v8  ;;  %v1488_v9 = vld [vmem:[%s11797_s10 + $0xa88] sm:$0xff] }
 0x25f   : > { %v1492_v8 = vld [vmem:[%s11797_s10 + $0xaa8] sm:$0xff] }
 0x261   : > { %7459 = vmatpush1.bf16.msra.mxu0 %v9879_v33  ;;  %7787 = vmatpush1.bf16.msra.mxu1 %v9881_v35  ;;  %v9944_v33 = vcombine.high %v1439_v26, %v1443_v27  ;;  %v9946_v35 = vcombine.high %v1440_v28, %v1444_v29  ;;  %v9993_v29 = vcombine.low %v1488_v9, %v1492_v8 }
 0x262   : > { %7460 = vmatprep.subr.bf16.mxu0 %v9888_v36  ;;  %7788 = vmatprep.subr.bf16.mxu1 %v9890_v24  ;;  %v1447_v36 = vld [vmem:[%s11797_s10 + $0x940] sm:$0xff]  ;;  %v9943_v24 = vcombine.low %v1439_v26, %v1443_v27  ;;  %v1496_v26 = vld [vmem:[%s11797_s10 + $0xac8] sm:$0xff] }
 0x263   : > { %v1500_v27 = vld [vmem:[%s11797_s10 + $0xae8] sm:$0xff] }
 0x265   : > { %7461 = vmatpush1.bf16.msra.mxu0 %v9887_v39  ;;  %7789 = vmatpush1.bf16.msra.mxu1 %v9889_v30  ;;  %v9952_v39 = vcombine.high %v1447_v36, %v1451_v37  ;;  %v9954_v30 = vcombine.high %v1448_v19, %v1452_v38  ;;  %v10001_v38 = vcombine.low %v1496_v26, %v1500_v27 }
 0x266   : > { %7462 = vmatprep.subr.bf16.mxu0 %v9896_v40  ;;  %7790 = vmatprep.subr.bf16.mxu1 %v9898_v44  ;;  %v1455_v40 = vld [vmem:[%s11797_s10 + $0x980] sm:$0xff]  ;;  %v9951_v44 = vcombine.low %v1447_v36, %v1451_v37  ;;  %v1504_v36 = vld [vmem:[%s11797_s10 + $0xb08] sm:$0xff] }
 0x267   : > { %v1508_v37 = vld [vmem:[%s11797_s10 + $0xb28] sm:$0xff] }
 0x269   : > { %7463 = vmatpush1.bf16.msra.mxu0 %v9895_v46  ;;  %7791 = vmatpush1.bf16.msra.mxu1 %v9897_v47  ;;  %v9960_v46 = vcombine.high %v1455_v40, %v1459_v41  ;;  %v9962_v47 = vcombine.high %v1456_v42, %v1460_v43  ;;  %v10009_v43 = vcombine.low %v1504_v36, %v1508_v37 }
 0x26a   : > { %7464 = vmatprep.subr.bf16.mxu0 %v9904_v48  ;;  %7792 = vmatprep.subr.bf16.mxu1 %v9906_v53  ;;  %v1463_v48 = vld [vmem:[%s11797_s10 + $0x9c0] sm:$0xff]  ;;  %v9959_v53 = vcombine.low %v1455_v40, %v1459_v41  ;;  %v1512_v40 = vld [vmem:[%s11797_s10 + $0xb48] sm:$0xff] }
 0x26b   : > { %v9967_v62 = vcombine.low %v1463_v48, %v1467_v49  ;;  %v1516_v41 = vld [vmem:[%s11797_s10 + $0xb68] sm:$0xff] }
 0x26d   : > { %7465 = vmatpush1.bf16.msra.mxu0 %v9903_v56  ;;  %7793 = vmatpush1.bf16.msra.mxu1 %v9905_v58  ;;  %v9968_v56 = vcombine.high %v1463_v48, %v1467_v49  ;;  %v1471_v58 = vld [vmem:[%s11797_s10 + $0xa00] sm:$0xff]  ;;  %v1520_v48 = vld [vmem:[%s11797_s10 + $0xb88] sm:$0xff] }
 0x26e   : > { %7475 = vmatprep.subr.bf16.mxu0 %v9912_v59  ;;  %7803 = vmatprep.subr.bf16.mxu1 %v9914_v34  ;;  %v1475_v59 = vld [vmem:[%s11797_s10 + $0xa20] sm:$0xff]  ;;  %v9969_v34 = vcombine.low %v1464_v50, %v1468_v51  ;;  %v1524_v49 = vld [vmem:[%s11797_s10 + $0xba8] sm:$0xff]  ;;  %v10017_v51 = vcombine.low %v1512_v40, %v1516_v41 }
 0x26f   : > { %v9975_v55 = vcombine.low %v1471_v58, %v1475_v59 }
 0x270   : > { %7467 = vmatmul.mubr.bf16.vlgmr.msra.gmra.mrb[0].mxu0 %v12018_v1  ;;  %7795 = vmatmul.mubr.bf16.vlgmr.msra.gmra.mrb[0].mxu1 %v12018_v1 }
 0x271   : > { %7476 = vmatpush1.bf16.msra.mxu0 %v9911_v2  ;;  %7804 = vmatpush1.bf16.msra.mxu1 %v9913_v3  ;;  %v9976_v2 = vcombine.high %v1471_v58, %v1475_v59  ;;  %v9978_v3 = vcombine.high %v1472_v60, %v1476_v61  ;;  %v1528_v58 = vld [vmem:[%s11797_s10 + $0xbc8] sm:$0xff]  ;;  %v10025_v61 = vcombine.low %v1520_v48, %v1524_v49 }
 0x272   : > { %7477 = vmatprep.subr.bf16.mxu0 %v9920_v4  ;;  %7805 = vmatprep.subr.bf16.mxu1 %v9922_v7  ;;  %v1479_v4 = vld [vmem:[%s11797_s10 + $0xa40] sm:$0xff]  ;;  %v1532_v59 = vld [vmem:[%s11797_s10 + $0xbe8] sm:$0xff] }
 0x273   : > { %7507 = vmatprep.mubr.bf16.mxu0 %v12024_v13  ;;  %7835 = vmatprep.mubr.bf16.mxu1 %v12024_v13  ;;  %v1483_v7 = vld [vmem:[%s11797_s10 + $0xa60] sm:$0xff] }
 0x274   : > { %v9983_v10 = vcombine.low %v1479_v4, %v1483_v7 }
 0x275   : > { %7478 = vmatpush1.bf16.msra.mxu0 %v9919_v15  ;;  %7806 = vmatpush1.bf16.msra.mxu1 %v9921_v16  ;;  %v9984_v15 = vcombine.high %v1479_v4, %v1483_v7  ;;  %v9986_v16 = vcombine.high %v1480_v11, %v1484_v12  ;;  %v1536_v4 = vld [vmem:[%s11797_s10 + $0xc08] sm:$0xff]  ;;  %v10033_v12 = vcombine.low %v1528_v58, %v1532_v59 }
 0x276   : > { %7479 = vmatprep.subr.bf16.mxu0 %v9928_v6  ;;  %7807 = vmatprep.subr.bf16.mxu1 %v9930_v17  ;;  %v1487_v6 = vld [vmem:[%s11797_s10 + $0xa80] sm:$0xff]  ;;  %v1540_v7 = vld [vmem:[%s11797_s10 + $0xc28] sm:$0xff] }
 0x277   : > { %v1491_v17 = vld [vmem:[%s11797_s10 + $0xaa0] sm:$0xff] }
 0x278   : > { %v9991_v28 = vcombine.low %v1487_v6, %v1491_v17 }
 0x279   : > { %7480 = vmatpush1.bf16.msra.mxu0 %v9927_v20  ;;  %7808 = vmatpush1.bf16.msra.mxu1 %v9929_v21  ;;  %v9992_v20 = vcombine.high %v1487_v6, %v1491_v17  ;;  %v9994_v21 = vcombine.high %v1488_v9, %v1492_v8  ;;  %v12092_v6 = vcombine.low %v12014_v0, %v12014_v0  ;;  %v1544_v17 = vld [vmem:[%s11797_s10 + $0xc48] sm:$0xff]  ;;  %v12096_v8 = vld [vmem:[#allocation2 + $0x18] sm:$0xff] }
 0x27a   : > { %7481 = vmatprep.subr.bf16.mxu0 %v9936_v22  ;;  %7809 = vmatprep.subr.bf16.mxu1 %v9938_v23  ;;  %v1495_v22 = vld [vmem:[%s11797_s10 + $0xac0] sm:$0xff]  ;;  %v1548_v9 = vld [vmem:[%s11797_s10 + $0xc68] sm:$0xff]  ;;  %v12102_v0 = vcombine.high %v12096_v8, %v12096_v8 }
 0x27b   : > { %v1499_v23 = vld [vmem:[%s11797_s10 + $0xae0] sm:$0xff] }
 0x27c   : > { %v9999_v19 = vcombine.low %v1495_v22, %v1499_v23 }
 0x27d   : > { %7482 = vmatpush1.bf16.msra.mxu0 %v9935_v31  ;;  %7810 = vmatpush1.bf16.msra.mxu1 %v9937_v32  ;;  %v10000_v31 = vcombine.high %v1495_v22, %v1499_v23  ;;  %v10002_v32 = vcombine.high %v1496_v26, %v1500_v27  ;;  %v1551_v22 = vld [vmem:[%s11797_s10 + $0xc80] sm:$0xff]  ;;  %v1552_v26 = vld [vmem:[%s11797_s10 + $0xc88] sm:$0xff] }
 0x27e   : > { %7483 = vmatprep.subr.bf16.mxu0 %v9944_v33  ;;  %7811 = vmatprep.subr.bf16.mxu1 %v9946_v35  ;;  %v1503_v33 = vld [vmem:[%s11797_s10 + $0xb00] sm:$0xff]  ;;  %v1556_v27 = vld [vmem:[%s11797_s10 + $0xca8] sm:$0xff] }
 0x27f   : > { %v1507_v35 = vld [vmem:[%s11797_s10 + $0xb20] sm:$0xff] }
 0x280   : > { %v10007_v42 = vcombine.low %v1503_v33, %v1507_v35  ;;  %v1555_v23 = vld [vmem:[%s11797_s10 + $0xca0] sm:$0xff] }
 0x281   : > { %7484 = vmatpush1.bf16.msra.mxu0 %v9943_v24  ;;  %7812 = vmatpush1.bf16.msra.mxu1 %v9945_v25  ;;  %v10008_v24 = vcombine.high %v1503_v33, %v1507_v35  ;;  %v10010_v25 = vcombine.high %v1504_v36, %v1508_v37  ;;  %v1559_v33 = vld [vmem:[%s11797_s10 + $0xcc0] sm:$0xff]  ;;  %v1560_v36 = vld [vmem:[%s11797_s10 + $0xcc8] sm:$0xff] }
 0x282   : > { %7485 = vmatprep.subr.bf16.mxu0 %v9952_v39  ;;  %7813 = vmatprep.subr.bf16.mxu1 %v9954_v30  ;;  %v1511_v39 = vld [vmem:[%s11797_s10 + $0xb40] sm:$0xff]  ;;  %v1564_v37 = vld [vmem:[%s11797_s10 + $0xce8] sm:$0xff] }
 0x283   : > { %v1515_v30 = vld [vmem:[%s11797_s10 + $0xb60] sm:$0xff] }
 0x284   : > { %v10015_v50 = vcombine.low %v1511_v39, %v1515_v30  ;;  %v1563_v35 = vld [vmem:[%s11797_s10 + $0xce0] sm:$0xff] }
 0x285   : > { %7486 = vmatpush1.bf16.msra.mxu0 %v9951_v44  ;;  %7814 = vmatpush1.bf16.msra.mxu1 %v9953_v45  ;;  %v10016_v44 = vcombine.high %v1511_v39, %v1515_v30  ;;  %v10018_v45 = vcombine.high %v1512_v40, %v1516_v41  ;;  %v1567_v39 = vld [vmem:[%s11797_s10 + $0xd00] sm:$0xff]  ;;  %v1568_v40 = vld [vmem:[%s11797_s10 + $0xd08] sm:$0xff] }
 0x286   : > { %7487 = vmatprep.subr.bf16.mxu0 %v9960_v46  ;;  %7815 = vmatprep.subr.bf16.mxu1 %v9962_v47  ;;  %v1519_v46 = vld [vmem:[%s11797_s10 + $0xb80] sm:$0xff]  ;;  %v1572_v41 = vld [vmem:[%s11797_s10 + $0xd28] sm:$0xff] }
 0x287   : > { %v1523_v47 = vld [vmem:[%s11797_s10 + $0xba0] sm:$0xff] }
 0x288   : > { %v10023_v60 = vcombine.low %v1519_v46, %v1523_v47  ;;  %v1571_v30 = vld [vmem:[%s11797_s10 + $0xd20] sm:$0xff] }
 0x289   : > { %7488 = vmatpush1.bf16.msra.mxu0 %v9959_v53  ;;  %7816 = vmatpush1.bf16.msra.mxu1 %v9961_v54  ;;  %v10024_v53 = vcombine.high %v1519_v46, %v1523_v47  ;;  %v10026_v54 = vcombine.high %v1520_v48, %v1524_v49  ;;  %v1575_v46 = vld [vmem:[%s11797_s10 + $0xd40] sm:$0xff]  ;;  %v1576_v48 = vld [vmem:[%s11797_s10 + $0xd48] sm:$0xff] }
 0x28a   : > { %7489 = vmatprep.subr.bf16.mxu0 %v9968_v56  ;;  %7817 = vmatprep.subr.bf16.mxu1 %v9970_v57  ;;  %v1527_v56 = vld [vmem:[%s11797_s10 + $0xbc0] sm:$0xff]  ;;  %v1580_v49 = vld [vmem:[%s11797_s10 + $0xd68] sm:$0xff] }
 0x28b   : > { %v1531_v57 = vld [vmem:[%s11797_s10 + $0xbe0] sm:$0xff] }
 0x28c   : > { %v10031_v11 = vcombine.low %v1527_v56, %v1531_v57  ;;  %v1579_v47 = vld [vmem:[%s11797_s10 + $0xd60] sm:$0xff] }
 0x28d   : > { %7490 = vmatpush1.bf16.msra.mxu0 %v9967_v62  ;;  %7818 = vmatpush1.bf16.msra.mxu1 %v9969_v34  ;;  %v10032_v62 = vcombine.high %v1527_v56, %v1531_v57  ;;  %v10034_v34 = vcombine.high %v1528_v58, %v1532_v59  ;;  %v1583_v56 = vld [vmem:[%s11797_s10 + $0xd80] sm:$0xff]  ;;  %v1584_v58 = vld [vmem:[%s11797_s10 + $0xd88] sm:$0xff] }
 0x28e   : > { %7491 = vmatprep.subr.bf16.mxu0 %v9976_v2  ;;  %7819 = vmatprep.subr.bf16.mxu1 %v9978_v3  ;;  %v1535_v2 = vld [vmem:[%s11797_s10 + $0xc00] sm:$0xff]  ;;  %v1588_v59 = vld [vmem:[%s11797_s10 + $0xda8] sm:$0xff] }
 0x28f   : > { %v1539_v3 = vld [vmem:[%s11797_s10 + $0xc20] sm:$0xff] }
 0x290   : > { %v1587_v57 = vld [vmem:[%s11797_s10 + $0xda0] sm:$0xff] }
 0x291   : > { %7492 = vmatpush1.bf16.msra.mxu0 %v9975_v55  ;;  %7820 = vmatpush1.bf16.msra.mxu1 %v9977_v14  ;;  %v10040_v55 = vcombine.high %v1535_v2, %v1539_v3  ;;  %v10042_v14 = vcombine.high %v1536_v4, %v1540_v7 }
 0x292   : > { %7493 = vmatprep.subr.bf16.mxu0 %v9984_v15  ;;  %7821 = vmatprep.subr.bf16.mxu1 %v9986_v16  ;;  %v1543_v15 = vld [vmem:[%s11797_s10 + $0xc40] sm:$0xff] }
 0x293   : > { %v1547_v16 = vld [vmem:[%s11797_s10 + $0xc60] sm:$0xff] }
 0x295   : > { %7494 = vmatpush1.bf16.msra.mxu0 %v9983_v10  ;;  %7822 = vmatpush1.bf16.msra.mxu1 %v9985_v18  ;;  %v10039_v10 = vcombine.low %v1535_v2, %v1539_v3  ;;  %v10041_v18 = vcombine.low %v1536_v4, %v1540_v7  ;;  %v1591_v2 = vld [vmem:[%s11797_s10 + $0xdc0] sm:$0xff]  ;;  %v1592_v4 = vld [vmem:[%s11797_s10 + $0xdc8] sm:$0xff] }
 0x296   : > { %7495 = vmatprep.subr.bf16.mxu0 %v9992_v20  ;;  %7823 = vmatprep.subr.bf16.mxu1 %v9994_v21  ;;  %v10048_v20 = vcombine.high %v1543_v15, %v1547_v16  ;;  %v10050_v21 = vcombine.high %v1544_v17, %v1548_v9  ;;  %v1595_v3 = vld [vmem:[%s11797_s10 + $0xde0] sm:$0xff]  ;;  %v1596_v7 = vld [vmem:[%s11797_s10 + $0xde8] sm:$0xff] }
 0x299   : > { %7496 = vmatpush1.bf16.msra.mxu0 %v9991_v28  ;;  %7824 = vmatpush1.bf16.msra.mxu1 %v9993_v29  ;;  %v10047_v28 = vcombine.low %v1543_v15, %v1547_v16  ;;  %v10049_v29 = vcombine.low %v1544_v17, %v1548_v9  ;;  %v1599_v15 = vld [vmem:[%s11797_s10 + $0xe00] sm:$0xff]  ;;  %v1600_v17 = vld [vmem:[%s11797_s10 + $0xe08] sm:$0xff] }
 0x29a   : > { %7497 = vmatprep.subr.bf16.mxu0 %v10000_v31  ;;  %7825 = vmatprep.subr.bf16.mxu1 %v10002_v32  ;;  %v10056_v31 = vcombine.high %v1551_v22, %v1555_v23  ;;  %v10058_v32 = vcombine.high %v1552_v26, %v1556_v27  ;;  %v1603_v16 = vld [vmem:[%s11797_s10 + $0xe20] sm:$0xff]  ;;  %v1604_v9 = vld [vmem:[%s11797_s10 + $0xe28] sm:$0xff] }
 0x29d   : > { %7498 = vmatpush1.bf16.msra.mxu0 %v9999_v19  ;;  %7826 = vmatpush1.bf16.msra.mxu1 %v10001_v38  ;;  %v10055_v19 = vcombine.low %v1551_v22, %v1555_v23  ;;  %v10057_v38 = vcombine.low %v1552_v26, %v1556_v27  ;;  %v1607_v22 = vld [vmem:[%s11797_s10 + $0xe40] sm:$0xff]  ;;  %v1608_v26 = vld [vmem:[%s11797_s10 + $0xe48] sm:$0xff] }
 0x29e   : > { %7499 = vmatprep.subr.bf16.mxu0 %v10008_v24  ;;  %7827 = vmatprep.subr.bf16.mxu1 %v10010_v25  ;;  %v10064_v24 = vcombine.high %v1559_v33, %v1563_v35  ;;  %v10066_v25 = vcombine.high %v1560_v36, %v1564_v37  ;;  %v1611_v23 = vld [vmem:[%s11797_s10 + $0xe60] sm:$0xff]  ;;  %v1612_v27 = vld [vmem:[%s11797_s10 + $0xe68] sm:$0xff] }
 0x2a1   : > { %7500 = vmatpush1.bf16.msra.mxu0 %v10007_v42  ;;  %7828 = vmatpush1.bf16.msra.mxu1 %v10009_v43  ;;  %v10063_v42 = vcombine.low %v1559_v33, %v1563_v35  ;;  %v10065_v43 = vcombine.low %v1560_v36, %v1564_v37  ;;  %v1615_v33 = vld [vmem:[%s11797_s10 + $0xe80] sm:$0xff]  ;;  %v1616_v36 = vld [vmem:[%s11797_s10 + $0xe88] sm:$0xff] }
 0x2a2   : > { %7501 = vmatprep.subr.bf16.mxu0 %v10016_v44  ;;  %7829 = vmatprep.subr.bf16.mxu1 %v10018_v45  ;;  %v10072_v44 = vcombine.high %v1567_v39, %v1571_v30  ;;  %v10074_v45 = vcombine.high %v1568_v40, %v1572_v41  ;;  %v1619_v35 = vld [vmem:[%s11797_s10 + $0xea0] sm:$0xff]  ;;  %v1620_v37 = vld [vmem:[%s11797_s10 + $0xea8] sm:$0xff] }
 0x2a5   : > { %7502 = vmatpush1.bf16.msra.mxu0 %v10015_v50  ;;  %7830 = vmatpush1.bf16.msra.mxu1 %v10017_v51  ;;  %v10071_v50 = vcombine.low %v1567_v39, %v1571_v30  ;;  %v10073_v51 = vcombine.low %v1568_v40, %v1572_v41  ;;  %v1623_v39 = vld [vmem:[%s11797_s10 + $0xec0] sm:$0xff]  ;;  %v1624_v40 = vld [vmem:[%s11797_s10 + $0xec8] sm:$0xff] }
 0x2a6   : > { %7503 = vmatprep.subr.bf16.mxu0 %v10024_v53  ;;  %7831 = vmatprep.subr.bf16.mxu1 %v10026_v54  ;;  %v10080_v53 = vcombine.high %v1575_v46, %v1579_v47  ;;  %v10082_v54 = vcombine.high %v1576_v48, %v1580_v49  ;;  %v1627_v30 = vld [vmem:[%s11797_s10 + $0xee0] sm:$0xff]  ;;  %v1628_v41 = vld [vmem:[%s11797_s10 + $0xee8] sm:$0xff] }
 0x2a9   : > { %7504 = vmatpush1.bf16.msra.mxu0 %v10023_v60  ;;  %7832 = vmatpush1.bf16.msra.mxu1 %v10025_v61  ;;  %v10079_v60 = vcombine.low %v1575_v46, %v1579_v47  ;;  %v10081_v61 = vcombine.low %v1576_v48, %v1580_v49  ;;  %v1631_v46 = vld [vmem:[%s11797_s10 + $0xf00] sm:$0xff]  ;;  %v1632_v48 = vld [vmem:[%s11797_s10 + $0xf08] sm:$0xff] }
 0x2aa   : > { %7505 = vmatprep.subr.bf16.mxu0 %v10032_v62  ;;  %7833 = vmatprep.subr.bf16.mxu1 %v10034_v34  ;;  %v10088_v62 = vcombine.high %v1583_v56, %v1587_v57  ;;  %v10090_v34 = vcombine.high %v1584_v58, %v1588_v59  ;;  %v1635_v47 = vld [vmem:[%s11797_s10 + $0xf20] sm:$0xff]  ;;  %v1636_v49 = vld [vmem:[%s11797_s10 + $0xf28] sm:$0xff] }
 0x2ad   : > { %7506 = vmatpush1.bf16.msra.mxu0 %v10031_v11  ;;  %7834 = vmatpush1.bf16.msra.mxu1 %v10033_v12  ;;  %v10087_v11 = vcombine.low %v1583_v56, %v1587_v57  ;;  %v10089_v12 = vcombine.low %v1584_v58, %v1588_v59  ;;  %v1639_v56 = vld [vmem:[%s11797_s10 + $0xf40] sm:$0xff]  ;;  %v1640_v58 = vld [vmem:[%s11797_s10 + $0xf48] sm:$0xff] }
 0x2ae   : > { %7516 = vmatprep.subr.bf16.mxu0 %v10040_v55  ;;  %7844 = vmatprep.subr.bf16.mxu1 %v10042_v14  ;;  %v10096_v55 = vcombine.high %v1591_v2, %v1595_v3  ;;  %v10098_v14 = vcombine.high %v1592_v4, %v1596_v7  ;;  %v1643_v57 = vld [vmem:[%s11797_s10 + $0xf60] sm:$0xff]  ;;  %v1644_v59 = vld [vmem:[%s11797_s10 + $0xf68] sm:$0xff] }
 0x2b0   : > { %7508 = vmatmul.mubr.bf16.vlgmr.msra.gmra.mrb[0].mxu0 %v12092_v6  ;;  %7836 = vmatmul.mubr.bf16.vlgmr.msra.gmra.mrb[0].mxu1 %v12092_v6 }
 0x2b1   : > { %7517 = vmatpush1.bf16.msra.mxu0 %v10039_v10  ;;  %7845 = vmatpush1.bf16.msra.mxu1 %v10041_v18  ;;  %v10095_v10 = vcombine.low %v1591_v2, %v1595_v3  ;;  %v10097_v18 = vcombine.low %v1592_v4, %v1596_v7  ;;  %v1647_v2 = vld [vmem:[%s11797_s10 + $0xf80] sm:$0xff]  ;;  %v1648_v4 = vld [vmem:[%s11797_s10 + $0xf88] sm:$0xff] }
 0x2b2   : > { %7518 = vmatprep.subr.bf16.mxu0 %v10048_v20  ;;  %7846 = vmatprep.subr.bf16.mxu1 %v10050_v21  ;;  %v10104_v20 = vcombine.high %v1599_v15, %v1603_v16  ;;  %v10106_v21 = vcombine.high %v1600_v17, %v1604_v9  ;;  %v1651_v3 = vld [vmem:[%s11797_s10 + $0xfa0] sm:$0xff]  ;;  %v1652_v7 = vld [vmem:[%s11797_s10 + $0xfa8] sm:$0xff] }
 0x2b3   : > { %7548 = vmatprep.mubr.bf16.mxu0 %v12102_v0  ;;  %7876 = vmatprep.mubr.bf16.mxu1 %v12102_v0 }
 0x2b5   : > { %7519 = vmatpush1.bf16.msra.mxu0 %v10047_v28  ;;  %7847 = vmatpush1.bf16.msra.mxu1 %v10049_v29  ;;  %v10103_v28 = vcombine.low %v1599_v15, %v1603_v16  ;;  %v10105_v29 = vcombine.low %v1600_v17, %v1604_v9  ;;  %v1655_v15 = vld [vmem:[%s11797_s10 + $0xfc0] sm:$0xff]  ;;  %v1656_v17 = vld [vmem:[%s11797_s10 + $0xfc8] sm:$0xff] }
 0x2b6   : > { %7520 = vmatprep.subr.bf16.mxu0 %v10056_v31  ;;  %7848 = vmatprep.subr.bf16.mxu1 %v10058_v32  ;;  %v10112_v31 = vcombine.high %v1607_v22, %v1611_v23  ;;  %v10114_v32 = vcombine.high %v1608_v26, %v1612_v27  ;;  %v1659_v16 = vld [vmem:[%s11797_s10 + $0xfe0] sm:$0xff]  ;;  %v1660_v9 = vld [vmem:[%s11797_s10 + $0xfe8] sm:$0xff] }
 0x2b9   : > { %7521 = vmatpush1.bf16.msra.mxu0 %v10055_v19  ;;  %7849 = vmatpush1.bf16.msra.mxu1 %v10057_v38  ;;  %v10111_v19 = vcombine.low %v1607_v22, %v1611_v23  ;;  %v10113_v38 = vcombine.low %v1608_v26, %v1612_v27  ;;  %v1663_v22 = vld [vmem:[%s11797_s10 + $0x1000] sm:$0xff]  ;;  %v1664_v26 = vld [vmem:[%s11797_s10 + $0x1008] sm:$0xff] }
 0x2ba   : > { %7522 = vmatprep.subr.bf16.mxu0 %v10064_v24  ;;  %7850 = vmatprep.subr.bf16.mxu1 %v10066_v25  ;;  %v10120_v24 = vcombine.high %v1615_v33, %v1619_v35  ;;  %v10122_v25 = vcombine.high %v1616_v36, %v1620_v37  ;;  %v1667_v23 = vld [vmem:[%s11797_s10 + $0x1020] sm:$0xff]  ;;  %v1668_v27 = vld [vmem:[%s11797_s10 + $0x1028] sm:$0xff] }
 0x2bd   : > { %7523 = vmatpush1.bf16.msra.mxu0 %v10063_v42  ;;  %7851 = vmatpush1.bf16.msra.mxu1 %v10065_v43  ;;  %v10119_v42 = vcombine.low %v1615_v33, %v1619_v35  ;;  %v10121_v43 = vcombine.low %v1616_v36, %v1620_v37  ;;  %v1671_v33 = vld [vmem:[%s11797_s10 + $0x1040] sm:$0xff]  ;;  %v12170_v36 = vcombine.low %v12096_v8, %v12096_v8  ;;  %v1672_v37 = vld [vmem:[%s11797_s10 + $0x1048] sm:$0xff] }
 0x2be   : > { %7524 = vmatprep.subr.bf16.mxu0 %v10072_v44  ;;  %7852 = vmatprep.subr.bf16.mxu1 %v10074_v45  ;;  %v10128_v44 = vcombine.high %v1623_v39, %v1627_v30  ;;  %v10130_v45 = vcombine.high %v1624_v40, %v1628_v41  ;;  %v1675_v35 = vld [vmem:[%s11797_s10 + $0x1060] sm:$0xff] }
 0x2c1   : > { %7525 = vmatpush1.bf16.msra.mxu0 %v10071_v50  ;;  %7853 = vmatpush1.bf16.msra.mxu1 %v10073_v51  ;;  %v10127_v50 = vcombine.low %v1623_v39, %v1627_v30  ;;  %v10129_v51 = vcombine.low %v1624_v40, %v1628_v41  ;;  %v10176_v39 = vcombine.high %v1671_v33, %v1675_v35  ;;  %v1679_v40 = vld [vmem:[%s11797_s10 + $0x1080] sm:$0xff] }
 0x2c2   : > { %7526 = vmatprep.subr.bf16.mxu0 %v10080_v53  ;;  %7854 = vmatprep.subr.bf16.mxu1 %v10082_v54  ;;  %v10136_v53 = vcombine.high %v1631_v46, %v1635_v47  ;;  %v10138_v54 = vcombine.high %v1632_v48, %v1636_v49  ;;  %v1683_v41 = vld [vmem:[%s11797_s10 + $0x10a0] sm:$0xff] }
 0x2c5   : > { %7527 = vmatpush1.bf16.msra.mxu0 %v10079_v60  ;;  %7855 = vmatpush1.bf16.msra.mxu1 %v10081_v61  ;;  %v10135_v60 = vcombine.low %v1631_v46, %v1635_v47  ;;  %v10137_v61 = vcombine.low %v1632_v48, %v1636_v49  ;;  %v10184_v46 = vcombine.high %v1679_v40, %v1683_v41  ;;  %v1687_v48 = vld [vmem:[%s11797_s10 + $0x10c0] sm:$0xff] }
 0x2c6   : > { %7528 = vmatprep.subr.bf16.mxu0 %v10088_v62  ;;  %7856 = vmatprep.subr.bf16.mxu1 %v10090_v34  ;;  %v10144_v62 = vcombine.high %v1639_v56, %v1643_v57  ;;  %v10146_v34 = vcombine.high %v1640_v58, %v1644_v59  ;;  %v1691_v49 = vld [vmem:[%s11797_s10 + $0x10e0] sm:$0xff] }
 0x2c9   : > { %7529 = vmatpush1.bf16.msra.mxu0 %v10087_v11  ;;  %7857 = vmatpush1.bf16.msra.mxu1 %v10089_v12  ;;  %v10143_v11 = vcombine.low %v1639_v56, %v1643_v57  ;;  %v10145_v12 = vcombine.low %v1640_v58, %v1644_v59  ;;  %v10192_v56 = vcombine.high %v1687_v48, %v1691_v49  ;;  %v1695_v58 = vld [vmem:[%s11797_s10 + $0x1100] sm:$0xff] }
 0x2ca   : > { %7530 = vmatprep.subr.bf16.mxu0 %v10096_v55  ;;  %7858 = vmatprep.subr.bf16.mxu1 %v10098_v14  ;;  %v10152_v55 = vcombine.high %v1647_v2, %v1651_v3  ;;  %v10154_v14 = vcombine.high %v1648_v4, %v1652_v7  ;;  %v1699_v59 = vld [vmem:[%s11797_s10 + $0x1120] sm:$0xff] }
 0x2cd   : > { %7531 = vmatpush1.bf16.msra.mxu0 %v10095_v10  ;;  %7859 = vmatpush1.bf16.msra.mxu1 %v10097_v18  ;;  %v10151_v10 = vcombine.low %v1647_v2, %v1651_v3  ;;  %v10153_v18 = vcombine.low %v1648_v4, %v1652_v7  ;;  %v10200_v2 = vcombine.high %v1695_v58, %v1699_v59  ;;  %v1703_v4 = vld [vmem:[%s11797_s10 + $0x1140] sm:$0xff] }
 0x2ce   : > { %7532 = vmatprep.subr.bf16.mxu0 %v10104_v20  ;;  %7860 = vmatprep.subr.bf16.mxu1 %v10106_v21  ;;  %v10160_v20 = vcombine.high %v1655_v15, %v1659_v16  ;;  %v10162_v21 = vcombine.high %v1656_v17, %v1660_v9  ;;  %v1707_v7 = vld [vmem:[%s11797_s10 + $0x1160] sm:$0xff] }
 0x2d1   : > { %7533 = vmatpush1.bf16.msra.mxu0 %v10103_v28  ;;  %7861 = vmatpush1.bf16.msra.mxu1 %v10105_v29  ;;  %v10159_v28 = vcombine.low %v1655_v15, %v1659_v16  ;;  %v10161_v29 = vcombine.low %v1656_v17, %v1660_v9  ;;  %v10208_v15 = vcombine.high %v1703_v4, %v1707_v7  ;;  %v1711_v17 = vld [vmem:[%s11797_s10 + $0x1180] sm:$0xff] }
 0x2d2   : > { %7534 = vmatprep.subr.bf16.mxu0 %v10112_v31  ;;  %7862 = vmatprep.subr.bf16.mxu1 %v10114_v32  ;;  %v10168_v31 = vcombine.high %v1663_v22, %v1667_v23  ;;  %v10170_v32 = vcombine.high %v1664_v26, %v1668_v27  ;;  %v1715_v9 = vld [vmem:[%s11797_s10 + $0x11a0] sm:$0xff] }
 0x2d5   : > { %7535 = vmatpush1.bf16.msra.mxu0 %v10111_v19  ;;  %7863 = vmatpush1.bf16.msra.mxu1 %v10113_v38  ;;  %v1676_v19 = vld [vmem:[%s11797_s10 + $0x1068] sm:$0xff]  ;;  %v12174_v38 = vld [vmem:[#allocation2 + $0x20] sm:$0xff] }
 0x2d6   : > { %7536 = vmatprep.subr.bf16.mxu0 %v10120_v24  ;;  %7864 = vmatprep.subr.bf16.mxu1 %v10122_v25  ;;  %v10167_v24 = vcombine.low %v1663_v22, %v1667_v23  ;;  %v10169_v25 = vcombine.low %v1664_v26, %v1668_v27  ;;  %v10178_v30 = vcombine.high %v1672_v37, %v1676_v19  ;;  %v1719_v26 = vld [vmem:[%s11797_s10 + $0x11c0] sm:$0xff] }
 0x2d7   : > { %v12180_v8 = vcombine.high %v12174_v38, %v12174_v38  ;;  %v10216_v22 = vcombine.high %v1711_v17, %v1715_v9  ;;  %v1723_v27 = vld [vmem:[%s11797_s10 + $0x11e0] sm:$0xff] }
 0x2d9   : > { %7537 = vmatpush1.bf16.msra.mxu0 %v10119_v42  ;;  %7865 = vmatpush1.bf16.msra.mxu1 %v10121_v43  ;;  %v1680_v42 = vld [vmem:[%s11797_s10 + $0x1088] sm:$0xff] }
 0x2da   : > { %7538 = vmatprep.subr.bf16.mxu0 %v10128_v44  ;;  %7866 = vmatprep.subr.bf16.mxu1 %v10130_v45  ;;  %v1684_v43 = vld [vmem:[%s11797_s10 + $0x10a8] sm:$0xff]  ;;  %v10175_v44 = vcombine.low %v1671_v33, %v1675_v35  ;;  %v10177_v45 = vcombine.low %v1672_v37, %v1676_v19  ;;  %v10224_v33 = vcombine.high %v1719_v26, %v1723_v27  ;;  %v1727_v37 = vld [vmem:[%s11797_s10 + $0x1200] sm:$0xff] }
 0x2db   : > { %v10186_v47 = vcombine.high %v1680_v42, %v1684_v43  ;;  %v1731_v19 = vld [vmem:[%s11797_s10 + $0x1220] sm:$0xff] }
 0x2dd   : > { %7539 = vmatpush1.bf16.msra.mxu0 %v10127_v50  ;;  %7867 = vmatpush1.bf16.msra.mxu1 %v10129_v51  ;;  %v1688_v50 = vld [vmem:[%s11797_s10 + $0x10c8] sm:$0xff] }
 0x2de   : > { %7540 = vmatprep.subr.bf16.mxu0 %v10136_v53  ;;  %7868 = vmatprep.subr.bf16.mxu1 %v10138_v54  ;;  %v1692_v51 = vld [vmem:[%s11797_s10 + $0x10e8] sm:$0xff]  ;;  %v10183_v53 = vcombine.low %v1679_v40, %v1683_v41  ;;  %v10185_v54 = vcombine.low %v1680_v42, %v1684_v43  ;;  %v10232_v40 = vcombine.high %v1727_v37, %v1731_v19  ;;  %v1735_v42 = vld [vmem:[%s11797_s10 + $0x1240] sm:$0xff] }
 0x2df   : > { %v10194_v57 = vcombine.high %v1688_v50, %v1692_v51  ;;  %v1739_v43 = vld [vmem:[%s11797_s10 + $0x1260] sm:$0xff] }
 0x2e1   : > { %7541 = vmatpush1.bf16.msra.mxu0 %v10135_v60  ;;  %7869 = vmatpush1.bf16.msra.mxu1 %v10137_v61  ;;  %v1696_v60 = vld [vmem:[%s11797_s10 + $0x1108] sm:$0xff] }
 0x2e2   : > { %7542 = vmatprep.subr.bf16.mxu0 %v10144_v62  ;;  %7870 = vmatprep.subr.bf16.mxu1 %v10146_v34  ;;  %v1700_v61 = vld [vmem:[%s11797_s10 + $0x1128] sm:$0xff]  ;;  %v10191_v62 = vcombine.low %v1687_v48, %v1691_v49  ;;  %v10193_v34 = vcombine.low %v1688_v50, %v1692_v51  ;;  %v10240_v48 = vcombine.high %v1735_v42, %v1739_v43  ;;  %v1743_v50 = vld [vmem:[%s11797_s10 + $0x1280] sm:$0xff] }
 0x2e3   : > { %v10202_v3 = vcombine.high %v1696_v60, %v1700_v61  ;;  %v1747_v51 = vld [vmem:[%s11797_s10 + $0x12a0] sm:$0xff] }
 0x2e5   : > { %7543 = vmatpush1.bf16.msra.mxu0 %v10143_v11  ;;  %7871 = vmatpush1.bf16.msra.mxu1 %v10145_v12  ;;  %v1704_v11 = vld [vmem:[%s11797_s10 + $0x1148] sm:$0xff] }
 0x2e6   : > { %7544 = vmatprep.subr.bf16.mxu0 %v10152_v55  ;;  %7872 = vmatprep.subr.bf16.mxu1 %v10154_v14  ;;  %v1708_v12 = vld [vmem:[%s11797_s10 + $0x1168] sm:$0xff]  ;;  %v10199_v55 = vcombine.low %v1695_v58, %v1699_v59  ;;  %v10201_v14 = vcombine.low %v1696_v60, %v1700_v61  ;;  %v10248_v58 = vcombine.high %v1743_v50, %v1747_v51  ;;  %v1751_v60 = vld [vmem:[%s11797_s10 + $0x12c0] sm:$0xff] }
 0x2e7   : > { %v10210_v16 = vcombine.high %v1704_v11, %v1708_v12  ;;  %v1755_v61 = vld [vmem:[%s11797_s10 + $0x12e0] sm:$0xff] }
 0x2e9   : > { %7545 = vmatpush1.bf16.msra.mxu0 %v10151_v10  ;;  %7873 = vmatpush1.bf16.msra.mxu1 %v10153_v18  ;;  %v1712_v10 = vld [vmem:[%s11797_s10 + $0x1188] sm:$0xff] }
 0x2ea   : > { %7546 = vmatprep.subr.bf16.mxu0 %v10160_v20  ;;  %7874 = vmatprep.subr.bf16.mxu1 %v10162_v21  ;;  %v1716_v18 = vld [vmem:[%s11797_s10 + $0x11a8] sm:$0xff]  ;;  %v10207_v20 = vcombine.low %v1703_v4, %v1707_v7  ;;  %v10209_v21 = vcombine.low %v1704_v11, %v1708_v12  ;;  %v10256_v4 = vcombine.high %v1751_v60, %v1755_v61  ;;  %v1759_v11 = vld [vmem:[%s11797_s10 + $0x1300] sm:$0xff] }
 0x2eb   : > { %v10218_v23 = vcombine.high %v1712_v10, %v1716_v18  ;;  %v1763_v12 = vld [vmem:[%s11797_s10 + $0x1320] sm:$0xff] }
 0x2ed   : > { %7547 = vmatpush1.bf16.msra.mxu0 %v10159_v28  ;;  %7875 = vmatpush1.bf16.msra.mxu1 %v10161_v29  ;;  %v1720_v28 = vld [vmem:[%s11797_s10 + $0x11c8] sm:$0xff] }
 0x2ee   : > { %7557 = vmatprep.subr.bf16.mxu0 %v10168_v31  ;;  %7885 = vmatprep.subr.bf16.mxu1 %v10170_v32  ;;  %v1724_v29 = vld [vmem:[%s11797_s10 + $0x11e8] sm:$0xff]  ;;  %v10215_v31 = vcombine.low %v1711_v17, %v1715_v9  ;;  %v10217_v32 = vcombine.low %v1712_v10, %v1716_v18  ;;  %v10264_v17 = vcombine.high %v1759_v11, %v1763_v12  ;;  %v1767_v10 = vld [vmem:[%s11797_s10 + $0x1340] sm:$0xff] }
 0x2ef   : > { %v10226_v35 = vcombine.high %v1720_v28, %v1724_v29  ;;  %v1771_v18 = vld [vmem:[%s11797_s10 + $0x1360] sm:$0xff] }
 0x2f0   : > { %7549 = vmatmul.mubr.bf16.vlgmr.msra.gmra.mrb[0].mxu0 %v12170_v36  ;;  %7877 = vmatmul.mubr.bf16.vlgmr.msra.gmra.mrb[0].mxu1 %v12170_v36 }
 0x2f1   : > { %7558 = vmatpush1.bf16.msra.mxu0 %v10167_v24  ;;  %7886 = vmatpush1.bf16.msra.mxu1 %v10169_v25  ;;  %v1728_v24 = vld [vmem:[%s11797_s10 + $0x1208] sm:$0xff] }
 0x2f2   : > { %7559 = vmatprep.subr.bf16.mxu0 %v10176_v39  ;;  %7887 = vmatprep.subr.bf16.mxu1 %v10178_v30  ;;  %v1732_v25 = vld [vmem:[%s11797_s10 + $0x1228] sm:$0xff]  ;;  %v10223_v39 = vcombine.low %v1719_v26, %v1723_v27  ;;  %v10225_v30 = vcombine.low %v1720_v28, %v1724_v29  ;;  %v10272_v26 = vcombine.high %v1767_v10, %v1771_v18  ;;  %v1775_v28 = vld [vmem:[%s11797_s10 + $0x1380] sm:$0xff] }
 0x2f3   : > { %7589 = vmatprep.mubr.bf16.mxu0 %v12180_v8  ;;  %7917 = vmatprep.mubr.bf16.mxu1 %v12180_v8  ;;  %v10234_v41 = vcombine.high %v1728_v24, %v1732_v25  ;;  %v1779_v29 = vld [vmem:[%s11797_s10 + $0x13a0] sm:$0xff] }
 0x2f5   : > { %7560 = vmatpush1.bf16.msra.mxu0 %v10175_v44  ;;  %7888 = vmatpush1.bf16.msra.mxu1 %v10177_v45  ;;  %v1736_v44 = vld [vmem:[%s11797_s10 + $0x1248] sm:$0xff] }
 0x2f6   : > { %7561 = vmatprep.subr.bf16.mxu0 %v10184_v46  ;;  %7889 = vmatprep.subr.bf16.mxu1 %v10186_v47  ;;  %v1740_v45 = vld [vmem:[%s11797_s10 + $0x1268] sm:$0xff]  ;;  %v10231_v46 = vcombine.low %v1727_v37, %v1731_v19  ;;  %v10233_v47 = vcombine.low %v1728_v24, %v1732_v25  ;;  %v10280_v37 = vcombine.high %v1775_v28, %v1779_v29  ;;  %v1783_v24 = vld [vmem:[%s11797_s10 + $0x13c0] sm:$0xff] }
 0x2f7   : > { %v10242_v49 = vcombine.high %v1736_v44, %v1740_v45  ;;  %v1787_v25 = vld [vmem:[%s11797_s10 + $0x13e0] sm:$0xff] }
 0x2f9   : > { %7562 = vmatpush1.bf16.msra.mxu0 %v10183_v53  ;;  %7890 = vmatpush1.bf16.msra.mxu1 %v10185_v54  ;;  %v1744_v53 = vld [vmem:[%s11797_s10 + $0x1288] sm:$0xff] }
 0x2fa   : > { %7563 = vmatprep.subr.bf16.mxu0 %v10192_v56  ;;  %7891 = vmatprep.subr.bf16.mxu1 %v10194_v57  ;;  %v1748_v54 = vld [vmem:[%s11797_s10 + $0x12a8] sm:$0xff]  ;;  %v10239_v56 = vcombine.low %v1735_v42, %v1739_v43  ;;  %v10241_v57 = vcombine.low %v1736_v44, %v1740_v45  ;;  %v10288_v42 = vcombine.high %v1783_v24, %v1787_v25  ;;  %v1791_v44 = vld [vmem:[%s11797_s10 + $0x1400] sm:$0xff] }
 0x2fb   : > { %v10250_v59 = vcombine.high %v1744_v53, %v1748_v54  ;;  %v1795_v45 = vld [vmem:[%s11797_s10 + $0x1420] sm:$0xff] }
 0x2fd   : > { %7564 = vmatpush1.bf16.msra.mxu0 %v10191_v62  ;;  %7892 = vmatpush1.bf16.msra.mxu1 %v10193_v34  ;;  %v1752_v62 = vld [vmem:[%s11797_s10 + $0x12c8] sm:$0xff] }
 0x2fe   : > { %7565 = vmatprep.subr.bf16.mxu0 %v10200_v2  ;;  %7893 = vmatprep.subr.bf16.mxu1 %v10202_v3  ;;  %v1756_v34 = vld [vmem:[%s11797_s10 + $0x12e8] sm:$0xff]  ;;  %v10247_v2 = vcombine.low %v1743_v50, %v1747_v51  ;;  %v10249_v3 = vcombine.low %v1744_v53, %v1748_v54  ;;  %v10296_v50 = vcombine.high %v1791_v44, %v1795_v45  ;;  %v1799_v53 = vld [vmem:[%s11797_s10 + $0x1440] sm:$0xff] }
 0x2ff   : > { %v10258_v7 = vcombine.high %v1752_v62, %v1756_v34  ;;  %v1803_v54 = vld [vmem:[%s11797_s10 + $0x1460] sm:$0xff] }
 0x301   : > { %7566 = vmatpush1.bf16.msra.mxu0 %v10199_v55  ;;  %7894 = vmatpush1.bf16.msra.mxu1 %v10201_v14  ;;  %v1760_v55 = vld [vmem:[%s11797_s10 + $0x1308] sm:$0xff] }
 0x302   : > { %7567 = vmatprep.subr.bf16.mxu0 %v10208_v15  ;;  %7895 = vmatprep.subr.bf16.mxu1 %v10210_v16  ;;  %v1764_v14 = vld [vmem:[%s11797_s10 + $0x1328] sm:$0xff]  ;;  %v10255_v15 = vcombine.low %v1751_v60, %v1755_v61  ;;  %v10257_v16 = vcombine.low %v1752_v62, %v1756_v34  ;;  %v10295_v60 = vcombine.low %v1791_v44, %v1795_v45 }
 0x303   : > { %v10266_v9 = vcombine.high %v1760_v55, %v1764_v14  ;;  %v10304_v62 = vcombine.high %v1799_v53, %v1803_v54 }
 0x305   : > { %7568 = vmatpush1.bf16.msra.mxu0 %v10207_v20  ;;  %7896 = vmatpush1.bf16.msra.mxu1 %v10209_v21  ;;  %v1768_v20 = vld [vmem:[%s11797_s10 + $0x1348] sm:$0xff] }
 0x306   : > { %7569 = vmatprep.subr.bf16.mxu0 %v10216_v22  ;;  %7897 = vmatprep.subr.bf16.mxu1 %v10218_v23  ;;  %v1772_v21 = vld [vmem:[%s11797_s10 + $0x1368] sm:$0xff]  ;;  %v10263_v22 = vcombine.low %v1759_v11, %v1763_v12  ;;  %v10265_v23 = vcombine.low %v1760_v55, %v1764_v14  ;;  %v10303_v11 = vcombine.low %v1799_v53, %v1803_v54 }
 0x307   : > { %v10274_v27 = vcombine.high %v1768_v20, %v1772_v21 }
 0x309   : > { %7570 = vmatpush1.bf16.msra.mxu0 %v10215_v31  ;;  %7898 = vmatpush1.bf16.msra.mxu1 %v10217_v32  ;;  %v1776_v31 = vld [vmem:[%s11797_s10 + $0x1388] sm:$0xff] }
 0x30a   : > { %7571 = vmatprep.subr.bf16.mxu0 %v10224_v33  ;;  %7899 = vmatprep.subr.bf16.mxu1 %v10226_v35  ;;  %v1780_v32 = vld [vmem:[%s11797_s10 + $0x13a8] sm:$0xff]  ;;  %v10271_v33 = vcombine.low %v1767_v10, %v1771_v18  ;;  %v10273_v35 = vcombine.low %v1768_v20, %v1772_v21 }
 0x30b   : > { %v10282_v19 = vcombine.high %v1776_v31, %v1780_v32 }
 0x30d   : > { %7572 = vmatpush1.bf16.msra.mxu0 %v10223_v39  ;;  %7900 = vmatpush1.bf16.msra.mxu1 %v10225_v30  ;;  %v1784_v39 = vld [vmem:[%s11797_s10 + $0x13c8] sm:$0xff] }
 0x30e   : > { %7573 = vmatprep.subr.bf16.mxu0 %v10232_v40  ;;  %7901 = vmatprep.subr.bf16.mxu1 %v10234_v41  ;;  %v1788_v30 = vld [vmem:[%s11797_s10 + $0x13e8] sm:$0xff]  ;;  %v10279_v40 = vcombine.low %v1775_v28, %v1779_v29  ;;  %v10281_v41 = vcombine.low %v1776_v31, %v1780_v32 }
 0x30f   : > { %v10290_v43 = vcombine.high %v1784_v39, %v1788_v30 }
 0x311   : > { %7574 = vmatpush1.bf16.msra.mxu0 %v10231_v46  ;;  %7902 = vmatpush1.bf16.msra.mxu1 %v10233_v47  ;;  %v1792_v46 = vld [vmem:[%s11797_s10 + $0x1408] sm:$0xff] }
 0x312   : > { %7575 = vmatprep.subr.bf16.mxu0 %v10240_v48  ;;  %7903 = vmatprep.subr.bf16.mxu1 %v10242_v49  ;;  %v1796_v47 = vld [vmem:[%s11797_s10 + $0x1428] sm:$0xff]  ;;  %v10287_v48 = vcombine.low %v1783_v24, %v1787_v25  ;;  %v10289_v49 = vcombine.low %v1784_v39, %v1788_v30 }
 0x313   : > { %v10298_v51 = vcombine.high %v1792_v46, %v1796_v47  ;;  %v10297_v61 = vcombine.low %v1792_v46, %v1796_v47 }
 0x315   : > { %7576 = vmatpush1.bf16.msra.mxu0 %v10239_v56  ;;  %7904 = vmatpush1.bf16.msra.mxu1 %v10241_v57  ;;  %v12248_v56 = vcombine.low %v12174_v38, %v12174_v38  ;;  %v1800_v57 = vld [vmem:[%s11797_s10 + $0x1448] sm:$0xff] }
 0x316   : > { %7577 = vmatprep.subr.bf16.mxu0 %v10248_v58  ;;  %7905 = vmatprep.subr.bf16.mxu1 %v10250_v59  ;;  %v1804_v58 = vld [vmem:[%s11797_s10 + $0x1468] sm:$0xff] }
 0x317   : > { %v12252_v59 = vld [vmem:[#allocation2 + $0x28] sm:$0xff]  ;;  %v10306_v34 = vcombine.high %v1800_v57, %v1804_v58  ;;  %v10305_v12 = vcombine.low %v1800_v57, %v1804_v58 }
 0x318   : > { %v12258_v38 = vcombine.high %v12252_v59, %v12252_v59 }
 0x319   : > { %7578 = vmatpush1.bf16.msra.mxu0 %v10247_v2  ;;  %7906 = vmatpush1.bf16.msra.mxu1 %v10249_v3  ;;  %v1807_v2 = vld [vmem:[%s11797_s10 + $0x1480] sm:$0xff] }
 0x31a   : > { %7579 = vmatprep.subr.bf16.mxu0 %v10256_v4  ;;  %7907 = vmatprep.subr.bf16.mxu1 %v10258_v7  ;;  %v1811_v3 = vld [vmem:[%s11797_s10 + $0x14a0] sm:$0xff]  ;;  %v1808_v4 = vld [vmem:[%s11797_s10 + $0x1488] sm:$0xff] }
 0x31b   : > { %v1812_v7 = vld [vmem:[%s11797_s10 + $0x14a8] sm:$0xff]  ;;  %v10312_v55 = vcombine.high %v1807_v2, %v1811_v3  ;;  %v10311_v10 = vcombine.low %v1807_v2, %v1811_v3 }
 0x31c   : > { %v10314_v14 = vcombine.high %v1808_v4, %v1812_v7  ;;  %v10313_v18 = vcombine.low %v1808_v4, %v1812_v7 }
 0x31d   : > { %7580 = vmatpush1.bf16.msra.mxu0 %v10255_v15  ;;  %7908 = vmatpush1.bf16.msra.mxu1 %v10257_v16  ;;  %v1815_v15 = vld [vmem:[%s11797_s10 + $0x14c0] sm:$0xff] }
 0x31e   : > { %7581 = vmatprep.subr.bf16.mxu0 %v10264_v17  ;;  %7909 = vmatprep.subr.bf16.mxu1 %v10266_v9  ;;  %v1819_v16 = vld [vmem:[%s11797_s10 + $0x14e0] sm:$0xff]  ;;  %v1816_v17 = vld [vmem:[%s11797_s10 + $0x14c8] sm:$0xff] }
 0x31f   : > { %v1820_v9 = vld [vmem:[%s11797_s10 + $0x14e8] sm:$0xff]  ;;  %v10320_v20 = vcombine.high %v1815_v15, %v1819_v16  ;;  %v10319_v28 = vcombine.low %v1815_v15, %v1819_v16 }
 0x320   : > { %v10322_v21 = vcombine.high %v1816_v17, %v1820_v9  ;;  %v10321_v29 = vcombine.low %v1816_v17, %v1820_v9 }
 0x321   : > { %7582 = vmatpush1.bf16.msra.mxu0 %v10263_v22  ;;  %7910 = vmatpush1.bf16.msra.mxu1 %v10265_v23  ;;  %v1823_v22 = vld [vmem:[%s11797_s10 + $0x1500] sm:$0xff] }
 0x322   : > { %7583 = vmatprep.subr.bf16.mxu0 %v10272_v26  ;;  %7911 = vmatprep.subr.bf16.mxu1 %v10274_v27  ;;  %v1827_v23 = vld [vmem:[%s11797_s10 + $0x1520] sm:$0xff]  ;;  %v1824_v26 = vld [vmem:[%s11797_s10 + $0x1508] sm:$0xff] }
 0x323   : > { %v1828_v27 = vld [vmem:[%s11797_s10 + $0x1528] sm:$0xff]  ;;  %v10328_v31 = vcombine.high %v1823_v22, %v1827_v23  ;;  %v10327_v24 = vcombine.low %v1823_v22, %v1827_v23 }
 0x324   : > { %v10330_v32 = vcombine.high %v1824_v26, %v1828_v27  ;;  %v10329_v25 = vcombine.low %v1824_v26, %v1828_v27 }
 0x325   : > { %7584 = vmatpush1.bf16.msra.mxu0 %v10271_v33  ;;  %7912 = vmatpush1.bf16.msra.mxu1 %v10273_v35  ;;  %v1831_v33 = vld [vmem:[%s11797_s10 + $0x1540] sm:$0xff] }
 0x326   : > { %7585 = vmatprep.subr.bf16.mxu0 %v10280_v37  ;;  %7913 = vmatprep.subr.bf16.mxu1 %v10282_v19  ;;  %v1835_v35 = vld [vmem:[%s11797_s10 + $0x1560] sm:$0xff]  ;;  %v1832_v37 = vld [vmem:[%s11797_s10 + $0x1548] sm:$0xff] }
 0x327   : > { %v1836_v19 = vld [vmem:[%s11797_s10 + $0x1568] sm:$0xff]  ;;  %v10336_v39 = vcombine.high %v1831_v33, %v1835_v35  ;;  %v10335_v44 = vcombine.low %v1831_v33, %v1835_v35 }
 0x328   : > { %v10338_v30 = vcombine.high %v1832_v37, %v1836_v19  ;;  %v10337_v45 = vcombine.low %v1832_v37, %v1836_v19 }
 0x329   : > { %7586 = vmatpush1.bf16.msra.mxu0 %v10279_v40  ;;  %7914 = vmatpush1.bf16.msra.mxu1 %v10281_v41  ;;  %v1839_v40 = vld [vmem:[%s11797_s10 + $0x1580] sm:$0xff] }
 0x32a   : > { %7587 = vmatprep.subr.bf16.mxu0 %v10288_v42  ;;  %7915 = vmatprep.subr.bf16.mxu1 %v10290_v43  ;;  %v1843_v41 = vld [vmem:[%s11797_s10 + $0x15a0] sm:$0xff]  ;;  %v1840_v42 = vld [vmem:[%s11797_s10 + $0x1588] sm:$0xff] }
 0x32b   : > { %v1844_v43 = vld [vmem:[%s11797_s10 + $0x15a8] sm:$0xff]  ;;  %v10344_v46 = vcombine.high %v1839_v40, %v1843_v41  ;;  %v10343_v53 = vcombine.low %v1839_v40, %v1843_v41 }
 0x32c   : > { %v10346_v47 = vcombine.high %v1840_v42, %v1844_v43  ;;  %v10345_v54 = vcombine.low %v1840_v42, %v1844_v43 }
 0x32d   : > { %7588 = vmatpush1.bf16.msra.mxu0 %v10287_v48  ;;  %7916 = vmatpush1.bf16.msra.mxu1 %v10289_v49  ;;  %v1847_v48 = vld [vmem:[%s11797_s10 + $0x15c0] sm:$0xff] }
 0x32e   : > { %7598 = vmatprep.subr.bf16.mxu0 %v10296_v50  ;;  %7926 = vmatprep.subr.bf16.mxu1 %v10298_v51  ;;  %v1851_v49 = vld [vmem:[%s11797_s10 + $0x15e0] sm:$0xff]  ;;  %v1848_v50 = vld [vmem:[%s11797_s10 + $0x15c8] sm:$0xff] }
 0x32f   : > { %v1852_v51 = vld [vmem:[%s11797_s10 + $0x15e8] sm:$0xff]  ;;  %v10352_v57 = vcombine.high %v1847_v48, %v1851_v49  ;;  %v10351_v2 = vcombine.low %v1847_v48, %v1851_v49 }
 0x330   : > { %7590 = vmatmul.mubr.bf16.vlgmr.msra.gmra.mrb[0].mxu0 %v12248_v56  ;;  %7918 = vmatmul.mubr.bf16.vlgmr.msra.gmra.mrb[0].mxu1 %v12248_v56  ;;  %v10354_v58 = vcombine.high %v1848_v50, %v1852_v51  ;;  %v10353_v3 = vcombine.low %v1848_v50, %v1852_v51 }
 0x331   : > { %7599 = vmatpush1.bf16.msra.mxu0 %v10295_v60  ;;  %7927 = vmatpush1.bf16.msra.mxu1 %v10297_v61  ;;  %v1855_v60 = vld [vmem:[%s11797_s10 + $0x1600] sm:$0xff] }
 0x332   : > { %7600 = vmatprep.subr.bf16.mxu0 %v10304_v62  ;;  %7928 = vmatprep.subr.bf16.mxu1 %v10306_v34  ;;  %v1859_v61 = vld [vmem:[%s11797_s10 + $0x1620] sm:$0xff]  ;;  %v1856_v62 = vld [vmem:[%s11797_s10 + $0x1608] sm:$0xff] }
 0x333   : > { %7630 = vmatprep.mubr.bf16.mxu0 %v12258_v38  ;;  %7958 = vmatprep.mubr.bf16.mxu1 %v12258_v38  ;;  %v1860_v34 = vld [vmem:[%s11797_s10 + $0x1628] sm:$0xff]  ;;  %v10360_v4 = vcombine.high %v1855_v60, %v1859_v61  ;;  %v10359_v15 = vcombine.low %v1855_v60, %v1859_v61 }
 0x334   : > { %v10362_v7 = vcombine.high %v1856_v62, %v1860_v34  ;;  %v10361_v16 = vcombine.low %v1856_v62, %v1860_v34 }
 0x335   : > { %7601 = vmatpush1.bf16.msra.mxu0 %v10303_v11  ;;  %7929 = vmatpush1.bf16.msra.mxu1 %v10305_v12  ;;  %v1863_v11 = vld [vmem:[%s11797_s10 + $0x1640] sm:$0xff] }
 0x336   : > { %7602 = vmatprep.subr.bf16.mxu0 %v10312_v55  ;;  %7930 = vmatprep.subr.bf16.mxu1 %v10314_v14  ;;  %v1867_v12 = vld [vmem:[%s11797_s10 + $0x1660] sm:$0xff]  ;;  %v1864_v55 = vld [vmem:[%s11797_s10 + $0x1648] sm:$0xff] }
 0x337   : > { %v1868_v14 = vld [vmem:[%s11797_s10 + $0x1668] sm:$0xff]  ;;  %v10368_v17 = vcombine.high %v1863_v11, %v1867_v12  ;;  %v10367_v22 = vcombine.low %v1863_v11, %v1867_v12 }
 0x338   : > { %v10370_v9 = vcombine.high %v1864_v55, %v1868_v14  ;;  %v10369_v23 = vcombine.low %v1864_v55, %v1868_v14 }
 0x339   : > { %7603 = vmatpush1.bf16.msra.mxu0 %v10311_v10  ;;  %7931 = vmatpush1.bf16.msra.mxu1 %v10313_v18  ;;  %v1871_v10 = vld [vmem:[%s11797_s10 + $0x1680] sm:$0xff] }
 0x33a   : > { %7604 = vmatprep.subr.bf16.mxu0 %v10320_v20  ;;  %7932 = vmatprep.subr.bf16.mxu1 %v10322_v21  ;;  %v1875_v18 = vld [vmem:[%s11797_s10 + $0x16a0] sm:$0xff]  ;;  %v1872_v20 = vld [vmem:[%s11797_s10 + $0x1688] sm:$0xff] }
 0x33b   : > { %v1876_v21 = vld [vmem:[%s11797_s10 + $0x16a8] sm:$0xff]  ;;  %v10376_v26 = vcombine.high %v1871_v10, %v1875_v18  ;;  %v10375_v33 = vcombine.low %v1871_v10, %v1875_v18 }
 0x33c   : > { %v10378_v27 = vcombine.high %v1872_v20, %v1876_v21  ;;  %v10377_v35 = vcombine.low %v1872_v20, %v1876_v21 }
 0x33d   : > { %7605 = vmatpush1.bf16.msra.mxu0 %v10319_v28  ;;  %7933 = vmatpush1.bf16.msra.mxu1 %v10321_v29  ;;  %v1879_v28 = vld [vmem:[%s11797_s10 + $0x16c0] sm:$0xff] }
 0x33e   : > { %7606 = vmatprep.subr.bf16.mxu0 %v10328_v31  ;;  %7934 = vmatprep.subr.bf16.mxu1 %v10330_v32  ;;  %v1883_v29 = vld [vmem:[%s11797_s10 + $0x16e0] sm:$0xff]  ;;  %v1880_v31 = vld [vmem:[%s11797_s10 + $0x16c8] sm:$0xff] }
 0x33f   : > { %v1884_v32 = vld [vmem:[%s11797_s10 + $0x16e8] sm:$0xff]  ;;  %v10384_v37 = vcombine.high %v1879_v28, %v1883_v29  ;;  %v10383_v40 = vcombine.low %v1879_v28, %v1883_v29  ;;  %v12330_v29 = vld [vmem:[#allocation2 + $0x30] sm:$0xff] }
 0x340   : > { %v10386_v19 = vcombine.high %v1880_v31, %v1884_v32  ;;  %v10385_v41 = vcombine.low %v1880_v31, %v1884_v32  ;;  %v1932_v28 = vld [vmem:[%s11797_s10 + $0x1868] sm:$0xff] }
 0x341   : > { %7607 = vmatpush1.bf16.msra.mxu0 %v10327_v24  ;;  %7935 = vmatpush1.bf16.msra.mxu1 %v10329_v25  ;;  %v1887_v24 = vld [vmem:[%s11797_s10 + $0x1700] sm:$0xff] }
 0x342   : > { %7608 = vmatprep.subr.bf16.mxu0 %v10336_v39  ;;  %7936 = vmatprep.subr.bf16.mxu1 %v10338_v30  ;;  %v1891_v25 = vld [vmem:[%s11797_s10 + $0x1720] sm:$0xff]  ;;  %v1888_v39 = vld [vmem:[%s11797_s10 + $0x1708] sm:$0xff] }
 0x343   : > { %v1892_v30 = vld [vmem:[%s11797_s10 + $0x1728] sm:$0xff]  ;;  %v10392_v42 = vcombine.high %v1887_v24, %v1891_v25  ;;  %v10391_v48 = vcombine.low %v1887_v24, %v1891_v25 }
 0x344   : > { %v10394_v43 = vcombine.high %v1888_v39, %v1892_v30  ;;  %v10393_v49 = vcombine.low %v1888_v39, %v1892_v30  ;;  %v1936_v24 = vld [vmem:[%s11797_s10 + $0x1888] sm:$0xff] }
 0x345   : > { %7609 = vmatpush1.bf16.msra.mxu0 %v10335_v44  ;;  %7937 = vmatpush1.bf16.msra.mxu1 %v10337_v45  ;;  %v1895_v44 = vld [vmem:[%s11797_s10 + $0x1740] sm:$0xff]  ;;  %v1940_v25 = vld [vmem:[%s11797_s10 + $0x18a8] sm:$0xff] }
 0x346   : > { %7610 = vmatprep.subr.bf16.mxu0 %v10344_v46  ;;  %7938 = vmatprep.subr.bf16.mxu1 %v10346_v47  ;;  %v1899_v45 = vld [vmem:[%s11797_s10 + $0x1760] sm:$0xff]  ;;  %v1896_v46 = vld [vmem:[%s11797_s10 + $0x1748] sm:$0xff] }
 0x347   : > { %v1900_v47 = vld [vmem:[%s11797_s10 + $0x1768] sm:$0xff]  ;;  %v10400_v50 = vcombine.high %v1895_v44, %v1899_v45  ;;  %v10399_v60 = vcombine.low %v1895_v44, %v1899_v45 }
 0x348   : > { %v10402_v51 = vcombine.high %v1896_v46, %v1900_v47  ;;  %v10401_v61 = vcombine.low %v1896_v46, %v1900_v47  ;;  %v1944_v44 = vld [vmem:[%s11797_s10 + $0x18c8] sm:$0xff]  ;;  %v10441_v47 = vcombine.low %v1936_v24, %v1940_v25 }
 0x349   : > { %7611 = vmatpush1.bf16.msra.mxu0 %v10343_v53  ;;  %7939 = vmatpush1.bf16.msra.mxu1 %v10345_v54  ;;  %v1903_v53 = vld [vmem:[%s11797_s10 + $0x1780] sm:$0xff]  ;;  %v1948_v45 = vld [vmem:[%s11797_s10 + $0x18e8] sm:$0xff] }
 0x34a   : > { %7612 = vmatprep.subr.bf16.mxu0 %v10352_v57  ;;  %7940 = vmatprep.subr.bf16.mxu1 %v10354_v58  ;;  %v1907_v54 = vld [vmem:[%s11797_s10 + $0x17a0] sm:$0xff]  ;;  %v1904_v57 = vld [vmem:[%s11797_s10 + $0x1788] sm:$0xff] }
 0x34b   : > { %v1908_v58 = vld [vmem:[%s11797_s10 + $0x17a8] sm:$0xff]  ;;  %v10408_v62 = vcombine.high %v1903_v53, %v1907_v54  ;;  %v10407_v11 = vcombine.low %v1903_v53, %v1907_v54 }
 0x34c   : > { %v10410_v34 = vcombine.high %v1904_v57, %v1908_v58  ;;  %v10409_v12 = vcombine.low %v1904_v57, %v1908_v58  ;;  %v1952_v53 = vld [vmem:[%s11797_s10 + $0x1908] sm:$0xff]  ;;  %v10449_v58 = vcombine.low %v1944_v44, %v1948_v45 }
 0x34d   : > { %7613 = vmatpush1.bf16.msra.mxu0 %v10351_v2  ;;  %7941 = vmatpush1.bf16.msra.mxu1 %v10353_v3  ;;  %v1911_v2 = vld [vmem:[%s11797_s10 + $0x17c0] sm:$0xff]  ;;  %v1956_v54 = vld [vmem:[%s11797_s10 + $0x1928] sm:$0xff] }
 0x34e   : > { %7614 = vmatprep.subr.bf16.mxu0 %v10360_v4  ;;  %7942 = vmatprep.subr.bf16.mxu1 %v10362_v7  ;;  %v1915_v3 = vld [vmem:[%s11797_s10 + $0x17e0] sm:$0xff]  ;;  %v1912_v4 = vld [vmem:[%s11797_s10 + $0x17c8] sm:$0xff] }
 0x34f   : > { %v1916_v7 = vld [vmem:[%s11797_s10 + $0x17e8] sm:$0xff]  ;;  %v10416_v55 = vcombine.high %v1911_v2, %v1915_v3  ;;  %v10415_v10 = vcombine.low %v1911_v2, %v1915_v3 }
 0x350   : > { %v10418_v14 = vcombine.high %v1912_v4, %v1916_v7  ;;  %v10417_v18 = vcombine.low %v1912_v4, %v1916_v7  ;;  %v1960_v2 = vld [vmem:[%s11797_s10 + $0x1948] sm:$0xff]  ;;  %v10457_v7 = vcombine.low %v1952_v53, %v1956_v54 }
 0x351   : > { %7615 = vmatpush1.bf16.msra.mxu0 %v10359_v15  ;;  %7943 = vmatpush1.bf16.msra.mxu1 %v10361_v16  ;;  %v1919_v15 = vld [vmem:[%s11797_s10 + $0x1800] sm:$0xff]  ;;  %v1964_v3 = vld [vmem:[%s11797_s10 + $0x1968] sm:$0xff] }
 0x352   : > { %7616 = vmatprep.subr.bf16.mxu0 %v10368_v17  ;;  %7944 = vmatprep.subr.bf16.mxu1 %v10370_v9  ;;  %v1923_v16 = vld [vmem:[%s11797_s10 + $0x1820] sm:$0xff]  ;;  %v1920_v17 = vld [vmem:[%s11797_s10 + $0x1808] sm:$0xff] }
 0x353   : > { %v1924_v9 = vld [vmem:[%s11797_s10 + $0x1828] sm:$0xff]  ;;  %v10424_v20 = vcombine.high %v1919_v15, %v1923_v16  ;;  %v10423_v31 = vcombine.low %v1919_v15, %v1923_v16 }
 0x354   : > { %v10426_v21 = vcombine.high %v1920_v17, %v1924_v9  ;;  %v10425_v32 = vcombine.low %v1920_v17, %v1924_v9  ;;  %v1968_v15 = vld [vmem:[%s11797_s10 + $0x1988] sm:$0xff]  ;;  %v10465_v9 = vcombine.low %v1960_v2, %v1964_v3 }
 0x355   : > { %7617 = vmatpush1.bf16.msra.mxu0 %v10367_v22  ;;  %7945 = vmatpush1.bf16.msra.mxu1 %v10369_v23  ;;  %v1927_v22 = vld [vmem:[%s11797_s10 + $0x1840] sm:$0xff]  ;;  %v1972_v16 = vld [vmem:[%s11797_s10 + $0x19a8] sm:$0xff] }
 0x356   : > { %7618 = vmatprep.subr.bf16.mxu0 %v10376_v26  ;;  %7946 = vmatprep.subr.bf16.mxu1 %v10378_v27  ;;  %v1931_v23 = vld [vmem:[%s11797_s10 + $0x1860] sm:$0xff]  ;;  %v12326_v26 = vcombine.low %v12252_v59, %v12252_v59  ;;  %v1928_v27 = vld [vmem:[%s11797_s10 + $0x1848] sm:$0xff]  ;;  %v12336_v59 = vcombine.high %v12330_v29, %v12330_v29 }
 0x357   : > { %v10431_v39 = vcombine.low %v1927_v22, %v1931_v23  ;;  %v10433_v30 = vcombine.low %v1928_v27, %v1932_v28 }
 0x359   : > { %7619 = vmatpush1.bf16.msra.mxu0 %v10375_v33  ;;  %7947 = vmatpush1.bf16.msra.mxu1 %v10377_v35  ;;  %v10432_v33 = vcombine.high %v1927_v22, %v1931_v23  ;;  %v10434_v35 = vcombine.high %v1928_v27, %v1932_v28  ;;  %v1976_v22 = vld [vmem:[%s11797_s10 + $0x19c8] sm:$0xff]  ;;  %v10473_v28 = vcombine.low %v1968_v15, %v1972_v16 }
 0x35a   : > { %7620 = vmatprep.subr.bf16.mxu0 %v10384_v37  ;;  %7948 = vmatprep.subr.bf16.mxu1 %v10386_v19  ;;  %v1935_v37 = vld [vmem:[%s11797_s10 + $0x1880] sm:$0xff]  ;;  %v1980_v23 = vld [vmem:[%s11797_s10 + $0x19e8] sm:$0xff] }
 0x35b   : > { %v1939_v19 = vld [vmem:[%s11797_s10 + $0x18a0] sm:$0xff] }
 0x35c   : > { %v10439_v46 = vcombine.low %v1935_v37, %v1939_v19 }
 0x35d   : > { %7621 = vmatpush1.bf16.msra.mxu0 %v10383_v40  ;;  %7949 = vmatpush1.bf16.msra.mxu1 %v10385_v41  ;;  %v10440_v40 = vcombine.high %v1935_v37, %v1939_v19  ;;  %v10442_v41 = vcombine.high %v1936_v24, %v1940_v25  ;;  %v1984_v37 = vld [vmem:[%s11797_s10 + $0x1a08] sm:$0xff]  ;;  %v10481_v25 = vcombine.low %v1976_v22, %v1980_v23 }
 0x35e   : > { %7622 = vmatprep.subr.bf16.mxu0 %v10392_v42  ;;  %7950 = vmatprep.subr.bf16.mxu1 %v10394_v43  ;;  %v1943_v42 = vld [vmem:[%s11797_s10 + $0x18c0] sm:$0xff]  ;;  %v1988_v19 = vld [vmem:[%s11797_s10 + $0x1a28] sm:$0xff] }
 0x35f   : > { %v1947_v43 = vld [vmem:[%s11797_s10 + $0x18e0] sm:$0xff] }
 0x360   : > { %v10447_v57 = vcombine.low %v1943_v42, %v1947_v43 }
 0x361   : > { %7623 = vmatpush1.bf16.msra.mxu0 %v10391_v48  ;;  %7951 = vmatpush1.bf16.msra.mxu1 %v10393_v49  ;;  %v10448_v48 = vcombine.high %v1943_v42, %v1947_v43  ;;  %v10450_v49 = vcombine.high %v1944_v44, %v1948_v45  ;;  %v1992_v42 = vld [vmem:[%s11797_s10 + $0x1a48] sm:$0xff]  ;;  %v10489_v45 = vcombine.low %v1984_v37, %v1988_v19 }
 0x362   : > { %7624 = vmatprep.subr.bf16.mxu0 %v10400_v50  ;;  %7952 = vmatprep.subr.bf16.mxu1 %v10402_v51  ;;  %v1951_v50 = vld [vmem:[%s11797_s10 + $0x1900] sm:$0xff]  ;;  %v1996_v43 = vld [vmem:[%s11797_s10 + $0x1a68] sm:$0xff] }
 0x363   : > { %v1955_v51 = vld [vmem:[%s11797_s10 + $0x1920] sm:$0xff] }
 0x364   : > { %v10455_v4 = vcombine.low %v1951_v50, %v1955_v51 }
 0x365   : > { %7625 = vmatpush1.bf16.msra.mxu0 %v10399_v60  ;;  %7953 = vmatpush1.bf16.msra.mxu1 %v10401_v61  ;;  %v10456_v60 = vcombine.high %v1951_v50, %v1955_v51  ;;  %v10458_v61 = vcombine.high %v1952_v53, %v1956_v54  ;;  %v2000_v50 = vld [vmem:[%s11797_s10 + $0x1a88] sm:$0xff]  ;;  %v10497_v54 = vcombine.low %v1992_v42, %v1996_v43 }
 0x366   : > { %7626 = vmatprep.subr.bf16.mxu0 %v10408_v62  ;;  %7954 = vmatprep.subr.bf16.mxu1 %v10410_v34  ;;  %v1959_v62 = vld [vmem:[%s11797_s10 + $0x1940] sm:$0xff]  ;;  %v2004_v51 = vld [vmem:[%s11797_s10 + $0x1aa8] sm:$0xff] }
 0x367   : > { %v1963_v34 = vld [vmem:[%s11797_s10 + $0x1960] sm:$0xff] }
 0x368   : > { %v10463_v17 = vcombine.low %v1959_v62, %v1963_v34 }
 0x369   : > { %7627 = vmatpush1.bf16.msra.mxu0 %v10407_v11  ;;  %7955 = vmatpush1.bf16.msra.mxu1 %v10409_v12  ;;  %v10464_v11 = vcombine.high %v1959_v62, %v1963_v34  ;;  %v10466_v12 = vcombine.high %v1960_v2, %v1964_v3  ;;  %v2008_v62 = vld [vmem:[%s11797_s10 + $0x1ac8] sm:$0xff]  ;;  %v10505_v3 = vcombine.low %v2000_v50, %v2004_v51 }
 0x36a   : > { %7628 = vmatprep.subr.bf16.mxu0 %v10416_v55  ;;  %7956 = vmatprep.subr.bf16.mxu1 %v10418_v14  ;;  %v1967_v55 = vld [vmem:[%s11797_s10 + $0x1980] sm:$0xff]  ;;  %v2012_v34 = vld [vmem:[%s11797_s10 + $0x1ae8] sm:$0xff] }
 0x36b   : > { %v1971_v14 = vld [vmem:[%s11797_s10 + $0x19a0] sm:$0xff] }
 0x36c   : > { %v10471_v27 = vcombine.low %v1967_v55, %v1971_v14 }
 0x36d   : > { %7629 = vmatpush1.bf16.msra.mxu0 %v10415_v10  ;;  %7957 = vmatpush1.bf16.msra.mxu1 %v10417_v18  ;;  %v10472_v10 = vcombine.high %v1967_v55, %v1971_v14  ;;  %v10474_v18 = vcombine.high %v1968_v15, %v1972_v16  ;;  %v2016_v55 = vld [vmem:[%s11797_s10 + $0x1b08] sm:$0xff]  ;;  %v10513_v16 = vcombine.low %v2008_v62, %v2012_v34 }
 0x36e   : > { %7639 = vmatprep.subr.bf16.mxu0 %v10424_v20  ;;  %7967 = vmatprep.subr.bf16.mxu1 %v10426_v21  ;;  %v1975_v20 = vld [vmem:[%s11797_s10 + $0x19c0] sm:$0xff]  ;;  %v2020_v14 = vld [vmem:[%s11797_s10 + $0x1b28] sm:$0xff] }
 0x36f   : > { %v1979_v21 = vld [vmem:[%s11797_s10 + $0x19e0] sm:$0xff] }
 0x370   : > { %7631 = vmatmul.mubr.bf16.vlgmr.msra.gmra.mrb[0].mxu0 %v12326_v26  ;;  %7959 = vmatmul.mubr.bf16.vlgmr.msra.gmra.mrb[0].mxu1 %v12326_v26  ;;  %v10479_v24 = vcombine.low %v1975_v20, %v1979_v21 }
 0x371   : > { %7640 = vmatpush1.bf16.msra.mxu0 %v10423_v31  ;;  %7968 = vmatpush1.bf16.msra.mxu1 %v10425_v32  ;;  %v10480_v31 = vcombine.high %v1975_v20, %v1979_v21  ;;  %v10482_v32 = vcombine.high %v1976_v22, %v1980_v23  ;;  %v2024_v20 = vld [vmem:[%s11797_s10 + $0x1b48] sm:$0xff]  ;;  %v10521_v23 = vcombine.low %v2016_v55, %v2020_v14 }
 0x372   : > { %7641 = vmatprep.subr.bf16.mxu0 %v10432_v33  ;;  %7969 = vmatprep.subr.bf16.mxu1 %v10434_v35  ;;  %v1983_v33 = vld [vmem:[%s11797_s10 + $0x1a00] sm:$0xff]  ;;  %v2028_v21 = vld [vmem:[%s11797_s10 + $0x1b68] sm:$0xff] }
 0x373   : > { %7671 = vmatprep.mubr.bf16.mxu0 %v12336_v59  ;;  %7999 = vmatprep.mubr.bf16.mxu1 %v12336_v59  ;;  %v1987_v35 = vld [vmem:[%s11797_s10 + $0x1a20] sm:$0xff] }
 0x374   : > { %v10487_v44 = vcombine.low %v1983_v33, %v1987_v35 }
 0x375   : > { %7642 = vmatpush1.bf16.msra.mxu0 %v10431_v39  ;;  %7970 = vmatpush1.bf16.msra.mxu1 %v10433_v30  ;;  %v10488_v39 = vcombine.high %v1983_v33, %v1987_v35  ;;  %v10490_v30 = vcombine.high %v1984_v37, %v1988_v19  ;;  %v2032_v33 = vld [vmem:[%s11797_s10 + $0x1b88] sm:$0xff]  ;;  %v10529_v19 = vcombine.low %v2024_v20, %v2028_v21 }
 0x376   : > { %7643 = vmatprep.subr.bf16.mxu0 %v10440_v40  ;;  %7971 = vmatprep.subr.bf16.mxu1 %v10442_v41  ;;  %v1991_v40 = vld [vmem:[%s11797_s10 + $0x1a40] sm:$0xff]  ;;  %v2036_v35 = vld [vmem:[%s11797_s10 + $0x1ba8] sm:$0xff] }
 0x377   : > { %v1995_v41 = vld [vmem:[%s11797_s10 + $0x1a60] sm:$0xff] }
 0x378   : > { %v10495_v53 = vcombine.low %v1991_v40, %v1995_v41 }
 0x379   : > { %7644 = vmatpush1.bf16.msra.mxu0 %v10439_v46  ;;  %7972 = vmatpush1.bf16.msra.mxu1 %v10441_v47  ;;  %v10496_v46 = vcombine.high %v1991_v40, %v1995_v41  ;;  %v10498_v47 = vcombine.high %v1992_v42, %v1996_v43  ;;  %v2040_v40 = vld [vmem:[%s11797_s10 + $0x1bc8] sm:$0xff]  ;;  %v10537_v43 = vcombine.low %v2032_v33, %v2036_v35 }
 0x37a   : > { %7645 = vmatprep.subr.bf16.mxu0 %v10448_v48  ;;  %7973 = vmatprep.subr.bf16.mxu1 %v10450_v49  ;;  %v1999_v48 = vld [vmem:[%s11797_s10 + $0x1a80] sm:$0xff]  ;;  %v2044_v41 = vld [vmem:[%s11797_s10 + $0x1be8] sm:$0xff] }
 0x37b   : > { %v2003_v49 = vld [vmem:[%s11797_s10 + $0x1aa0] sm:$0xff] }
 0x37c   : > { %v10503_v2 = vcombine.low %v1999_v48, %v2003_v49 }
 0x37d   : > { %7646 = vmatpush1.bf16.msra.mxu0 %v10447_v57  ;;  %7974 = vmatpush1.bf16.msra.mxu1 %v10449_v58  ;;  %v10504_v57 = vcombine.high %v1999_v48, %v2003_v49  ;;  %v10506_v58 = vcombine.high %v2000_v50, %v2004_v51  ;;  %v2048_v48 = vld [vmem:[%s11797_s10 + $0x1c08] sm:$0xff]  ;;  %v10545_v51 = vcombine.low %v2040_v40, %v2044_v41 }
 0x37e   : > { %7647 = vmatprep.subr.bf16.mxu0 %v10456_v60  ;;  %7975 = vmatprep.subr.bf16.mxu1 %v10458_v61  ;;  %v2007_v60 = vld [vmem:[%s11797_s10 + $0x1ac0] sm:$0xff]  ;;  %v2052_v49 = vld [vmem:[%s11797_s10 + $0x1c28] sm:$0xff] }
 0x37f   : > { %v2011_v61 = vld [vmem:[%s11797_s10 + $0x1ae0] sm:$0xff] }
 0x380   : > { %v10511_v15 = vcombine.low %v2007_v60, %v2011_v61 }
 0x381   : > { %7648 = vmatpush1.bf16.msra.mxu0 %v10455_v4  ;;  %7976 = vmatpush1.bf16.msra.mxu1 %v10457_v7  ;;  %v10512_v4 = vcombine.high %v2007_v60, %v2011_v61  ;;  %v10514_v7 = vcombine.high %v2008_v62, %v2012_v34  ;;  %v12404_v60 = vcombine.low %v12330_v29, %v12330_v29  ;;  %v2056_v61 = vld [vmem:[%s11797_s10 + $0x1c48] sm:$0xff]  ;;  %v12408_v34 = vld [vmem:[#allocation2 + $0x38] sm:$0xff] }
 0x382   : > { %7649 = vmatprep.subr.bf16.mxu0 %v10464_v11  ;;  %7977 = vmatprep.subr.bf16.mxu1 %v10466_v12  ;;  %v2015_v11 = vld [vmem:[%s11797_s10 + $0x1b00] sm:$0xff]  ;;  %v2060_v62 = vld [vmem:[%s11797_s10 + $0x1c68] sm:$0xff]  ;;  %v12414_v29 = vcombine.high %v12408_v34, %v12408_v34 }
 0x383   : > { %v2019_v12 = vld [vmem:[%s11797_s10 + $0x1b20] sm:$0xff] }
 0x384   : > { %v10519_v22 = vcombine.low %v2015_v11, %v2019_v12 }
 0x385   : > { %7650 = vmatpush1.bf16.msra.mxu0 %v10463_v17  ;;  %7978 = vmatpush1.bf16.msra.mxu1 %v10465_v9  ;;  %v10520_v17 = vcombine.high %v2015_v11, %v2019_v12  ;;  %v10522_v9 = vcombine.high %v2016_v55, %v2020_v14  ;;  %v2063_v11 = vld [vmem:[%s11797_s10 + $0x1c80] sm:$0xff]  ;;  %v2064_v55 = vld [vmem:[%s11797_s10 + $0x1c88] sm:$0xff] }
 0x386   : > { %7651 = vmatprep.subr.bf16.mxu0 %v10472_v10  ;;  %7979 = vmatprep.subr.bf16.mxu1 %v10474_v18  ;;  %v2023_v10 = vld [vmem:[%s11797_s10 + $0x1b40] sm:$0xff]  ;;  %v2068_v14 = vld [vmem:[%s11797_s10 + $0x1ca8] sm:$0xff] }
 0x387   : > { %v2027_v18 = vld [vmem:[%s11797_s10 + $0x1b60] sm:$0xff] }
 0x388   : > { %v10527_v37 = vcombine.low %v2023_v10, %v2027_v18  ;;  %v2067_v12 = vld [vmem:[%s11797_s10 + $0x1ca0] sm:$0xff] }
 0x389   : > { %7652 = vmatpush1.bf16.msra.mxu0 %v10471_v27  ;;  %7980 = vmatpush1.bf16.msra.mxu1 %v10473_v28  ;;  %v10528_v27 = vcombine.high %v2023_v10, %v2027_v18  ;;  %v10530_v28 = vcombine.high %v2024_v20, %v2028_v21  ;;  %v2071_v10 = vld [vmem:[%s11797_s10 + $0x1cc0] sm:$0xff]  ;;  %v2072_v20 = vld [vmem:[%s11797_s10 + $0x1cc8] sm:$0xff] }
 0x38a   : > { %7653 = vmatprep.subr.bf16.mxu0 %v10480_v31  ;;  %7981 = vmatprep.subr.bf16.mxu1 %v10482_v32  ;;  %v2031_v31 = vld [vmem:[%s11797_s10 + $0x1b80] sm:$0xff]  ;;  %v2076_v21 = vld [vmem:[%s11797_s10 + $0x1ce8] sm:$0xff] }
 0x38b   : > { %v2035_v32 = vld [vmem:[%s11797_s10 + $0x1ba0] sm:$0xff] }
 0x38c   : > { %v10535_v42 = vcombine.low %v2031_v31, %v2035_v32  ;;  %v2075_v18 = vld [vmem:[%s11797_s10 + $0x1ce0] sm:$0xff] }
 0x38d   : > { %7654 = vmatpush1.bf16.msra.mxu0 %v10479_v24  ;;  %7982 = vmatpush1.bf16.msra.mxu1 %v10481_v25  ;;  %v10536_v24 = vcombine.high %v2031_v31, %v2035_v32  ;;  %v10538_v25 = vcombine.high %v2032_v33, %v2036_v35  ;;  %v2079_v31 = vld [vmem:[%s11797_s10 + $0x1d00] sm:$0xff]  ;;  %v2080_v33 = vld [vmem:[%s11797_s10 + $0x1d08] sm:$0xff] }
 0x38e   : > { %7655 = vmatprep.subr.bf16.mxu0 %v10488_v39  ;;  %7983 = vmatprep.subr.bf16.mxu1 %v10490_v30  ;;  %v2039_v39 = vld [vmem:[%s11797_s10 + $0x1bc0] sm:$0xff]  ;;  %v2084_v35 = vld [vmem:[%s11797_s10 + $0x1d28] sm:$0xff] }
 0x38f   : > { %v2043_v30 = vld [vmem:[%s11797_s10 + $0x1be0] sm:$0xff] }
 0x390   : > { %v10543_v50 = vcombine.low %v2039_v39, %v2043_v30  ;;  %v2083_v32 = vld [vmem:[%s11797_s10 + $0x1d20] sm:$0xff] }
 0x391   : > { %7656 = vmatpush1.bf16.msra.mxu0 %v10487_v44  ;;  %7984 = vmatpush1.bf16.msra.mxu1 %v10489_v45  ;;  %v10544_v44 = vcombine.high %v2039_v39, %v2043_v30  ;;  %v10546_v45 = vcombine.high %v2040_v40, %v2044_v41  ;;  %v2087_v39 = vld [vmem:[%s11797_s10 + $0x1d40] sm:$0xff]  ;;  %v2088_v40 = vld [vmem:[%s11797_s10 + $0x1d48] sm:$0xff] }
 0x392   : > { %7657 = vmatprep.subr.bf16.mxu0 %v10496_v46  ;;  %7985 = vmatprep.subr.bf16.mxu1 %v10498_v47  ;;  %v2047_v46 = vld [vmem:[%s11797_s10 + $0x1c00] sm:$0xff]  ;;  %v2092_v41 = vld [vmem:[%s11797_s10 + $0x1d68] sm:$0xff] }
 0x393   : > { %v2051_v47 = vld [vmem:[%s11797_s10 + $0x1c20] sm:$0xff] }
 0x394   : > { %v2091_v30 = vld [vmem:[%s11797_s10 + $0x1d60] sm:$0xff] }
 0x395   : > { %7658 = vmatpush1.bf16.msra.mxu0 %v10495_v53  ;;  %7986 = vmatpush1.bf16.msra.mxu1 %v10497_v54  ;;  %v10552_v53 = vcombine.high %v2047_v46, %v2051_v47  ;;  %v10554_v54 = vcombine.high %v2048_v48, %v2052_v49 }
 0x396   : > { %7659 = vmatprep.subr.bf16.mxu0 %v10504_v57  ;;  %7987 = vmatprep.subr.bf16.mxu1 %v10506_v58  ;;  %v2055_v57 = vld [vmem:[%s11797_s10 + $0x1c40] sm:$0xff] }
 0x397   : > { %v2059_v58 = vld [vmem:[%s11797_s10 + $0x1c60] sm:$0xff] }
 0x399   : > { %7660 = vmatpush1.bf16.msra.mxu0 %v10503_v2  ;;  %7988 = vmatpush1.bf16.msra.mxu1 %v10505_v3  ;;  %v10551_v2 = vcombine.low %v2047_v46, %v2051_v47  ;;  %v10553_v3 = vcombine.low %v2048_v48, %v2052_v49  ;;  %v2095_v46 = vld [vmem:[%s11797_s10 + $0x1d80] sm:$0xff]  ;;  %v2096_v48 = vld [vmem:[%s11797_s10 + $0x1d88] sm:$0xff] }
 0x39a   : > { %7661 = vmatprep.subr.bf16.mxu0 %v10512_v4  ;;  %7989 = vmatprep.subr.bf16.mxu1 %v10514_v7  ;;  %v10560_v4 = vcombine.high %v2055_v57, %v2059_v58  ;;  %v10562_v7 = vcombine.high %v2056_v61, %v2060_v62  ;;  %v2099_v47 = vld [vmem:[%s11797_s10 + $0x1da0] sm:$0xff]  ;;  %v2100_v49 = vld [vmem:[%s11797_s10 + $0x1da8] sm:$0xff] }
 0x39d   : > { %7662 = vmatpush1.bf16.msra.mxu0 %v10511_v15  ;;  %7990 = vmatpush1.bf16.msra.mxu1 %v10513_v16  ;;  %v10559_v15 = vcombine.low %v2055_v57, %v2059_v58  ;;  %v10561_v16 = vcombine.low %v2056_v61, %v2060_v62  ;;  %v2103_v57 = vld [vmem:[%s11797_s10 + $0x1dc0] sm:$0xff]  ;;  %v2104_v61 = vld [vmem:[%s11797_s10 + $0x1dc8] sm:$0xff] }
 0x39e   : > { %7663 = vmatprep.subr.bf16.mxu0 %v10520_v17  ;;  %7991 = vmatprep.subr.bf16.mxu1 %v10522_v9  ;;  %v10568_v17 = vcombine.high %v2063_v11, %v2067_v12  ;;  %v10570_v9 = vcombine.high %v2064_v55, %v2068_v14  ;;  %v2107_v58 = vld [vmem:[%s11797_s10 + $0x1de0] sm:$0xff]  ;;  %v2108_v62 = vld [vmem:[%s11797_s10 + $0x1de8] sm:$0xff] }
 0x3a1   : > { %7664 = vmatpush1.bf16.msra.mxu0 %v10519_v22  ;;  %7992 = vmatpush1.bf16.msra.mxu1 %v10521_v23  ;;  %v10567_v22 = vcombine.low %v2063_v11, %v2067_v12  ;;  %v10569_v23 = vcombine.low %v2064_v55, %v2068_v14  ;;  %v2111_v11 = vld [vmem:[%s11797_s10 + $0x1e00] sm:$0xff]  ;;  %v2112_v55 = vld [vmem:[%s11797_s10 + $0x1e08] sm:$0xff] }
 0x3a2   : > { %7665 = vmatprep.subr.bf16.mxu0 %v10528_v27  ;;  %7993 = vmatprep.subr.bf16.mxu1 %v10530_v28  ;;  %v10576_v27 = vcombine.high %v2071_v10, %v2075_v18  ;;  %v10578_v28 = vcombine.high %v2072_v20, %v2076_v21  ;;  %v2115_v12 = vld [vmem:[%s11797_s10 + $0x1e20] sm:$0xff]  ;;  %v2116_v14 = vld [vmem:[%s11797_s10 + $0x1e28] sm:$0xff] }
 0x3a5   : > { %7666 = vmatpush1.bf16.msra.mxu0 %v10527_v37  ;;  %7994 = vmatpush1.bf16.msra.mxu1 %v10529_v19  ;;  %v10575_v37 = vcombine.low %v2071_v10, %v2075_v18  ;;  %v10577_v19 = vcombine.low %v2072_v20, %v2076_v21  ;;  %v2119_v10 = vld [vmem:[%s11797_s10 + $0x1e40] sm:$0xff]  ;;  %v2120_v20 = vld [vmem:[%s11797_s10 + $0x1e48] sm:$0xff] }
 0x3a6   : > { %7667 = vmatprep.subr.bf16.mxu0 %v10536_v24  ;;  %7995 = vmatprep.subr.bf16.mxu1 %v10538_v25  ;;  %v10584_v24 = vcombine.high %v2079_v31, %v2083_v32  ;;  %v10586_v25 = vcombine.high %v2080_v33, %v2084_v35  ;;  %v2123_v18 = vld [vmem:[%s11797_s10 + $0x1e60] sm:$0xff]  ;;  %v2124_v21 = vld [vmem:[%s11797_s10 + $0x1e68] sm:$0xff] }
 0x3a9   : > { %7668 = vmatpush1.bf16.msra.mxu0 %v10535_v42  ;;  %7996 = vmatpush1.bf16.msra.mxu1 %v10537_v43  ;;  %v10583_v42 = vcombine.low %v2079_v31, %v2083_v32  ;;  %v10585_v43 = vcombine.low %v2080_v33, %v2084_v35  ;;  %v2127_v31 = vld [vmem:[%s11797_s10 + $0x1e80] sm:$0xff]  ;;  %v2128_v33 = vld [vmem:[%s11797_s10 + $0x1e88] sm:$0xff] }
 0x3aa   : > { %7669 = vmatprep.subr.bf16.mxu0 %v10544_v44  ;;  %7997 = vmatprep.subr.bf16.mxu1 %v10546_v45  ;;  %v10592_v44 = vcombine.high %v2087_v39, %v2091_v30  ;;  %v10594_v45 = vcombine.high %v2088_v40, %v2092_v41  ;;  %v2131_v32 = vld [vmem:[%s11797_s10 + $0x1ea0] sm:$0xff]  ;;  %v2132_v35 = vld [vmem:[%s11797_s10 + $0x1ea8] sm:$0xff] }
 0x3ad   : > { %7670 = vmatpush1.bf16.msra.mxu0 %v10543_v50  ;;  %7998 = vmatpush1.bf16.msra.mxu1 %v10545_v51  ;;  %v10591_v50 = vcombine.low %v2087_v39, %v2091_v30  ;;  %v10593_v51 = vcombine.low %v2088_v40, %v2092_v41  ;;  %v2135_v39 = vld [vmem:[%s11797_s10 + $0x1ec0] sm:$0xff]  ;;  %v2136_v40 = vld [vmem:[%s11797_s10 + $0x1ec8] sm:$0xff] }
 0x3ae   : > { %7680 = vmatprep.subr.bf16.mxu0 %v10552_v53  ;;  %8008 = vmatprep.subr.bf16.mxu1 %v10554_v54  ;;  %v10600_v53 = vcombine.high %v2095_v46, %v2099_v47  ;;  %v10602_v54 = vcombine.high %v2096_v48, %v2100_v49  ;;  %v2139_v30 = vld [vmem:[%s11797_s10 + $0x1ee0] sm:$0xff]  ;;  %v2140_v41 = vld [vmem:[%s11797_s10 + $0x1ee8] sm:$0xff] }
 0x3b0   : > { %7672 = vmatmul.mubr.bf16.vlgmr.msra.gmra.mrb[0].mxu0 %v12404_v60  ;;  %8000 = vmatmul.mubr.bf16.vlgmr.msra.gmra.mrb[0].mxu1 %v12404_v60 }
 0x3b1   : > { %7681 = vmatpush1.bf16.msra.mxu0 %v10551_v2  ;;  %8009 = vmatpush1.bf16.msra.mxu1 %v10553_v3  ;;  %v10599_v2 = vcombine.low %v2095_v46, %v2099_v47  ;;  %v10601_v3 = vcombine.low %v2096_v48, %v2100_v49  ;;  %v2143_v46 = vld [vmem:[%s11797_s10 + $0x1f00] sm:$0xff]  ;;  %v2144_v48 = vld [vmem:[%s11797_s10 + $0x1f08] sm:$0xff] }
 0x3b2   : > { %7682 = vmatprep.subr.bf16.mxu0 %v10560_v4  ;;  %8010 = vmatprep.subr.bf16.mxu1 %v10562_v7  ;;  %v10608_v4 = vcombine.high %v2103_v57, %v2107_v58  ;;  %v10610_v7 = vcombine.high %v2104_v61, %v2108_v62  ;;  %v2147_v47 = vld [vmem:[%s11797_s10 + $0x1f20] sm:$0xff]  ;;  %v2148_v49 = vld [vmem:[%s11797_s10 + $0x1f28] sm:$0xff] }
 0x3b3   : > { %7712 = vmatprep.mubr.bf16.mxu0 %v12414_v29  ;;  %8040 = vmatprep.mubr.bf16.mxu1 %v12414_v29 }
 0x3b5   : > { %7683 = vmatpush1.bf16.msra.mxu0 %v10559_v15  ;;  %8011 = vmatpush1.bf16.msra.mxu1 %v10561_v16  ;;  %v10607_v15 = vcombine.low %v2103_v57, %v2107_v58  ;;  %v10609_v16 = vcombine.low %v2104_v61, %v2108_v62  ;;  %v2151_v57 = vld [vmem:[%s11797_s10 + $0x1f40] sm:$0xff]  ;;  %v2152_v61 = vld [vmem:[%s11797_s10 + $0x1f48] sm:$0xff] }
 0x3b6   : > { %7684 = vmatprep.subr.bf16.mxu0 %v10568_v17  ;;  %8012 = vmatprep.subr.bf16.mxu1 %v10570_v9  ;;  %v10616_v17 = vcombine.high %v2111_v11, %v2115_v12  ;;  %v10618_v9 = vcombine.high %v2112_v55, %v2116_v14  ;;  %v2155_v58 = vld [vmem:[%s11797_s10 + $0x1f60] sm:$0xff]  ;;  %v2156_v62 = vld [vmem:[%s11797_s10 + $0x1f68] sm:$0xff] }
 0x3b9   : > { %7685 = vmatpush1.bf16.msra.mxu0 %v10567_v22  ;;  %8013 = vmatpush1.bf16.msra.mxu1 %v10569_v23  ;;  %v10615_v22 = vcombine.low %v2111_v11, %v2115_v12  ;;  %v10617_v23 = vcombine.low %v2112_v55, %v2116_v14  ;;  %v2159_v11 = vld [vmem:[%s11797_s10 + $0x1f80] sm:$0xff]  ;;  %v2160_v55 = vld [vmem:[%s11797_s10 + $0x1f88] sm:$0xff] }
 0x3ba   : > { %7686 = vmatprep.subr.bf16.mxu0 %v10576_v27  ;;  %8014 = vmatprep.subr.bf16.mxu1 %v10578_v28  ;;  %v10624_v27 = vcombine.high %v2119_v10, %v2123_v18  ;;  %v10626_v28 = vcombine.high %v2120_v20, %v2124_v21  ;;  %v2163_v12 = vld [vmem:[%s11797_s10 + $0x1fa0] sm:$0xff]  ;;  %v2164_v14 = vld [vmem:[%s11797_s10 + $0x1fa8] sm:$0xff] }
 0x3bd   : > { %7687 = vmatpush1.bf16.msra.mxu0 %v10575_v37  ;;  %8015 = vmatpush1.bf16.msra.mxu1 %v10577_v19  ;;  %v10623_v37 = vcombine.low %v2119_v10, %v2123_v18  ;;  %v10625_v19 = vcombine.low %v2120_v20, %v2124_v21  ;;  %v2167_v10 = vld [vmem:[%s11797_s10 + $0x1fc0] sm:$0xff]  ;;  %v2168_v20 = vld [vmem:[%s11797_s10 + $0x1fc8] sm:$0xff] }
 0x3be   : > { %7688 = vmatprep.subr.bf16.mxu0 %v10584_v24  ;;  %8016 = vmatprep.subr.bf16.mxu1 %v10586_v25  ;;  %v10632_v24 = vcombine.high %v2127_v31, %v2131_v32  ;;  %v10634_v25 = vcombine.high %v2128_v33, %v2132_v35  ;;  %v2171_v18 = vld [vmem:[%s11797_s10 + $0x1fe0] sm:$0xff]  ;;  %v2172_v21 = vld [vmem:[%s11797_s10 + $0x1fe8] sm:$0xff] }
 0x3c1   : > { %7689 = vmatpush1.bf16.msra.mxu0 %v10583_v42  ;;  %8017 = vmatpush1.bf16.msra.mxu1 %v10585_v43  ;;  %v10631_v42 = vcombine.low %v2127_v31, %v2131_v32  ;;  %v10633_v43 = vcombine.low %v2128_v33, %v2132_v35  ;;  %v1153_v31 = vld [vmem:[%s11797_s10 + $0x10] sm:$0xff]  ;;  %v1154_v33 = vld [vmem:[%s11797_s10 + $0x18] sm:$0xff] }
 0x3c2   : > { %7690 = vmatprep.subr.bf16.mxu0 %v10592_v44  ;;  %8018 = vmatprep.subr.bf16.mxu1 %v10594_v45  ;;  %v10640_v44 = vcombine.high %v2135_v39, %v2139_v30  ;;  %v10642_v45 = vcombine.high %v2136_v40, %v2140_v41  ;;  %v1157_v32 = vld [vmem:[%s11797_s10 + $0x30] sm:$0xff]  ;;  %v1158_v35 = vld [vmem:[%s11797_s10 + $0x38] sm:$0xff] }
 0x3c5   : > { %7691 = vmatpush1.bf16.msra.mxu0 %v10591_v50  ;;  %8019 = vmatpush1.bf16.msra.mxu1 %v10593_v51  ;;  %v10639_v50 = vcombine.low %v2135_v39, %v2139_v30  ;;  %v10641_v51 = vcombine.low %v2136_v40, %v2140_v41  ;;  %v1161_v39 = vld [vmem:[%s11797_s10 + $0x50] sm:$0xff]  ;;  %v12482_v40 = vcombine.low %v12408_v34, %v12408_v34  ;;  %v1162_v41 = vld [vmem:[%s11797_s10 + $0x58] sm:$0xff] }
 0x3c6   : > { %7692 = vmatprep.subr.bf16.mxu0 %v10600_v53  ;;  %8020 = vmatprep.subr.bf16.mxu1 %v10602_v54  ;;  %v10648_v53 = vcombine.high %v2143_v46, %v2147_v47  ;;  %v10650_v54 = vcombine.high %v2144_v48, %v2148_v49  ;;  %v1165_v30 = vld [vmem:[%s11797_s10 + $0x70] sm:$0xff]  ;;  %v1170_v34 = vld [vmem:[%s11797_s10 + $0x98] sm:$0xff] }
 0x3c9   : > { %7693 = vmatpush1.bf16.msra.mxu0 %v10599_v2  ;;  %8021 = vmatpush1.bf16.msra.mxu1 %v10601_v3  ;;  %v10647_v2 = vcombine.low %v2143_v46, %v2147_v47  ;;  %v10649_v3 = vcombine.low %v2144_v48, %v2148_v49  ;;  %v1169_v47 = vld [vmem:[%s11797_s10 + $0x90] sm:$0xff]  ;;  %v1174_v49 = vld [vmem:[%s11797_s10 + $0xb8] sm:$0xff] }
 0x3ca   : > { %7694 = vmatprep.subr.bf16.mxu0 %v10608_v4  ;;  %8022 = vmatprep.subr.bf16.mxu1 %v10610_v7  ;;  %v10656_v4 = vcombine.high %v2151_v57, %v2155_v58  ;;  %v10658_v7 = vcombine.high %v2152_v61, %v2156_v62  ;;  %v1173_v48 = vld [vmem:[%s11797_s10 + $0xb0] sm:$0xff] }
 0x3cd   : > { %7695 = vmatpush1.bf16.msra.mxu0 %v10607_v15  ;;  %8023 = vmatpush1.bf16.msra.mxu1 %v10609_v16  ;;  %v10655_v15 = vcombine.low %v2151_v57, %v2155_v58  ;;  %v10657_v16 = vcombine.low %v2152_v61, %v2156_v62  ;;  %v1177_v57 = vld [vmem:[%s11797_s10 + $0xd0] sm:$0xff]  ;;  %v1178_v61 = vld [vmem:[%s11797_s10 + $0xd8] sm:$0xff] }
 0x3ce   : > { %7696 = vmatprep.subr.bf16.mxu0 %v10616_v17  ;;  %8024 = vmatprep.subr.bf16.mxu1 %v10618_v9  ;;  %v10664_v17 = vcombine.high %v2159_v11, %v2163_v12  ;;  %v10666_v9 = vcombine.high %v2160_v55, %v2164_v14  ;;  %v1181_v58 = vld [vmem:[%s11797_s10 + $0xf0] sm:$0xff]  ;;  %v1182_v62 = vld [vmem:[%s11797_s10 + $0xf8] sm:$0xff] }
 0x3d1   : > { %7697 = vmatpush1.bf16.msra.mxu0 %v10615_v22  ;;  %8025 = vmatpush1.bf16.msra.mxu1 %v10617_v23  ;;  %v10663_v22 = vcombine.low %v2159_v11, %v2163_v12  ;;  %v10665_v23 = vcombine.low %v2160_v55, %v2164_v14  ;;  %v1185_v11 = vld [vmem:[%s11797_s10 + $0x110] sm:$0xff]  ;;  %v1186_v55 = vld [vmem:[%s11797_s10 + $0x118] sm:$0xff] }
 0x3d2   : > { %7698 = vmatprep.subr.bf16.mxu0 %v10624_v27  ;;  %8026 = vmatprep.subr.bf16.mxu1 %v10626_v28  ;;  %v10672_v27 = vcombine.high %v2167_v10, %v2171_v18  ;;  %v10674_v28 = vcombine.high %v2168_v20, %v2172_v21  ;;  %v1189_v12 = vld [vmem:[%s11797_s10 + $0x130] sm:$0xff]  ;;  %v1190_v14 = vld [vmem:[%s11797_s10 + $0x138] sm:$0xff] }
 0x3d5   : > { %7699 = vmatpush1.bf16.msra.mxu0 %v10623_v37  ;;  %8027 = vmatpush1.bf16.msra.mxu1 %v10625_v19  ;;  %v10671_v37 = vcombine.low %v2167_v10, %v2171_v18  ;;  %v10673_v19 = vcombine.low %v2168_v20, %v2172_v21  ;;  %v1197_v10 = vld [vmem:[%s11797_s10 + $0x170] sm:$0xff]  ;;  %v1194_v18 = vld [vmem:[%s11797_s10 + $0x158] sm:$0xff]  ;;  %v9691_v21 = vcombine.low %v1185_v11, %v1189_v12 }
 0x3d6   : > { %7700 = vmatprep.subr.bf16.mxu0 %v10632_v24  ;;  %8028 = vmatprep.subr.bf16.mxu1 %v10634_v25  ;;  %v9660_v24 = vcombine.high %v1153_v31, %v1157_v32  ;;  %v9662_v25 = vcombine.high %v1154_v33, %v1158_v35  ;;  %v1198_v20 = vld [vmem:[%s11797_s10 + $0x178] sm:$0xff] }
 0x3d9   : > { %7701 = vmatpush1.bf16.msra.mxu0 %v10631_v42  ;;  %8029 = vmatpush1.bf16.msra.mxu1 %v10633_v43  ;;  %v1166_v42 = vld [vmem:[%s11797_s10 + $0x78] sm:$0xff]  ;;  %v9659_v43 = vcombine.low %v1153_v31, %v1157_v32  ;;  %v1205_v31 = vld [vmem:[%s11797_s10 + $0x1b0] sm:$0xff] }
 0x3da   : > { %7702 = vmatprep.subr.bf16.mxu0 %v10640_v44  ;;  %8030 = vmatprep.subr.bf16.mxu1 %v10642_v45  ;;  %v9661_v44 = vcombine.low %v1154_v33, %v1158_v35  ;;  %v9668_v45 = vcombine.high %v1161_v39, %v1165_v30  ;;  %v9670_v46 = vcombine.high %v1162_v41, %v1166_v42  ;;  %v1202_v32 = vld [vmem:[%s11797_s10 + $0x198] sm:$0xff] }
 0x3db   : > { %v1206_v33 = vld [vmem:[%s11797_s10 + $0x1b8] sm:$0xff] }
 0x3dd   : > { %7703 = vmatpush1.bf16.msra.mxu0 %v10639_v50  ;;  %8031 = vmatpush1.bf16.msra.mxu1 %v10641_v51  ;;  %v9667_v50 = vcombine.low %v1161_v39, %v1165_v30  ;;  %v9669_v51 = vcombine.low %v1162_v41, %v1166_v42  ;;  %v1213_v39 = vld [vmem:[%s11797_s10 + $0x1f0] sm:$0xff]  ;;  %v1210_v30 = vld [vmem:[%s11797_s10 + $0x1d8] sm:$0xff] }
 0x3de   : > { %7704 = vmatprep.subr.bf16.mxu0 %v10648_v53  ;;  %8032 = vmatprep.subr.bf16.mxu1 %v10650_v54  ;;  %v9676_v53 = vcombine.high %v1169_v47, %v1173_v48  ;;  %v9678_v54 = vcombine.high %v1170_v34, %v1174_v49  ;;  %v1214_v41 = vld [vmem:[%s11797_s10 + $0x1f8] sm:$0xff] }
 0x3e1   : > { %7705 = vmatpush1.bf16.msra.mxu0 %v10647_v2  ;;  %8033 = vmatpush1.bf16.msra.mxu1 %v10649_v3  ;;  %v9675_v2 = vcombine.low %v1169_v47, %v1173_v48  ;;  %v9677_v3 = vcombine.low %v1170_v34, %v1174_v49  ;;  %v1221_v47 = vld [vmem:[%s11797_s10 + $0x230] sm:$0xff]  ;;  %v1218_v48 = vld [vmem:[%s11797_s10 + $0x218] sm:$0xff] }
 0x3e2   : > { %7706 = vmatprep.subr.bf16.mxu0 %v10656_v4  ;;  %8034 = vmatprep.subr.bf16.mxu1 %v10658_v7  ;;  %v9684_v4 = vcombine.high %v1177_v57, %v1181_v58  ;;  %v9686_v7 = vcombine.high %v1178_v61, %v1182_v62  ;;  %v1222_v34 = vld [vmem:[%s11797_s10 + $0x238] sm:$0xff] }
 0x3e5   : > { %7707 = vmatpush1.bf16.msra.mxu0 %v10655_v15  ;;  %8035 = vmatpush1.bf16.msra.mxu1 %v10657_v16  ;;  %v9683_v15 = vcombine.low %v1177_v57, %v1181_v58  ;;  %v9692_v16 = vcombine.high %v1185_v11, %v1189_v12  ;;  %v1229_v57 = vld [vmem:[%s11797_s10 + $0x270] sm:$0xff]  ;;  %v1226_v58 = vld [vmem:[%s11797_s10 + $0x258] sm:$0xff] }
 0x3e6   : > { %7708 = vmatprep.subr.bf16.mxu0 %v10664_v17  ;;  %8036 = vmatprep.subr.bf16.mxu1 %v10666_v9  ;;  %v9694_v17 = vcombine.high %v1186_v55, %v1190_v14  ;;  %v1193_v9 = vld [vmem:[%s11797_s10 + $0x150] sm:$0xff]  ;;  %v1234_v12 = vld [vmem:[%s11797_s10 + $0x298] sm:$0xff] }
 0x3e7   : > { %v9699_v35 = vcombine.low %v1193_v9, %v1197_v10  ;;  %v1237_v11 = vld [vmem:[%s11797_s10 + $0x2b0] sm:$0xff] }
 0x3e9   : > { %7709 = vmatpush1.bf16.msra.mxu0 %v10663_v22  ;;  %8037 = vmatpush1.bf16.msra.mxu1 %v10665_v23  ;;  %v9693_v22 = vcombine.low %v1186_v55, %v1190_v14  ;;  %v9700_v23 = vcombine.high %v1193_v9, %v1197_v10  ;;  %v1238_v55 = vld [vmem:[%s11797_s10 + $0x2b8] sm:$0xff]  ;;  %v1245_v9 = vld [vmem:[%s11797_s10 + $0x2f0] sm:$0xff] }
 0x3ea   : > { %7710 = vmatprep.subr.bf16.mxu0 %v10672_v27  ;;  %8038 = vmatprep.subr.bf16.mxu1 %v10674_v28  ;;  %v9702_v27 = vcombine.high %v1194_v18, %v1198_v20  ;;  %v1201_v28 = vld [vmem:[%s11797_s10 + $0x190] sm:$0xff]  ;;  %v1242_v10 = vld [vmem:[%s11797_s10 + $0x2d8] sm:$0xff] }
 0x3eb   : > { %v9707_v42 = vcombine.low %v1201_v28, %v1205_v31 }
 0x3ed   : > { %7711 = vmatpush1.bf16.msra.mxu0 %v10671_v37  ;;  %8039 = vmatpush1.bf16.msra.mxu1 %v10673_v19  ;;  %v9701_v37 = vcombine.low %v1194_v18, %v1198_v20  ;;  %v9708_v19 = vcombine.high %v1201_v28, %v1205_v31  ;;  %v1246_v18 = vld [vmem:[%s11797_s10 + $0x2f8] sm:$0xff]  ;;  %v1253_v28 = vld [vmem:[%s11797_s10 + $0x330] sm:$0xff] }
 0x3ee   : > { %8049 = vmatprep.subr.bf16.mxu0 %v9660_v24  ;;  %8377 = vmatprep.subr.bf16.mxu1 %v9662_v25  ;;  %v9710_v24 = vcombine.high %v1202_v32, %v1206_v33  ;;  %v1209_v25 = vld [vmem:[%s11797_s10 + $0x1d0] sm:$0xff]  ;;  %v1250_v31 = vld [vmem:[%s11797_s10 + $0x318] sm:$0xff] }
 0x3ef   : > { %v9715_v49 = vcombine.low %v1209_v25, %v1213_v39 }
 0x3f0   : > { %7713 = vmatmul.mubr.bf16.vlgmr.msra.gmra.mrb[0].mxu0 %v12482_v40  ;;  %8041 = vmatmul.mubr.bf16.vlgmr.msra.gmra.mrb[0].mxu1 %v12482_v40 }
 0x3f1   : > { %8050 = vmatpush1.bf16.msra.mxu0 %v9659_v43  ;;  %8378 = vmatpush1.bf16.msra.mxu1 %v9661_v44  ;;  %v9709_v43 = vcombine.low %v1202_v32, %v1206_v33  ;;  %v9716_v44 = vcombine.high %v1209_v25, %v1213_v39  ;;  %v1254_v32 = vld [vmem:[%s11797_s10 + $0x338] sm:$0xff]  ;;  %v1261_v25 = vld [vmem:[%s11797_s10 + $0x370] sm:$0xff] }
 0x3f2   : > { %8051 = vmatprep.subr.bf16.mxu0 %v9668_v45  ;;  %8379 = vmatprep.subr.bf16.mxu1 %v9670_v46  ;;  %v9718_v45 = vcombine.high %v1210_v30, %v1214_v41  ;;  %v1217_v46 = vld [vmem:[%s11797_s10 + $0x210] sm:$0xff]  ;;  %v1258_v39 = vld [vmem:[%s11797_s10 + $0x358] sm:$0xff] }
 0x3f3   : > { %8081 = vmatprep.mubr.bf16.mxu0 %v11890_v5  ;;  %8409 = vmatprep.mubr.bf16.mxu1 %v11890_v5  ;;  %v9685_v5 = vcombine.low %v1178_v61, %v1182_v62  ;;  %v1230_v61 = vld [vmem:[%s11797_s10 + $0x278] sm:$0xff]  ;;  %v9723_v62 = vcombine.low %v1217_v46, %v1221_v47 }
 0x3f5   : > { %8052 = vmatpush1.bf16.msra.mxu0 %v9667_v50  ;;  %8380 = vmatpush1.bf16.msra.mxu1 %v9669_v51  ;;  %v9717_v50 = vcombine.low %v1210_v30, %v1214_v41  ;;  %v9724_v51 = vcombine.high %v1217_v46, %v1221_v47  ;;  %v1262_v30 = vld [vmem:[%s11797_s10 + $0x378] sm:$0xff]  ;;  %v1269_v46 = vld [vmem:[%s11797_s10 + $0x3b0] sm:$0xff] }
 0x3f6   : > { %8053 = vmatprep.subr.bf16.mxu0 %v9676_v53  ;;  %8381 = vmatprep.subr.bf16.mxu1 %v9678_v54  ;;  %v9726_v53 = vcombine.high %v1218_v48, %v1222_v34  ;;  %v1225_v54 = vld [vmem:[%s11797_s10 + $0x250] sm:$0xff]  ;;  %v1266_v47 = vld [vmem:[%s11797_s10 + $0x398] sm:$0xff] }
 0x3f7   : > { %v9731_v14 = vcombine.low %v1225_v54, %v1229_v57 }
 0x3f9   : > { %8054 = vmatpush1.bf16.msra.mxu0 %v9675_v2  ;;  %8382 = vmatpush1.bf16.msra.mxu1 %v9677_v3  ;;  %v9725_v2 = vcombine.low %v1218_v48, %v1222_v34  ;;  %v9732_v3 = vcombine.high %v1225_v54, %v1229_v57  ;;  %v1270_v48 = vld [vmem:[%s11797_s10 + $0x3b8] sm:$0xff]  ;;  %v1277_v54 = vld [vmem:[%s11797_s10 + $0x3f0] sm:$0xff] }
 0x3fa   : > { %8055 = vmatprep.subr.bf16.mxu0 %v9684_v4  ;;  %8383 = vmatprep.subr.bf16.mxu1 %v9686_v7  ;;  %v9734_v4 = vcombine.high %v1226_v58, %v1230_v61  ;;  %v1233_v7 = vld [vmem:[%s11797_s10 + $0x290] sm:$0xff]  ;;  %v1274_v57 = vld [vmem:[%s11797_s10 + $0x3d8] sm:$0xff] }
 0x3fb   : > { %v9739_v20 = vcombine.low %v1233_v7, %v1237_v11 }
 0x3fd   : > { %8056 = vmatpush1.bf16.msra.mxu0 %v9683_v15  ;;  %8384 = vmatpush1.bf16.msra.mxu1 %v9685_v5  ;;  %v9733_v15 = vcombine.low %v1226_v58, %v1230_v61  ;;  %v9740_v5 = vcombine.high %v1233_v7, %v1237_v11  ;;  %v1278_v58 = vld [vmem:[%s11797_s10 + $0x3f8] sm:$0xff]  ;;  %v1285_v7 = vld [vmem:[%s11797_s10 + $0x430] sm:$0xff] }
 0x3fe   : > { %8057 = vmatprep.subr.bf16.mxu0 %v9692_v16  ;;  %8385 = vmatprep.subr.bf16.mxu1 %v9694_v17  ;;  %v9742_v16 = vcombine.high %v1234_v12, %v1238_v55  ;;  %v1241_v17 = vld [vmem:[%s11797_s10 + $0x2d0] sm:$0xff]  ;;  %v1282_v11 = vld [vmem:[%s11797_s10 + $0x418] sm:$0xff] }
 0x3ff   : > { %v9747_v33 = vcombine.low %v1241_v17, %v1245_v9 }
 0x401   : > { %8058 = vmatpush1.bf16.msra.mxu0 %v9691_v21  ;;  %8386 = vmatpush1.bf16.msra.mxu1 %v9693_v22  ;;  %v9741_v21 = vcombine.low %v1234_v12, %v1238_v55  ;;  %v9748_v22 = vcombine.high %v1241_v17, %v1245_v9  ;;  %v1286_v12 = vld [vmem:[%s11797_s10 + $0x438] sm:$0xff]  ;;  %v1293_v17 = vld [vmem:[%s11797_s10 + $0x470] sm:$0xff] }
 0x402   : > { %8059 = vmatprep.subr.bf16.mxu0 %v9700_v23  ;;  %8387 = vmatprep.subr.bf16.mxu1 %v9702_v27  ;;  %v9750_v23 = vcombine.high %v1242_v10, %v1246_v18  ;;  %v1249_v27 = vld [vmem:[%s11797_s10 + $0x310] sm:$0xff]  ;;  %v1290_v9 = vld [vmem:[%s11797_s10 + $0x458] sm:$0xff] }
 0x403   : > { %v9755_v41 = vcombine.low %v1249_v27, %v1253_v28 }
 0x405   : > { %8060 = vmatpush1.bf16.msra.mxu0 %v9699_v35  ;;  %8388 = vmatpush1.bf16.msra.mxu1 %v9701_v37  ;;  %v9749_v35 = vcombine.low %v1242_v10, %v1246_v18  ;;  %v9756_v37 = vcombine.high %v1249_v27, %v1253_v28  ;;  %v1294_v10 = vld [vmem:[%s11797_s10 + $0x478] sm:$0xff]  ;;  %v1301_v27 = vld [vmem:[%s11797_s10 + $0x4b0] sm:$0xff] }
 0x406   : > { %8061 = vmatprep.subr.bf16.mxu0 %v9708_v19  ;;  %8389 = vmatprep.subr.bf16.mxu1 %v9710_v24  ;;  %v9758_v19 = vcombine.high %v1250_v31, %v1254_v32  ;;  %v1257_v24 = vld [vmem:[%s11797_s10 + $0x350] sm:$0xff]  ;;  %v1298_v28 = vld [vmem:[%s11797_s10 + $0x498] sm:$0xff] }
 0x407   : > { %v9763_v34 = vcombine.low %v1257_v24, %v1261_v25 }
 0x409   : > { %8062 = vmatpush1.bf16.msra.mxu0 %v9707_v42  ;;  %8390 = vmatpush1.bf16.msra.mxu1 %v9709_v43  ;;  %v9757_v42 = vcombine.low %v1250_v31, %v1254_v32  ;;  %v9764_v43 = vcombine.high %v1257_v24, %v1261_v25  ;;  %v1302_v31 = vld [vmem:[%s11797_s10 + $0x4b8] sm:$0xff]  ;;  %v1309_v24 = vld [vmem:[%s11797_s10 + $0x4f0] sm:$0xff] }
 0x40a   : > { %8063 = vmatprep.subr.bf16.mxu0 %v9716_v44  ;;  %8391 = vmatprep.subr.bf16.mxu1 %v9718_v45  ;;  %v9766_v44 = vcombine.high %v1258_v39, %v1262_v30  ;;  %v1265_v45 = vld [vmem:[%s11797_s10 + $0x390] sm:$0xff]  ;;  %v1306_v25 = vld [vmem:[%s11797_s10 + $0x4d8] sm:$0xff] }
 0x40b   : > { %v9771_v61 = vcombine.low %v1265_v45, %v1269_v46 }
 0x40d   : > { %8064 = vmatpush1.bf16.msra.mxu0 %v9715_v49  ;;  %8392 = vmatpush1.bf16.msra.mxu1 %v9717_v50  ;;  %v9765_v49 = vcombine.low %v1258_v39, %v1262_v30  ;;  %v9772_v50 = vcombine.high %v1265_v45, %v1269_v46  ;;  %v1310_v39 = vld [vmem:[%s11797_s10 + $0x4f8] sm:$0xff]  ;;  %v9805_v30 = vcombine.low %v1298_v28, %v1302_v31 }
 0x40e   : > { %8065 = vmatprep.subr.bf16.mxu0 %v9724_v51  ;;  %8393 = vmatprep.subr.bf16.mxu1 %v9726_v53  ;;  %v9774_v51 = vcombine.high %v1266_v47, %v1270_v48  ;;  %v1273_v53 = vld [vmem:[%s11797_s10 + $0x3d0] sm:$0xff]  ;;  %v1314_v45 = vld [vmem:[%s11797_s10 + $0x518] sm:$0xff] }
 0x40f   : > { %v9779_v55 = vcombine.low %v1273_v53, %v1277_v54  ;;  %v1318_v46 = vld [vmem:[%s11797_s10 + $0x538] sm:$0xff] }
 0x411   : > { %8066 = vmatpush1.bf16.msra.mxu0 %v9723_v62  ;;  %8394 = vmatpush1.bf16.msra.mxu1 %v9725_v2  ;;  %v9773_v62 = vcombine.low %v1266_v47, %v1270_v48  ;;  %v9780_v2 = vcombine.high %v1273_v53, %v1277_v54  ;;  %v1326_v53 = vld [vmem:[%s11797_s10 + $0x578] sm:$0xff] }
 0x412   : > { %8067 = vmatprep.subr.bf16.mxu0 %v9732_v3  ;;  %8395 = vmatprep.subr.bf16.mxu1 %v9734_v4  ;;  %v9782_v3 = vcombine.high %v1274_v57, %v1278_v58  ;;  %v1281_v4 = vld [vmem:[%s11797_s10 + $0x410] sm:$0xff] }
 0x413   : > { %v9787_v18 = vcombine.low %v1281_v4, %v1285_v7 }
 0x415   : > { %8068 = vmatpush1.bf16.msra.mxu0 %v9731_v14  ;;  %8396 = vmatpush1.bf16.msra.mxu1 %v9733_v15  ;;  %v9781_v14 = vcombine.low %v1274_v57, %v1278_v58  ;;  %v9788_v15 = vcombine.high %v1281_v4, %v1285_v7  ;;  %v9821_v57 = vcombine.low %v1314_v45, %v1318_v46  ;;  %v1334_v4 = vld [vmem:[%s11797_s10 + $0x5b8] sm:$0xff] }
 0x416   : > { %8069 = vmatprep.subr.bf16.mxu0 %v9740_v5  ;;  %8397 = vmatprep.subr.bf16.mxu1 %v9742_v16  ;;  %v9790_v5 = vcombine.high %v1282_v11, %v1286_v12  ;;  %v1289_v16 = vld [vmem:[%s11797_s10 + $0x450] sm:$0xff] }
 0x417   : > { %v9795_v32 = vcombine.low %v1289_v16, %v1293_v17 }
 0x419   : > { %8070 = vmatpush1.bf16.msra.mxu0 %v9739_v20  ;;  %8398 = vmatpush1.bf16.msra.mxu1 %v9741_v21  ;;  %v9789_v20 = vcombine.low %v1282_v11, %v1286_v12  ;;  %v9796_v21 = vcombine.high %v1289_v16, %v1293_v17  ;;  %v1342_v16 = vld [vmem:[%s11797_s10 + $0x5f8] sm:$0xff] }
 0x41a   : > { %8071 = vmatprep.subr.bf16.mxu0 %v9748_v22  ;;  %8399 = vmatprep.subr.bf16.mxu1 %v9750_v23  ;;  %v9798_v22 = vcombine.high %v1290_v9, %v1294_v10  ;;  %v1297_v23 = vld [vmem:[%s11797_s10 + $0x490] sm:$0xff] }
 0x41d   : > { %8072 = vmatpush1.bf16.msra.mxu0 %v9747_v33  ;;  %8400 = vmatpush1.bf16.msra.mxu1 %v9749_v35  ;;  %v9797_v33 = vcombine.low %v1290_v9, %v1294_v10  ;;  %v9804_v35 = vcombine.high %v1297_v23, %v1301_v27 }
 0x41e   : > { %8073 = vmatprep.subr.bf16.mxu0 %v9756_v37  ;;  %8401 = vmatprep.subr.bf16.mxu1 %v9758_v19  ;;  %v9806_v37 = vcombine.high %v1298_v28, %v1302_v31  ;;  %v1305_v19 = vld [vmem:[%s11797_s10 + $0x4d0] sm:$0xff] }
 0x41f   : > { %v9811_v47 = vcombine.low %v1305_v19, %v1309_v24 }
 0x421   : > { %8074 = vmatpush1.bf16.msra.mxu0 %v9755_v41  ;;  %8402 = vmatpush1.bf16.msra.mxu1 %v9757_v42  ;;  %v9812_v41 = vcombine.high %v1305_v19, %v1309_v24  ;;  %v9814_v42 = vcombine.high %v1306_v25, %v1310_v39  ;;  %v1358_v19 = vld [vmem:[%s11797_s10 + $0x678] sm:$0xff] }
 0x422   : > { %8075 = vmatprep.subr.bf16.mxu0 %v9764_v43  ;;  %8403 = vmatprep.subr.bf16.mxu1 %v9766_v44  ;;  %v1313_v43 = vld [vmem:[%s11797_s10 + $0x510] sm:$0xff] }
 0x423   : > { %v1317_v44 = vld [vmem:[%s11797_s10 + $0x530] sm:$0xff] }
 0x424   : > { %v9820_v48 = vcombine.high %v1313_v43, %v1317_v44  ;;  %v9819_v54 = vcombine.low %v1313_v43, %v1317_v44  ;;  %v1366_v43 = vld [vmem:[%s11797_s10 + $0x6b8] sm:$0xff] }
 0x425   : > { %8076 = vmatpush1.bf16.msra.mxu0 %v9763_v34  ;;  %8404 = vmatpush1.bf16.msra.mxu1 %v9765_v49  ;;  %v9822_v34 = vcombine.high %v1314_v45, %v1318_v46  ;;  %v1321_v49 = vld [vmem:[%s11797_s10 + $0x550] sm:$0xff] }
 0x426   : > { %8077 = vmatprep.subr.bf16.mxu0 %v9772_v50  ;;  %8405 = vmatprep.subr.bf16.mxu1 %v9774_v51  ;;  %v1325_v50 = vld [vmem:[%s11797_s10 + $0x570] sm:$0xff]  ;;  %v1322_v51 = vld [vmem:[%s11797_s10 + $0x558] sm:$0xff] }
 0x427   : > { %v9828_v58 = vcombine.high %v1321_v49, %v1325_v50  ;;  %v9827_v7 = vcombine.low %v1321_v49, %v1325_v50  ;;  %v9829_v11 = vcombine.low %v1322_v51, %v1326_v53  ;;  %v1374_v49 = vld [vmem:[%s11797_s10 + $0x6f8] sm:$0xff] }
 0x429   : > { %8078 = vmatpush1.bf16.msra.mxu0 %v9771_v61  ;;  %8406 = vmatpush1.bf16.msra.mxu1 %v9773_v62  ;;  %v9830_v61 = vcombine.high %v1322_v51, %v1326_v53  ;;  %v1329_v62 = vld [vmem:[%s11797_s10 + $0x590] sm:$0xff] }
 0x42a   : > { %8079 = vmatprep.subr.bf16.mxu0 %v9780_v2  ;;  %8407 = vmatprep.subr.bf16.mxu1 %v9782_v3  ;;  %v1333_v2 = vld [vmem:[%s11797_s10 + $0x5b0] sm:$0xff]  ;;  %v1330_v3 = vld [vmem:[%s11797_s10 + $0x598] sm:$0xff] }
 0x42b   : > { %v9836_v12 = vcombine.high %v1329_v62, %v1333_v2  ;;  %v9835_v17 = vcombine.low %v1329_v62, %v1333_v2  ;;  %v9837_v9 = vcombine.low %v1330_v3, %v1334_v4  ;;  %v1382_v62 = vld [vmem:[%s11797_s10 + $0x738] sm:$0xff] }
 0x42d   : > { %8080 = vmatpush1.bf16.msra.mxu0 %v9779_v55  ;;  %8408 = vmatpush1.bf16.msra.mxu1 %v9781_v14  ;;  %v9838_v55 = vcombine.high %v1330_v3, %v1334_v4  ;;  %v1337_v14 = vld [vmem:[%s11797_s10 + $0x5d0] sm:$0xff] }
 0x42e   : > { %8090 = vmatprep.subr.bf16.mxu0 %v9788_v15  ;;  %8418 = vmatprep.subr.bf16.mxu1 %v9790_v5  ;;  %v1341_v15 = vld [vmem:[%s11797_s10 + $0x5f0] sm:$0xff]  ;;  %v1338_v5 = vld [vmem:[%s11797_s10 + $0x5d8] sm:$0xff] }
 0x42f   : > { %v9844_v10 = vcombine.high %v1337_v14, %v1341_v15  ;;  %v9845_v28 = vcombine.low %v1338_v5, %v1342_v16 }
 0x430   : > { %8082 = vmatmul.mubr.bf16.vlgmr.msra.gmra.mrb[4].mxu0 %v11936_v52  ;;  %8410 = vmatmul.mubr.bf16.vlgmr.msra.gmra.mrb[4].mxu1 %v11936_v52  ;;  %v9803_v52 = vcombine.low %v1297_v23, %v1301_v27  ;;  %v1350_v23 = vld [vmem:[%s11797_s10 + $0x638] sm:$0xff]  ;;  %v9843_v27 = vcombine.low %v1337_v14, %v1341_v15 }
 0x431   : > { %8091 = vmatpush1.bf16.msra.mxu0 %v9787_v18  ;;  %8419 = vmatpush1.bf16.msra.mxu1 %v9789_v20  ;;  %v9846_v18 = vcombine.high %v1338_v5, %v1342_v16  ;;  %v1345_v20 = vld [vmem:[%s11797_s10 + $0x610] sm:$0xff]  ;;  %v1390_v14 = vld [vmem:[%s11797_s10 + $0x778] sm:$0xff] }
 0x432   : > { %8092 = vmatprep.subr.bf16.mxu0 %v9796_v21  ;;  %8420 = vmatprep.subr.bf16.mxu1 %v9798_v22  ;;  %v1349_v21 = vld [vmem:[%s11797_s10 + $0x630] sm:$0xff]  ;;  %v1346_v22 = vld [vmem:[%s11797_s10 + $0x618] sm:$0xff] }
 0x433   : > { %8122 = vmatprep.mubr.bf16.mxu0 %v11948_v63  ;;  %8450 = vmatprep.mubr.bf16.mxu1 %v11948_v63  ;;  %v9813_v63 = vcombine.low %v1306_v25, %v1310_v39  ;;  %v9852_v31 = vcombine.high %v1345_v20, %v1349_v21  ;;  %v9851_v24 = vcombine.low %v1345_v20, %v1349_v21  ;;  %v1398_v20 = vld [vmem:[%s11797_s10 + $0x7b8] sm:$0xff] }
 0x434   : > { %v9853_v25 = vcombine.low %v1346_v22, %v1350_v23 }
 0x435   : > { %8093 = vmatpush1.bf16.msra.mxu0 %v9795_v32  ;;  %8421 = vmatpush1.bf16.msra.mxu1 %v9797_v33  ;;  %v9854_v32 = vcombine.high %v1346_v22, %v1350_v23  ;;  %v1353_v33 = vld [vmem:[%s11797_s10 + $0x650] sm:$0xff] }
 0x436   : > { %8094 = vmatprep.subr.bf16.mxu0 %v9804_v35  ;;  %8422 = vmatprep.subr.bf16.mxu1 %v9806_v37  ;;  %v1357_v35 = vld [vmem:[%s11797_s10 + $0x670] sm:$0xff]  ;;  %v1354_v37 = vld [vmem:[%s11797_s10 + $0x658] sm:$0xff] }
 0x437   : > { %v9860_v39 = vcombine.high %v1353_v33, %v1357_v35  ;;  %v9859_v44 = vcombine.low %v1353_v33, %v1357_v35  ;;  %v9861_v45 = vcombine.low %v1354_v37, %v1358_v19  ;;  %v1406_v33 = vld [vmem:[%s11797_s10 + $0x7f8] sm:$0xff] }
 0x439   : > { %8095 = vmatpush1.bf16.msra.mxu0 %v9803_v52  ;;  %8423 = vmatpush1.bf16.msra.mxu1 %v9805_v30  ;;  %v9862_v52 = vcombine.high %v1354_v37, %v1358_v19  ;;  %v1361_v30 = vld [vmem:[%s11797_s10 + $0x690] sm:$0xff] }
 0x43a   : > { %8096 = vmatprep.subr.bf16.mxu0 %v9812_v41  ;;  %8424 = vmatprep.subr.bf16.mxu1 %v9814_v42  ;;  %v1365_v41 = vld [vmem:[%s11797_s10 + $0x6b0] sm:$0xff]  ;;  %v1362_v42 = vld [vmem:[%s11797_s10 + $0x698] sm:$0xff] }
 0x43b   : > { %v9868_v46 = vcombine.high %v1361_v30, %v1365_v41  ;;  %v9867_v50 = vcombine.low %v1361_v30, %v1365_v41  ;;  %v9869_v51 = vcombine.low %v1362_v42, %v1366_v43  ;;  %v1414_v30 = vld [vmem:[%s11797_s10 + $0x838] sm:$0xff] }
 0x43d   : > { %8097 = vmatpush1.bf16.msra.mxu0 %v9811_v47  ;;  %8425 = vmatpush1.bf16.msra.mxu1 %v9813_v63  ;;  %v9870_v47 = vcombine.high %v1362_v42, %v1366_v43  ;;  %v1369_v63 = vld [vmem:[%s11797_s10 + $0x6d0] sm:$0xff] }
 0x43e   : > { %8098 = vmatprep.subr.bf16.mxu0 %v9820_v48  ;;  %8426 = vmatprep.subr.bf16.mxu1 %v9822_v34  ;;  %v1373_v48 = vld [vmem:[%s11797_s10 + $0x6f0] sm:$0xff]  ;;  %v1370_v34 = vld [vmem:[%s11797_s10 + $0x6d8] sm:$0xff] }
 0x43f   : > { %v9876_v53 = vcombine.high %v1369_v63, %v1373_v48  ;;  %v9875_v2 = vcombine.low %v1369_v63, %v1373_v48  ;;  %v9877_v3 = vcombine.low %v1370_v34, %v1374_v49  ;;  %v1422_v63 = vld [vmem:[%s11797_s10 + $0x878] sm:$0xff] }
 0x441   : > { %8099 = vmatpush1.bf16.msra.mxu0 %v9819_v54  ;;  %8427 = vmatpush1.bf16.msra.mxu1 %v9821_v57  ;;  %v9878_v54 = vcombine.high %v1370_v34, %v1374_v49  ;;  %v1377_v57 = vld [vmem:[%s11797_s10 + $0x710] sm:$0xff] }
 0x442   : > { %8100 = vmatprep.subr.bf16.mxu0 %v9828_v58  ;;  %8428 = vmatprep.subr.bf16.mxu1 %v9830_v61  ;;  %v1381_v58 = vld [vmem:[%s11797_s10 + $0x730] sm:$0xff]  ;;  %v1378_v61 = vld [vmem:[%s11797_s10 + $0x718] sm:$0xff] }
 0x443   : > { %v9884_v4 = vcombine.high %v1377_v57, %v1381_v58  ;;  %v9883_v15 = vcombine.low %v1377_v57, %v1381_v58  ;;  %v9885_v5 = vcombine.low %v1378_v61, %v1382_v62  ;;  %v1430_v57 = vld [vmem:[%s11797_s10 + $0x8b8] sm:$0xff] }
 0x445   : > { %8101 = vmatpush1.bf16.msra.mxu0 %v9827_v7  ;;  %8429 = vmatpush1.bf16.msra.mxu1 %v9829_v11  ;;  %v9886_v7 = vcombine.high %v1378_v61, %v1382_v62  ;;  %v1385_v11 = vld [vmem:[%s11797_s10 + $0x750] sm:$0xff] }
 0x446   : > { %8102 = vmatprep.subr.bf16.mxu0 %v9836_v12  ;;  %8430 = vmatprep.subr.bf16.mxu1 %v9838_v55  ;;  %v1389_v12 = vld [vmem:[%s11797_s10 + $0x770] sm:$0xff]  ;;  %v1386_v55 = vld [vmem:[%s11797_s10 + $0x758] sm:$0xff] }
 0x447   : > { %v9892_v16 = vcombine.high %v1385_v11, %v1389_v12  ;;  %v9891_v21 = vcombine.low %v1385_v11, %v1389_v12  ;;  %v9893_v22 = vcombine.low %v1386_v55, %v1390_v14  ;;  %v1438_v11 = vld [vmem:[%s11797_s10 + $0x8f8] sm:$0xff] }
 0x449   : > { %8103 = vmatpush1.bf16.msra.mxu0 %v9835_v17  ;;  %8431 = vmatpush1.bf16.msra.mxu1 %v9837_v9  ;;  %v9894_v17 = vcombine.high %v1386_v55, %v1390_v14  ;;  %v1393_v9 = vld [vmem:[%s11797_s10 + $0x790] sm:$0xff] }
 0x44a   : > { %8104 = vmatprep.subr.bf16.mxu0 %v9844_v10  ;;  %8432 = vmatprep.subr.bf16.mxu1 %v9846_v18  ;;  %v1397_v10 = vld [vmem:[%s11797_s10 + $0x7b0] sm:$0xff]  ;;  %v1394_v18 = vld [vmem:[%s11797_s10 + $0x798] sm:$0xff] }
 0x44b   : > { %v9900_v23 = vcombine.high %v1393_v9, %v1397_v10  ;;  %v9899_v35 = vcombine.low %v1393_v9, %v1397_v10  ;;  %v9901_v37 = vcombine.low %v1394_v18, %v1398_v20 }
 0x44d   : > { %8105 = vmatpush1.bf16.msra.mxu0 %v9843_v27  ;;  %8433 = vmatpush1.bf16.msra.mxu1 %v9845_v28  ;;  %v9902_v27 = vcombine.high %v1394_v18, %v1398_v20  ;;  %v1401_v28 = vld [vmem:[%s11797_s10 + $0x7d0] sm:$0xff] }
 0x44e   : > { %8106 = vmatprep.subr.bf16.mxu0 %v9852_v31  ;;  %8434 = vmatprep.subr.bf16.mxu1 %v9854_v32  ;;  %v1405_v31 = vld [vmem:[%s11797_s10 + $0x7f0] sm:$0xff]  ;;  %v1402_v32 = vld [vmem:[%s11797_s10 + $0x7d8] sm:$0xff] }
 0x44f   : > { %v9908_v19 = vcombine.high %v1401_v28, %v1405_v31  ;;  %v9907_v41 = vcombine.low %v1401_v28, %v1405_v31  ;;  %v9909_v42 = vcombine.low %v1402_v32, %v1406_v33  ;;  %v1449_v20 = vld [vmem:[%s11797_s10 + $0x950] sm:$0xff] }
 0x451   : > { %8107 = vmatpush1.bf16.msra.mxu0 %v9851_v24  ;;  %8435 = vmatpush1.bf16.msra.mxu1 %v9853_v25  ;;  %v9910_v24 = vcombine.high %v1402_v32, %v1406_v33  ;;  %v1409_v25 = vld [vmem:[%s11797_s10 + $0x810] sm:$0xff] }
 0x452   : > { %8108 = vmatprep.subr.bf16.mxu0 %v9860_v39  ;;  %8436 = vmatprep.subr.bf16.mxu1 %v9862_v52  ;;  %v1413_v39 = vld [vmem:[%s11797_s10 + $0x830] sm:$0xff]  ;;  %v1410_v52 = vld [vmem:[%s11797_s10 + $0x818] sm:$0xff] }
 0x453   : > { %v9916_v43 = vcombine.high %v1409_v25, %v1413_v39  ;;  %v9915_v48 = vcombine.low %v1409_v25, %v1413_v39  ;;  %v9917_v34 = vcombine.low %v1410_v52, %v1414_v30  ;;  %v1457_v33 = vld [vmem:[%s11797_s10 + $0x990] sm:$0xff] }
 0x455   : > { %8109 = vmatpush1.bf16.msra.mxu0 %v9859_v44  ;;  %8437 = vmatpush1.bf16.msra.mxu1 %v9861_v45  ;;  %v9918_v44 = vcombine.high %v1410_v52, %v1414_v30  ;;  %v1417_v45 = vld [vmem:[%s11797_s10 + $0x850] sm:$0xff] }
 0x456   : > { %8110 = vmatprep.subr.bf16.mxu0 %v9868_v46  ;;  %8438 = vmatprep.subr.bf16.mxu1 %v9870_v47  ;;  %v1421_v46 = vld [vmem:[%s11797_s10 + $0x870] sm:$0xff]  ;;  %v1418_v47 = vld [vmem:[%s11797_s10 + $0x858] sm:$0xff] }
 0x457   : > { %v9924_v49 = vcombine.high %v1417_v45, %v1421_v46  ;;  %v9923_v58 = vcombine.low %v1417_v45, %v1421_v46  ;;  %v9925_v61 = vcombine.low %v1418_v47, %v1422_v63  ;;  %v1465_v30 = vld [vmem:[%s11797_s10 + $0x9d0] sm:$0xff] }
 0x459   : > { %8111 = vmatpush1.bf16.msra.mxu0 %v9867_v50  ;;  %8439 = vmatpush1.bf16.msra.mxu1 %v9869_v51  ;;  %v9926_v50 = vcombine.high %v1418_v47, %v1422_v63  ;;  %v1425_v51 = vld [vmem:[%s11797_s10 + $0x890] sm:$0xff] }
 0x45a   : > { %8112 = vmatprep.subr.bf16.mxu0 %v9876_v53  ;;  %8440 = vmatprep.subr.bf16.mxu1 %v9878_v54  ;;  %v1429_v53 = vld [vmem:[%s11797_s10 + $0x8b0] sm:$0xff]  ;;  %v1426_v54 = vld [vmem:[%s11797_s10 + $0x898] sm:$0xff] }
 0x45b   : > { %v9932_v62 = vcombine.high %v1425_v51, %v1429_v53  ;;  %v9933_v12 = vcombine.low %v1426_v54, %v1430_v57  ;;  %v1473_v63 = vld [vmem:[%s11797_s10 + $0xa10] sm:$0xff] }
 0x45d   : > { %8113 = vmatpush1.bf16.msra.mxu0 %v9875_v2  ;;  %8441 = vmatpush1.bf16.msra.mxu1 %v9877_v3  ;;  %v9934_v2 = vcombine.high %v1426_v54, %v1430_v57  ;;  %v1433_v3 = vld [vmem:[%s11797_s10 + $0x8d0] sm:$0xff] }
 0x45e   : > { %8114 = vmatprep.subr.bf16.mxu0 %v9884_v4  ;;  %8442 = vmatprep.subr.bf16.mxu1 %v9886_v7  ;;  %v1437_v4 = vld [vmem:[%s11797_s10 + $0x8f0] sm:$0xff]  ;;  %v1434_v7 = vld [vmem:[%s11797_s10 + $0x8d8] sm:$0xff] }
 0x45f   : > { %v9940_v55 = vcombine.high %v1433_v3, %v1437_v4  ;;  %v9942_v14 = vcombine.high %v1434_v7, %v1438_v11  ;;  %v9939_v9 = vcombine.low %v1433_v3, %v1437_v4  ;;  %v1481_v57 = vld [vmem:[%s11797_s10 + $0xa50] sm:$0xff] }
 0x461   : > { %8115 = vmatpush1.bf16.msra.mxu0 %v9883_v15  ;;  %8443 = vmatpush1.bf16.msra.mxu1 %v9885_v5  ;;  %v1441_v15 = vld [vmem:[%s11797_s10 + $0x910] sm:$0xff] }
 0x462   : > { %8116 = vmatprep.subr.bf16.mxu0 %v9892_v16  ;;  %8444 = vmatprep.subr.bf16.mxu1 %v9894_v17  ;;  %v1445_v5 = vld [vmem:[%s11797_s10 + $0x930] sm:$0xff]  ;;  %v1442_v16 = vld [vmem:[%s11797_s10 + $0x918] sm:$0xff] }
 0x463   : > { %v1446_v17 = vld [vmem:[%s11797_s10 + $0x938] sm:$0xff]  ;;  %v9948_v10 = vcombine.high %v1441_v15, %v1445_v5 }
 0x464   : > { %v9950_v18 = vcombine.high %v1442_v16, %v1446_v17  ;;  %v9949_v28 = vcombine.low %v1442_v16, %v1446_v17  ;;  %v1497_v17 = vld [vmem:[%s11797_s10 + $0xad0] sm:$0xff] }
 0x465   : > { %8117 = vmatpush1.bf16.msra.mxu0 %v9891_v21  ;;  %8445 = vmatpush1.bf16.msra.mxu1 %v9893_v22  ;;  %v1453_v21 = vld [vmem:[%s11797_s10 + $0x970] sm:$0xff]  ;;  %v1450_v22 = vld [vmem:[%s11797_s10 + $0x958] sm:$0xff] }
 0x466   : > { %8118 = vmatprep.subr.bf16.mxu0 %v9900_v23  ;;  %8446 = vmatprep.subr.bf16.mxu1 %v9902_v27  ;;  %v1454_v23 = vld [vmem:[%s11797_s10 + $0x978] sm:$0xff]  ;;  %v9947_v27 = vcombine.low %v1441_v15, %v1445_v5  ;;  %v9956_v31 = vcombine.high %v1449_v20, %v1453_v21 }
 0x467   : > { %v9958_v32 = vcombine.high %v1450_v22, %v1454_v23  ;;  %v9957_v25 = vcombine.low %v1450_v22, %v1454_v23  ;;  %v1505_v23 = vld [vmem:[%s11797_s10 + $0xb10] sm:$0xff] }
 0x469   : > { %8119 = vmatpush1.bf16.msra.mxu0 %v9899_v35  ;;  %8447 = vmatpush1.bf16.msra.mxu1 %v9901_v37  ;;  %v1461_v35 = vld [vmem:[%s11797_s10 + $0x9b0] sm:$0xff]  ;;  %v1458_v37 = vld [vmem:[%s11797_s10 + $0x998] sm:$0xff] }
 0x46a   : > { %8120 = vmatprep.subr.bf16.mxu0 %v9908_v19  ;;  %8448 = vmatprep.subr.bf16.mxu1 %v9910_v24  ;;  %v1462_v19 = vld [vmem:[%s11797_s10 + $0x9b8] sm:$0xff]  ;;  %v9955_v24 = vcombine.low %v1449_v20, %v1453_v21  ;;  %v9964_v39 = vcombine.high %v1457_v33, %v1461_v35 }
 0x46b   : > { %v9966_v52 = vcombine.high %v1458_v37, %v1462_v19  ;;  %v9965_v45 = vcombine.low %v1458_v37, %v1462_v19  ;;  %v1513_v19 = vld [vmem:[%s11797_s10 + $0xb50] sm:$0xff] }
 0x46d   : > { %8121 = vmatpush1.bf16.msra.mxu0 %v9907_v41  ;;  %8449 = vmatpush1.bf16.msra.mxu1 %v9909_v42  ;;  %v1469_v41 = vld [vmem:[%s11797_s10 + $0x9f0] sm:$0xff]  ;;  %v1466_v42 = vld [vmem:[%s11797_s10 + $0x9d8] sm:$0xff] }
 0x46e   : > { %8131 = vmatprep.subr.bf16.mxu0 %v9916_v43  ;;  %8459 = vmatprep.subr.bf16.mxu1 %v9918_v44  ;;  %v1470_v43 = vld [vmem:[%s11797_s10 + $0x9f8] sm:$0xff]  ;;  %v9963_v44 = vcombine.low %v1457_v33, %v1461_v35  ;;  %v9972_v46 = vcombine.high %v1465_v30, %v1469_v41 }
 0x46f   : > { %v9974_v47 = vcombine.high %v1466_v42, %v1470_v43 }
 0x470   : > { %8123 = vmatmul.mubr.bf16.vlgmr.msra.gmra.mrb[4].mxu0 %v12018_v1  ;;  %8451 = vmatmul.mubr.bf16.vlgmr.msra.gmra.mrb[4].mxu1 %v12018_v1  ;;  %v9931_v1 = vcombine.low %v1425_v51, %v1429_v53  ;;  %v9973_v51 = vcombine.low %v1466_v42, %v1470_v43  ;;  %v1521_v43 = vld [vmem:[%s11797_s10 + $0xb90] sm:$0xff] }
 0x471   : > { %8132 = vmatpush1.bf16.msra.mxu0 %v9915_v48  ;;  %8460 = vmatpush1.bf16.msra.mxu1 %v9917_v34  ;;  %v1477_v48 = vld [vmem:[%s11797_s10 + $0xa30] sm:$0xff]  ;;  %v1474_v34 = vld [vmem:[%s11797_s10 + $0xa18] sm:$0xff] }
 0x472   : > { %8133 = vmatprep.subr.bf16.mxu0 %v9924_v49  ;;  %8461 = vmatprep.subr.bf16.mxu1 %v9926_v50  ;;  %v1478_v49 = vld [vmem:[%s11797_s10 + $0xa38] sm:$0xff]  ;;  %v9971_v50 = vcombine.low %v1465_v30, %v1469_v41  ;;  %v9980_v53 = vcombine.high %v1473_v63, %v1477_v48 }
 0x473   : > { %8163 = vmatprep.mubr.bf16.mxu0 %v12024_v13  ;;  %8491 = vmatprep.mubr.bf16.mxu1 %v12024_v13  ;;  %v9941_v13 = vcombine.low %v1434_v7, %v1438_v11  ;;  %v9982_v54 = vcombine.high %v1474_v34, %v1478_v49  ;;  %v9981_v3 = vcombine.low %v1474_v34, %v1478_v49  ;;  %v1489_v11 = vld [vmem:[%s11797_s10 + $0xa90] sm:$0xff] }
 0x474   : > { %v1529_v49 = vld [vmem:[%s11797_s10 + $0xbd0] sm:$0xff] }
 0x475   : > { %8134 = vmatpush1.bf16.msra.mxu0 %v9923_v58  ;;  %8462 = vmatpush1.bf16.msra.mxu1 %v9925_v61  ;;  %v1485_v58 = vld [vmem:[%s11797_s10 + $0xa70] sm:$0xff]  ;;  %v1482_v61 = vld [vmem:[%s11797_s10 + $0xa58] sm:$0xff] }
 0x476   : > { %8135 = vmatprep.subr.bf16.mxu0 %v9932_v62  ;;  %8463 = vmatprep.subr.bf16.mxu1 %v9934_v2  ;;  %v1486_v62 = vld [vmem:[%s11797_s10 + $0xa78] sm:$0xff]  ;;  %v9979_v2 = vcombine.low %v1473_v63, %v1477_v48  ;;  %v9988_v4 = vcombine.high %v1481_v57, %v1485_v58 }
 0x477   : > { %v9990_v7 = vcombine.high %v1482_v61, %v1486_v62  ;;  %v9989_v15 = vcombine.low %v1482_v61, %v1486_v62  ;;  %v1537_v62 = vld [vmem:[%s11797_s10 + $0xc10] sm:$0xff] }
 0x479   : > { %8136 = vmatpush1.bf16.msra.mxu0 %v9931_v1  ;;  %8464 = vmatpush1.bf16.msra.mxu1 %v9933_v12  ;;  %v1493_v1 = vld [vmem:[%s11797_s10 + $0xab0] sm:$0xff]  ;;  %v1490_v12 = vld [vmem:[%s11797_s10 + $0xa98] sm:$0xff] }
 0x47a   : > { %8137 = vmatprep.subr.bf16.mxu0 %v9940_v55  ;;  %8465 = vmatprep.subr.bf16.mxu1 %v9942_v14  ;;  %v1494_v55 = vld [vmem:[%s11797_s10 + $0xab8] sm:$0xff]  ;;  %v9987_v14 = vcombine.low %v1481_v57, %v1485_v58  ;;  %v9996_v5 = vcombine.high %v1489_v11, %v1493_v1 }
 0x47b   : > { %v9998_v16 = vcombine.high %v1490_v12, %v1494_v55  ;;  %v9997_v20 = vcombine.low %v1490_v12, %v1494_v55  ;;  %v1545_v55 = vld [vmem:[%s11797_s10 + $0xc50] sm:$0xff] }
 0x47d   : > { %8138 = vmatpush1.bf16.msra.mxu0 %v9939_v9  ;;  %8466 = vmatpush1.bf16.msra.mxu1 %v9941_v13  ;;  %v1501_v9 = vld [vmem:[%s11797_s10 + $0xaf0] sm:$0xff]  ;;  %v1498_v13 = vld [vmem:[%s11797_s10 + $0xad8] sm:$0xff] }
 0x47e   : > { %8139 = vmatprep.subr.bf16.mxu0 %v9948_v10  ;;  %8467 = vmatprep.subr.bf16.mxu1 %v9950_v18  ;;  %v1502_v10 = vld [vmem:[%s11797_s10 + $0xaf8] sm:$0xff]  ;;  %v9995_v18 = vcombine.low %v1489_v11, %v1493_v1  ;;  %v10004_v21 = vcombine.high %v1497_v17, %v1501_v9 }
 0x47f   : > { %v10006_v22 = vcombine.high %v1498_v13, %v1502_v10  ;;  %v10005_v33 = vcombine.low %v1498_v13, %v1502_v10  ;;  %v1553_v10 = vld [vmem:[%s11797_s10 + $0xc90] sm:$0xff] }
 0x481   : > { %8140 = vmatpush1.bf16.msra.mxu0 %v9947_v27  ;;  %8468 = vmatpush1.bf16.msra.mxu1 %v9949_v28  ;;  %v1509_v27 = vld [vmem:[%s11797_s10 + $0xb30] sm:$0xff]  ;;  %v1506_v28 = vld [vmem:[%s11797_s10 + $0xb18] sm:$0xff] }
 0x482   : > { %8141 = vmatprep.subr.bf16.mxu0 %v9956_v31  ;;  %8469 = vmatprep.subr.bf16.mxu1 %v9958_v32  ;;  %v1510_v31 = vld [vmem:[%s11797_s10 + $0xb38] sm:$0xff]  ;;  %v10003_v32 = vcombine.low %v1497_v17, %v1501_v9  ;;  %v10012_v35 = vcombine.high %v1505_v23, %v1509_v27 }
 0x483   : > { %v10014_v37 = vcombine.high %v1506_v28, %v1510_v31  ;;  %v10013_v30 = vcombine.low %v1506_v28, %v1510_v31  ;;  %v1561_v31 = vld [vmem:[%s11797_s10 + $0xcd0] sm:$0xff] }
 0x485   : > { %8142 = vmatpush1.bf16.msra.mxu0 %v9955_v24  ;;  %8470 = vmatpush1.bf16.msra.mxu1 %v9957_v25  ;;  %v1517_v24 = vld [vmem:[%s11797_s10 + $0xb70] sm:$0xff]  ;;  %v1514_v25 = vld [vmem:[%s11797_s10 + $0xb58] sm:$0xff] }
 0x486   : > { %8143 = vmatprep.subr.bf16.mxu0 %v9964_v39  ;;  %8471 = vmatprep.subr.bf16.mxu1 %v9966_v52  ;;  %v1518_v39 = vld [vmem:[%s11797_s10 + $0xb78] sm:$0xff]  ;;  %v10011_v52 = vcombine.low %v1505_v23, %v1509_v27  ;;  %v10020_v41 = vcombine.high %v1513_v19, %v1517_v24 }
 0x487   : > { %v10022_v42 = vcombine.high %v1514_v25, %v1518_v39  ;;  %v10021_v63 = vcombine.low %v1514_v25, %v1518_v39  ;;  %v1569_v25 = vld [vmem:[%s11797_s10 + $0xd10] sm:$0xff] }
 0x488   : > { %v1573_v39 = vld [vmem:[%s11797_s10 + $0xd30] sm:$0xff] }
 0x489   : > { %8144 = vmatpush1.bf16.msra.mxu0 %v9963_v44  ;;  %8472 = vmatpush1.bf16.msra.mxu1 %v9965_v45  ;;  %v1525_v44 = vld [vmem:[%s11797_s10 + $0xbb0] sm:$0xff]  ;;  %v1522_v45 = vld [vmem:[%s11797_s10 + $0xb98] sm:$0xff] }
 0x48a   : > { %8145 = vmatprep.subr.bf16.mxu0 %v9972_v46  ;;  %8473 = vmatprep.subr.bf16.mxu1 %v9974_v47  ;;  %v1526_v46 = vld [vmem:[%s11797_s10 + $0xbb8] sm:$0xff]  ;;  %v10019_v47 = vcombine.low %v1513_v19, %v1517_v24  ;;  %v10028_v48 = vcombine.high %v1521_v43, %v1525_v44 }
 0x48b   : > { %v10030_v34 = vcombine.high %v1522_v45, %v1526_v46  ;;  %v10029_v57 = vcombine.low %v1522_v45, %v1526_v46  ;;  %v1581_v45 = vld [vmem:[%s11797_s10 + $0xd70] sm:$0xff]  ;;  %v1578_v46 = vld [vmem:[%s11797_s10 + $0xd58] sm:$0xff] }
 0x48d   : > { %8146 = vmatpush1.bf16.msra.mxu0 %v9971_v50  ;;  %8474 = vmatpush1.bf16.msra.mxu1 %v9973_v51  ;;  %v1533_v50 = vld [vmem:[%s11797_s10 + $0xbf0] sm:$0xff]  ;;  %v1530_v51 = vld [vmem:[%s11797_s10 + $0xbd8] sm:$0xff] }
 0x48e   : > { %8147 = vmatprep.subr.bf16.mxu0 %v9980_v53  ;;  %8475 = vmatprep.subr.bf16.mxu1 %v9982_v54  ;;  %v1534_v53 = vld [vmem:[%s11797_s10 + $0xbf8] sm:$0xff]  ;;  %v10027_v54 = vcombine.low %v1521_v43, %v1525_v44  ;;  %v10036_v58 = vcombine.high %v1529_v49, %v1533_v50  ;;  %v1577_v44 = vld [vmem:[%s11797_s10 + $0xd50] sm:$0xff] }
 0x48f   : > { %v10038_v61 = vcombine.high %v1530_v51, %v1534_v53  ;;  %v10037_v11 = vcombine.low %v1530_v51, %v1534_v53  ;;  %v1589_v51 = vld [vmem:[%s11797_s10 + $0xdb0] sm:$0xff]  ;;  %v1586_v53 = vld [vmem:[%s11797_s10 + $0xd98] sm:$0xff] }
 0x491   : > { %8148 = vmatpush1.bf16.msra.mxu0 %v9979_v2  ;;  %8476 = vmatpush1.bf16.msra.mxu1 %v9981_v3  ;;  %v1541_v2 = vld [vmem:[%s11797_s10 + $0xc30] sm:$0xff]  ;;  %v1538_v3 = vld [vmem:[%s11797_s10 + $0xc18] sm:$0xff] }
 0x492   : > { %8149 = vmatprep.subr.bf16.mxu0 %v9988_v4  ;;  %8477 = vmatprep.subr.bf16.mxu1 %v9990_v7  ;;  %v1542_v4 = vld [vmem:[%s11797_s10 + $0xc38] sm:$0xff]  ;;  %v10035_v7 = vcombine.low %v1529_v49, %v1533_v50  ;;  %v10044_v1 = vcombine.high %v1537_v62, %v1541_v2  ;;  %v1585_v50 = vld [vmem:[%s11797_s10 + $0xd90] sm:$0xff] }
 0x493   : > { %v10046_v12 = vcombine.high %v1538_v3, %v1542_v4  ;;  %v10045_v17 = vcombine.low %v1538_v3, %v1542_v4  ;;  %v1593_v3 = vld [vmem:[%s11797_s10 + $0xdd0] sm:$0xff] }
 0x494   : > { %v1597_v4 = vld [vmem:[%s11797_s10 + $0xdf0] sm:$0xff] }
 0x495   : > { %8150 = vmatpush1.bf16.msra.mxu0 %v9987_v14  ;;  %8478 = vmatpush1.bf16.msra.mxu1 %v9989_v15  ;;  %v1549_v14 = vld [vmem:[%s11797_s10 + $0xc70] sm:$0xff]  ;;  %v1546_v15 = vld [vmem:[%s11797_s10 + $0xc58] sm:$0xff] }
 0x496   : > { %8151 = vmatprep.subr.bf16.mxu0 %v9996_v5  ;;  %8479 = vmatprep.subr.bf16.mxu1 %v9998_v16  ;;  %v1550_v5 = vld [vmem:[%s11797_s10 + $0xc78] sm:$0xff]  ;;  %v10043_v16 = vcombine.low %v1537_v62, %v1541_v2  ;;  %v10052_v9 = vcombine.high %v1545_v55, %v1549_v14 }
 0x497   : > { %v10054_v13 = vcombine.high %v1546_v15, %v1550_v5  ;;  %v10053_v23 = vcombine.low %v1546_v15, %v1550_v5  ;;  %v10091_v15 = vcombine.low %v1585_v50, %v1589_v51 }
 0x499   : > { %8152 = vmatpush1.bf16.msra.mxu0 %v9995_v18  ;;  %8480 = vmatpush1.bf16.msra.mxu1 %v9997_v20  ;;  %v1557_v18 = vld [vmem:[%s11797_s10 + $0xcb0] sm:$0xff]  ;;  %v1554_v20 = vld [vmem:[%s11797_s10 + $0xc98] sm:$0xff] }
 0x49a   : > { %8153 = vmatprep.subr.bf16.mxu0 %v10004_v21  ;;  %8481 = vmatprep.subr.bf16.mxu1 %v10006_v22  ;;  %v1558_v21 = vld [vmem:[%s11797_s10 + $0xcb8] sm:$0xff]  ;;  %v10051_v22 = vcombine.low %v1545_v55, %v1549_v14  ;;  %v10060_v27 = vcombine.high %v1553_v10, %v1557_v18 }
 0x49b   : > { %v10062_v28 = vcombine.high %v1554_v20, %v1558_v21 }
 0x49d   : > { %8154 = vmatpush1.bf16.msra.mxu0 %v10003_v32  ;;  %8482 = vmatpush1.bf16.msra.mxu1 %v10005_v33  ;;  %v1565_v32 = vld [vmem:[%s11797_s10 + $0xcf0] sm:$0xff]  ;;  %v1562_v33 = vld [vmem:[%s11797_s10 + $0xcd8] sm:$0xff] }
 0x49e   : > { %8155 = vmatprep.subr.bf16.mxu0 %v10012_v35  ;;  %8483 = vmatprep.subr.bf16.mxu1 %v10014_v37  ;;  %v1566_v35 = vld [vmem:[%s11797_s10 + $0xcf8] sm:$0xff]  ;;  %v10061_v37 = vcombine.low %v1554_v20, %v1558_v21  ;;  %v10068_v19 = vcombine.high %v1561_v31, %v1565_v32  ;;  %v1605_v20 = vld [vmem:[%s11797_s10 + $0xe30] sm:$0xff] }
 0x49f   : > { %v10070_v24 = vcombine.high %v1562_v33, %v1566_v35  ;;  %v1602_v21 = vld [vmem:[%s11797_s10 + $0xe18] sm:$0xff] }
 0x4a1   : > { %8156 = vmatpush1.bf16.msra.mxu0 %v10011_v52  ;;  %8484 = vmatpush1.bf16.msra.mxu1 %v10013_v30  ;;  %v1570_v52 = vld [vmem:[%s11797_s10 + $0xd18] sm:$0xff] }
 0x4a2   : > { %8157 = vmatprep.subr.bf16.mxu0 %v10020_v41  ;;  %8485 = vmatprep.subr.bf16.mxu1 %v10022_v42  ;;  %v1574_v30 = vld [vmem:[%s11797_s10 + $0xd38] sm:$0xff]  ;;  %v10067_v41 = vcombine.low %v1561_v31, %v1565_v32  ;;  %v10076_v42 = vcombine.high %v1569_v25, %v1573_v39  ;;  %v1609_v32 = vld [vmem:[%s11797_s10 + $0xe50] sm:$0xff] }
 0x4a3   : > { %v10078_v43 = vcombine.high %v1570_v52, %v1574_v30 }
 0x4a5   : > { %8158 = vmatpush1.bf16.msra.mxu0 %v10019_v47  ;;  %8486 = vmatpush1.bf16.msra.mxu1 %v10021_v63  ;;  %v1582_v47 = vld [vmem:[%s11797_s10 + $0xd78] sm:$0xff]  ;;  %v10075_v63 = vcombine.low %v1569_v25, %v1573_v39  ;;  %v1617_v39 = vld [vmem:[%s11797_s10 + $0xe90] sm:$0xff] }
 0x4a6   : > { %8159 = vmatprep.subr.bf16.mxu0 %v10028_v48  ;;  %8487 = vmatprep.subr.bf16.mxu1 %v10030_v34  ;;  %v10077_v48 = vcombine.low %v1570_v52, %v1574_v30  ;;  %v10084_v34 = vcombine.high %v1577_v44, %v1581_v45  ;;  %v10086_v49 = vcombine.high %v1578_v46, %v1582_v47  ;;  %v1621_v52 = vld [vmem:[%s11797_s10 + $0xeb0] sm:$0xff]  ;;  %v1618_v30 = vld [vmem:[%s11797_s10 + $0xe98] sm:$0xff] }
 0x4a9   : > { %8160 = vmatpush1.bf16.msra.mxu0 %v10027_v54  ;;  %8488 = vmatpush1.bf16.msra.mxu1 %v10029_v57  ;;  %v1590_v54 = vld [vmem:[%s11797_s10 + $0xdb8] sm:$0xff]  ;;  %v10083_v57 = vcombine.low %v1577_v44, %v1581_v45  ;;  %v1625_v45 = vld [vmem:[%s11797_s10 + $0xed0] sm:$0xff] }
 0x4aa   : > { %8161 = vmatprep.subr.bf16.mxu0 %v10036_v58  ;;  %8489 = vmatprep.subr.bf16.mxu1 %v10038_v61  ;;  %v10085_v58 = vcombine.low %v1578_v46, %v1582_v47  ;;  %v10092_v61 = vcombine.high %v1585_v50, %v1589_v51  ;;  %v10094_v2 = vcombine.high %v1586_v53, %v1590_v54  ;;  %v1629_v46 = vld [vmem:[%s11797_s10 + $0xef0] sm:$0xff]  ;;  %v1626_v47 = vld [vmem:[%s11797_s10 + $0xed8] sm:$0xff] }
 0x4ab   : > { %v1633_v51 = vld [vmem:[%s11797_s10 + $0xf10] sm:$0xff] }
 0x4ad   : > { %8162 = vmatpush1.bf16.msra.mxu0 %v10035_v7  ;;  %8490 = vmatpush1.bf16.msra.mxu1 %v10037_v11 }
 0x4ae   : > { %8172 = vmatprep.subr.bf16.mxu0 %v10044_v1  ;;  %8500 = vmatprep.subr.bf16.mxu1 %v10046_v12  ;;  %v1594_v1 = vld [vmem:[%s11797_s10 + $0xdd8] sm:$0xff] }
 0x4af   : > { %v1598_v12 = vld [vmem:[%s11797_s10 + $0xdf8] sm:$0xff] }
 0x4b0   : > { %8164 = vmatmul.mubr.bf16.vlgmr.msra.gmra.mrb[4].mxu0 %v12092_v6  ;;  %8492 = vmatmul.mubr.bf16.vlgmr.msra.gmra.mrb[4].mxu1 %v12092_v6  ;;  %v10059_v6 = vcombine.low %v1553_v10, %v1557_v18  ;;  %v10102_v10 = vcombine.high %v1594_v1, %v1598_v12  ;;  %v1601_v18 = vld [vmem:[%s11797_s10 + $0xe10] sm:$0xff] }
 0x4b1   : > { %8173 = vmatpush1.bf16.msra.mxu0 %v10043_v16  ;;  %8501 = vmatpush1.bf16.msra.mxu1 %v10045_v17  ;;  %v10093_v17 = vcombine.low %v1586_v53, %v1590_v54  ;;  %v1637_v53 = vld [vmem:[%s11797_s10 + $0xf30] sm:$0xff]  ;;  %v1634_v54 = vld [vmem:[%s11797_s10 + $0xf18] sm:$0xff] }
 0x4b2   : > { %8174 = vmatprep.subr.bf16.mxu0 %v10052_v9  ;;  %8502 = vmatprep.subr.bf16.mxu1 %v10054_v13  ;;  %v10100_v9 = vcombine.high %v1593_v3, %v1597_v4 }
 0x4b3   : > { %8204 = vmatprep.mubr.bf16.mxu0 %v12102_v0  ;;  %8532 = vmatprep.mubr.bf16.mxu1 %v12102_v0  ;;  %v10069_v0 = vcombine.low %v1562_v33, %v1566_v35  ;;  %v1613_v33 = vld [vmem:[%s11797_s10 + $0xe70] sm:$0xff]  ;;  %v1610_v35 = vld [vmem:[%s11797_s10 + $0xe58] sm:$0xff] }
 0x4b5   : > { %8175 = vmatpush1.bf16.msra.mxu0 %v10051_v22  ;;  %8503 = vmatpush1.bf16.msra.mxu1 %v10053_v23  ;;  %v1606_v22 = vld [vmem:[%s11797_s10 + $0xe38] sm:$0xff]  ;;  %v10099_v23 = vcombine.low %v1593_v3, %v1597_v4  ;;  %v1641_v4 = vld [vmem:[%s11797_s10 + $0xf50] sm:$0xff] }
 0x4b6   : > { %8176 = vmatprep.subr.bf16.mxu0 %v10060_v27  ;;  %8504 = vmatprep.subr.bf16.mxu1 %v10062_v28  ;;  %v10101_v27 = vcombine.low %v1594_v1, %v1598_v12  ;;  %v10108_v28 = vcombine.high %v1601_v18, %v1605_v20  ;;  %v10110_v31 = vcombine.high %v1602_v21, %v1606_v22  ;;  %v1645_v1 = vld [vmem:[%s11797_s10 + $0xf70] sm:$0xff]  ;;  %v1642_v12 = vld [vmem:[%s11797_s10 + $0xf58] sm:$0xff] }
 0x4b9   : > { %8177 = vmatpush1.bf16.msra.mxu0 %v10059_v6  ;;  %8505 = vmatpush1.bf16.msra.mxu1 %v10061_v37  ;;  %v1614_v6 = vld [vmem:[%s11797_s10 + $0xe78] sm:$0xff]  ;;  %v10107_v37 = vcombine.low %v1601_v18, %v1605_v20  ;;  %v10147_v20 = vcombine.low %v1641_v4, %v1645_v1 }
 0x4ba   : > { %8178 = vmatprep.subr.bf16.mxu0 %v10068_v19  ;;  %8506 = vmatprep.subr.bf16.mxu1 %v10070_v24  ;;  %v10109_v19 = vcombine.low %v1602_v21, %v1606_v22  ;;  %v10116_v24 = vcombine.high %v1609_v32, %v1613_v33  ;;  %v10118_v25 = vcombine.high %v1610_v35, %v1614_v6  ;;  %v1654_v18 = vld [vmem:[%s11797_s10 + $0xfb8] sm:$0xff] }
 0x4bd   : > { %8179 = vmatpush1.bf16.msra.mxu0 %v10067_v41  ;;  %8507 = vmatpush1.bf16.msra.mxu1 %v10069_v0  ;;  %v1622_v41 = vld [vmem:[%s11797_s10 + $0xeb8] sm:$0xff]  ;;  %v10115_v0 = vcombine.low %v1609_v32, %v1613_v33 }
 0x4be   : > { %8180 = vmatprep.subr.bf16.mxu0 %v10076_v42  ;;  %8508 = vmatprep.subr.bf16.mxu1 %v10078_v43  ;;  %v10117_v42 = vcombine.low %v1610_v35, %v1614_v6  ;;  %v10124_v43 = vcombine.high %v1617_v39, %v1621_v52  ;;  %v10126_v44 = vcombine.high %v1618_v30, %v1622_v41  ;;  %v1662_v32 = vld [vmem:[%s11797_s10 + $0xff8] sm:$0xff] }
 0x4c1   : > { %8181 = vmatpush1.bf16.msra.mxu0 %v10075_v63  ;;  %8509 = vmatpush1.bf16.msra.mxu1 %v10077_v48  ;;  %v1630_v63 = vld [vmem:[%s11797_s10 + $0xef8] sm:$0xff]  ;;  %v10123_v48 = vcombine.low %v1617_v39, %v1621_v52 }
 0x4c2   : > { %8182 = vmatprep.subr.bf16.mxu0 %v10084_v34  ;;  %8510 = vmatprep.subr.bf16.mxu1 %v10086_v49  ;;  %v10125_v34 = vcombine.low %v1618_v30, %v1622_v41  ;;  %v10132_v49 = vcombine.high %v1625_v45, %v1629_v46  ;;  %v10134_v50 = vcombine.high %v1626_v47, %v1630_v63  ;;  %v1670_v39 = vld [vmem:[%s11797_s10 + $0x1038] sm:$0xff] }
 0x4c3   : > { %v12714_v62 = vpop.f32.mrb[0].mxu0  ;;  %v12718_v7 = vpop.f32.mrb[0].mxu1 }
 0x4c4   : > { %v12720_v11 = vpop.f32.mrb[1].mxu0  ;;  %v12724_v55 = vpop.f32.mrb[1].mxu1 }
 0x4c5   : > { %v7718_v14 = vpop.f32.mrb[2].mxu0  ;;  %8183 = vmatpush1.bf16.msra.mxu0 %v10083_v57  ;;  %v8046_v5 = vpop.f32.mrb[2].mxu1  ;;  %8511 = vmatpush1.bf16.msra.mxu1 %v10085_v58  ;;  %v1638_v57 = vld [vmem:[%s11797_s10 + $0xf38] sm:$0xff]  ;;  %v10131_v58 = vcombine.low %v1625_v45, %v1629_v46 }
 0x4c6   : > { %v7719_v16 = vpop.f32.mrb[3].mxu0  ;;  %8184 = vmatprep.subr.bf16.mxu0 %v10092_v61  ;;  %v8047_v13 = vpop.f32.mrb[3].mxu1  ;;  %8512 = vmatprep.subr.bf16.mxu1 %v10094_v2  ;;  %v10133_v61 = vcombine.low %v1626_v47, %v1630_v63  ;;  %v10140_v2 = vcombine.high %v1633_v51, %v1637_v53  ;;  %v10142_v3 = vcombine.high %v1634_v54, %v1638_v57  ;;  %v1646_v14 = vld [vmem:[%s11797_s10 + $0xf78] sm:$0xff] }
 0x4c7   : > { %v10141_v5 = vcombine.low %v1634_v54, %v1638_v57  ;;  %v10148_v16 = vcombine.high %v1641_v4, %v1645_v1  ;;  %v1653_v13 = vld [vmem:[%s11797_s10 + $0xfb0] sm:$0xff]  ;;  %v10149_v21 = vcombine.low %v1642_v12, %v1646_v14  ;;  %v1678_v45 = vld [vmem:[%s11797_s10 + $0x1078] sm:$0xff] }
 0x4c8   : > { %v1694_v4 = vld [vmem:[%s11797_s10 + $0x10f8] sm:$0xff] }
 0x4c9   : > { %8185 = vmatpush1.bf16.msra.mxu0 %v10091_v15  ;;  %8513 = vmatpush1.bf16.msra.mxu1 %v10093_v17  ;;  %v10139_v15 = vcombine.low %v1633_v51, %v1637_v53  ;;  %v10150_v17 = vcombine.high %v1642_v12, %v1646_v14  ;;  %v1686_v51 = vld [vmem:[%s11797_s10 + $0x10b8] sm:$0xff] }
 0x4ca   : > { %8186 = vmatprep.subr.bf16.mxu0 %v10100_v9  ;;  %8514 = vmatprep.subr.bf16.mxu1 %v10102_v10  ;;  %v1649_v9 = vld [vmem:[%s11797_s10 + $0xf90] sm:$0xff]  ;;  %v1650_v10 = vld [vmem:[%s11797_s10 + $0xf98] sm:$0xff] }
 0x4cb   : > { %v10156_v22 = vcombine.high %v1649_v9, %v1653_v13  ;;  %v10155_v33 = vcombine.low %v1649_v9, %v1653_v13  ;;  %v10157_v35 = vcombine.low %v1650_v10, %v1654_v18 }
 0x4cd   : > { %8187 = vmatpush1.bf16.msra.mxu0 %v10099_v23  ;;  %8515 = vmatpush1.bf16.msra.mxu1 %v10101_v27  ;;  %v10158_v23 = vcombine.high %v1650_v10, %v1654_v18  ;;  %v1657_v27 = vld [vmem:[%s11797_s10 + $0xfd0] sm:$0xff] }
 0x4ce   : > { %8188 = vmatprep.subr.bf16.mxu0 %v10108_v28  ;;  %8516 = vmatprep.subr.bf16.mxu1 %v10110_v31  ;;  %v1661_v28 = vld [vmem:[%s11797_s10 + $0xff0] sm:$0xff]  ;;  %v1658_v31 = vld [vmem:[%s11797_s10 + $0xfd8] sm:$0xff] }
 0x4cf   : > { %v10164_v6 = vcombine.high %v1657_v27, %v1661_v28  ;;  %v10163_v52 = vcombine.low %v1657_v27, %v1661_v28  ;;  %v10165_v30 = vcombine.low %v1658_v31, %v1662_v32  ;;  %v1705_v18 = vld [vmem:[%s11797_s10 + $0x1150] sm:$0xff] }
 0x4d1   : > { %8189 = vmatpush1.bf16.msra.mxu0 %v10107_v37  ;;  %8517 = vmatpush1.bf16.msra.mxu1 %v10109_v19  ;;  %v10166_v37 = vcombine.high %v1658_v31, %v1662_v32  ;;  %v1665_v19 = vld [vmem:[%s11797_s10 + $0x1010] sm:$0xff] }
 0x4d2   : > { %8190 = vmatprep.subr.bf16.mxu0 %v10116_v24  ;;  %8518 = vmatprep.subr.bf16.mxu1 %v10118_v25  ;;  %v1669_v24 = vld [vmem:[%s11797_s10 + $0x1030] sm:$0xff]  ;;  %v1666_v25 = vld [vmem:[%s11797_s10 + $0x1018] sm:$0xff] }
 0x4d3   : > { %v10172_v41 = vcombine.high %v1665_v19, %v1669_v24  ;;  %v10171_v46 = vcombine.low %v1665_v19, %v1669_v24  ;;  %v10173_v47 = vcombine.low %v1666_v25, %v1670_v39  ;;  %v1713_v32 = vld [vmem:[%s11797_s10 + $0x1190] sm:$0xff] }
 0x4d5   : > { %8191 = vmatpush1.bf16.msra.mxu0 %v10115_v0  ;;  %8519 = vmatpush1.bf16.msra.mxu1 %v10117_v42  ;;  %v10174_v0 = vcombine.high %v1666_v25, %v1670_v39  ;;  %v1673_v42 = vld [vmem:[%s11797_s10 + $0x1050] sm:$0xff] }
 0x4d6   : > { %8192 = vmatprep.subr.bf16.mxu0 %v10124_v43  ;;  %8520 = vmatprep.subr.bf16.mxu1 %v10126_v44  ;;  %v1677_v43 = vld [vmem:[%s11797_s10 + $0x1070] sm:$0xff]  ;;  %v1674_v44 = vld [vmem:[%s11797_s10 + $0x1058] sm:$0xff] }
 0x4d7   : > { %v10180_v63 = vcombine.high %v1673_v42, %v1677_v43  ;;  %v10179_v53 = vcombine.low %v1673_v42, %v1677_v43  ;;  %v10181_v54 = vcombine.low %v1674_v44, %v1678_v45  ;;  %v1721_v39 = vld [vmem:[%s11797_s10 + $0x11d0] sm:$0xff] }
 0x4d9   : > { %8193 = vmatpush1.bf16.msra.mxu0 %v10123_v48  ;;  %8521 = vmatpush1.bf16.msra.mxu1 %v10125_v34  ;;  %v10182_v48 = vcombine.high %v1674_v44, %v1678_v45  ;;  %v1681_v34 = vld [vmem:[%s11797_s10 + $0x1090] sm:$0xff] }
 0x4da   : > { %8194 = vmatprep.subr.bf16.mxu0 %v10132_v49  ;;  %8522 = vmatprep.subr.bf16.mxu1 %v10134_v50  ;;  %v1685_v49 = vld [vmem:[%s11797_s10 + $0x10b0] sm:$0xff]  ;;  %v1682_v50 = vld [vmem:[%s11797_s10 + $0x1098] sm:$0xff] }
 0x4db   : > { %v10188_v57 = vcombine.high %v1681_v34, %v1685_v49  ;;  %v10189_v1 = vcombine.low %v1682_v50, %v1686_v51  ;;  %v1729_v45 = vld [vmem:[%s11797_s10 + $0x1210] sm:$0xff] }
 0x4dd   : > { %8195 = vmatpush1.bf16.msra.mxu0 %v10131_v58  ;;  %8523 = vmatpush1.bf16.msra.mxu1 %v10133_v61  ;;  %v10190_v58 = vcombine.high %v1682_v50, %v1686_v51  ;;  %v1689_v61 = vld [vmem:[%s11797_s10 + $0x10d0] sm:$0xff] }
 0x4de   : > { %8196 = vmatprep.subr.bf16.mxu0 %v10140_v2  ;;  %8524 = vmatprep.subr.bf16.mxu1 %v10142_v3  ;;  %v1693_v2 = vld [vmem:[%s11797_s10 + $0x10f0] sm:$0xff]  ;;  %v1690_v3 = vld [vmem:[%s11797_s10 + $0x10d8] sm:$0xff] }
 0x4df   : > { %v10196_v12 = vcombine.high %v1689_v61, %v1693_v2  ;;  %v10198_v14 = vcombine.high %v1690_v3, %v1694_v4  ;;  %v10195_v9 = vcombine.low %v1689_v61, %v1693_v2  ;;  %v1737_v51 = vld [vmem:[%s11797_s10 + $0x1250] sm:$0xff] }
 0x4e1   : > { %8197 = vmatpush1.bf16.msra.mxu0 %v10139_v15  ;;  %8525 = vmatpush1.bf16.msra.mxu1 %v10141_v5  ;;  %v1697_v15 = vld [vmem:[%s11797_s10 + $0x1110] sm:$0xff] }
 0x4e2   : > { %8198 = vmatprep.subr.bf16.mxu0 %v10148_v16  ;;  %8526 = vmatprep.subr.bf16.mxu1 %v10150_v17  ;;  %v1701_v5 = vld [vmem:[%s11797_s10 + $0x1130] sm:$0xff]  ;;  %v1698_v16 = vld [vmem:[%s11797_s10 + $0x1118] sm:$0xff] }
 0x4e3   : > { %v1702_v17 = vld [vmem:[%s11797_s10 + $0x1138] sm:$0xff]  ;;  %v10204_v13 = vcombine.high %v1697_v15, %v1701_v5 }
 0x4e4   : > { %v10206_v10 = vcombine.high %v1698_v16, %v1702_v17  ;;  %v10205_v27 = vcombine.low %v1698_v16, %v1702_v17  ;;  %v1753_v17 = vld [vmem:[%s11797_s10 + $0x12d0] sm:$0xff] }
 0x4e5   : > { %8199 = vmatpush1.bf16.msra.mxu0 %v10147_v20  ;;  %8527 = vmatpush1.bf16.msra.mxu1 %v10149_v21  ;;  %v1709_v20 = vld [vmem:[%s11797_s10 + $0x1170] sm:$0xff]  ;;  %v1706_v21 = vld [vmem:[%s11797_s10 + $0x1158] sm:$0xff] }
 0x4e6   : > { %8200 = vmatprep.subr.bf16.mxu0 %v10156_v22  ;;  %8528 = vmatprep.subr.bf16.mxu1 %v10158_v23  ;;  %v1710_v22 = vld [vmem:[%s11797_s10 + $0x1178] sm:$0xff]  ;;  %v10203_v23 = vcombine.low %v1697_v15, %v1701_v5  ;;  %v10212_v28 = vcombine.high %v1705_v18, %v1709_v20 }
 0x4e7   : > { %v10214_v31 = vcombine.high %v1706_v21, %v1710_v22  ;;  %v10213_v19 = vcombine.low %v1706_v21, %v1710_v22  ;;  %v1761_v22 = vld [vmem:[%s11797_s10 + $0x1310] sm:$0xff] }
 0x4e9   : > { %8201 = vmatpush1.bf16.msra.mxu0 %v10155_v33  ;;  %8529 = vmatpush1.bf16.msra.mxu1 %v10157_v35  ;;  %v1717_v33 = vld [vmem:[%s11797_s10 + $0x11b0] sm:$0xff]  ;;  %v1714_v35 = vld [vmem:[%s11797_s10 + $0x1198] sm:$0xff] }
 0x4ea   : > { %8202 = vmatprep.subr.bf16.mxu0 %v10164_v6  ;;  %8530 = vmatprep.subr.bf16.mxu1 %v10166_v37  ;;  %v1718_v6 = vld [vmem:[%s11797_s10 + $0x11b8] sm:$0xff]  ;;  %v10211_v37 = vcombine.low %v1705_v18, %v1709_v20  ;;  %v10220_v24 = vcombine.high %v1713_v32, %v1717_v33 }
 0x4eb   : > { %v10222_v25 = vcombine.high %v1714_v35, %v1718_v6  ;;  %v10221_v42 = vcombine.low %v1714_v35, %v1718_v6  ;;  %v1769_v6 = vld [vmem:[%s11797_s10 + $0x1350] sm:$0xff] }
 0x4ed   : > { %8203 = vmatpush1.bf16.msra.mxu0 %v10163_v52  ;;  %8531 = vmatpush1.bf16.msra.mxu1 %v10165_v30  ;;  %v1725_v52 = vld [vmem:[%s11797_s10 + $0x11f0] sm:$0xff]  ;;  %v1722_v30 = vld [vmem:[%s11797_s10 + $0x11d8] sm:$0xff] }
 0x4ee   : > { %8213 = vmatprep.subr.bf16.mxu0 %v10172_v41  ;;  %8541 = vmatprep.subr.bf16.mxu1 %v10174_v0  ;;  %v1726_v41 = vld [vmem:[%s11797_s10 + $0x11f8] sm:$0xff]  ;;  %v10219_v0 = vcombine.low %v1713_v32, %v1717_v33  ;;  %v10228_v43 = vcombine.high %v1721_v39, %v1725_v52 }
 0x4ef   : > { %v10230_v44 = vcombine.high %v1722_v30, %v1726_v41 }
 0x4f0   : > { %8205 = vmatmul.mubr.bf16.vlgmr.msra.gmra.mrb[4].mxu0 %v12170_v36  ;;  %8533 = vmatmul.mubr.bf16.vlgmr.msra.gmra.mrb[4].mxu1 %v12170_v36  ;;  %v10187_v36 = vcombine.low %v1681_v34, %v1685_v49  ;;  %v10229_v34 = vcombine.low %v1722_v30, %v1726_v41  ;;  %v1777_v41 = vld [vmem:[%s11797_s10 + $0x1390] sm:$0xff] }
 0x4f1   : > { %8214 = vmatpush1.bf16.msra.mxu0 %v10171_v46  ;;  %8542 = vmatpush1.bf16.msra.mxu1 %v10173_v47  ;;  %v1733_v46 = vld [vmem:[%s11797_s10 + $0x1230] sm:$0xff]  ;;  %v1730_v47 = vld [vmem:[%s11797_s10 + $0x1218] sm:$0xff] }
 0x4f2   : > { %8215 = vmatprep.subr.bf16.mxu0 %v10180_v63  ;;  %8543 = vmatprep.subr.bf16.mxu1 %v10182_v48  ;;  %v1734_v63 = vld [vmem:[%s11797_s10 + $0x1238] sm:$0xff]  ;;  %v10227_v48 = vcombine.low %v1721_v39, %v1725_v52  ;;  %v10236_v49 = vcombine.high %v1729_v45, %v1733_v46 }
 0x4f3   : > { %8245 = vmatprep.mubr.bf16.mxu0 %v12180_v8  ;;  %8573 = vmatprep.mubr.bf16.mxu1 %v12180_v8  ;;  %v10197_v8 = vcombine.low %v1690_v3, %v1694_v4  ;;  %v10238_v50 = vcombine.high %v1730_v47, %v1734_v63  ;;  %v10237_v61 = vcombine.low %v1730_v47, %v1734_v63  ;;  %v1745_v4 = vld [vmem:[%s11797_s10 + $0x1290] sm:$0xff] }
 0x4f4   : > { %v1785_v63 = vld [vmem:[%s11797_s10 + $0x13d0] sm:$0xff] }
 0x4f5   : > { %8216 = vmatpush1.bf16.msra.mxu0 %v10179_v53  ;;  %8544 = vmatpush1.bf16.msra.mxu1 %v10181_v54  ;;  %v1741_v53 = vld [vmem:[%s11797_s10 + $0x1270] sm:$0xff]  ;;  %v1738_v54 = vld [vmem:[%s11797_s10 + $0x1258] sm:$0xff] }
 0x4f6   : > { %8217 = vmatprep.subr.bf16.mxu0 %v10188_v57  ;;  %8545 = vmatprep.subr.bf16.mxu1 %v10190_v58  ;;  %v1742_v57 = vld [vmem:[%s11797_s10 + $0x1278] sm:$0xff]  ;;  %v10235_v58 = vcombine.low %v1729_v45, %v1733_v46  ;;  %v10244_v2 = vcombine.high %v1737_v51, %v1741_v53 }
 0x4f7   : > { %v10246_v3 = vcombine.high %v1738_v54, %v1742_v57  ;;  %v10245_v15 = vcombine.low %v1738_v54, %v1742_v57  ;;  %v1793_v57 = vld [vmem:[%s11797_s10 + $0x1410] sm:$0xff] }
 0x4f9   : > { %8218 = vmatpush1.bf16.msra.mxu0 %v10187_v36  ;;  %8546 = vmatpush1.bf16.msra.mxu1 %v10189_v1  ;;  %v1749_v36 = vld [vmem:[%s11797_s10 + $0x12b0] sm:$0xff]  ;;  %v1746_v1 = vld [vmem:[%s11797_s10 + $0x1298] sm:$0xff] }
 0x4fa   : > { %8219 = vmatprep.subr.bf16.mxu0 %v10196_v12  ;;  %8547 = vmatprep.subr.bf16.mxu1 %v10198_v14  ;;  %v1750_v12 = vld [vmem:[%s11797_s10 + $0x12b8] sm:$0xff]  ;;  %v10243_v14 = vcombine.low %v1737_v51, %v1741_v53  ;;  %v10252_v5 = vcombine.high %v1745_v4, %v1749_v36 }
 0x4fb   : > { %v10254_v16 = vcombine.high %v1746_v1, %v1750_v12  ;;  %v10253_v18 = vcombine.low %v1746_v1, %v1750_v12  ;;  %v1801_v12 = vld [vmem:[%s11797_s10 + $0x1450] sm:$0xff] }
 0x4fd   : > { %8220 = vmatpush1.bf16.msra.mxu0 %v10195_v9  ;;  %8548 = vmatpush1.bf16.msra.mxu1 %v10197_v8  ;;  %v1757_v9 = vld [vmem:[%s11797_s10 + $0x12f0] sm:$0xff]  ;;  %v1754_v8 = vld [vmem:[%s11797_s10 + $0x12d8] sm:$0xff] }
 0x4fe   : > { %8221 = vmatprep.subr.bf16.mxu0 %v10204_v13  ;;  %8549 = vmatprep.subr.bf16.mxu1 %v10206_v10  ;;  %v1758_v13 = vld [vmem:[%s11797_s10 + $0x12f8] sm:$0xff]  ;;  %v10251_v10 = vcombine.low %v1745_v4, %v1749_v36  ;;  %v10260_v20 = vcombine.high %v1753_v17, %v1757_v9 }
 0x4ff   : > { %v10262_v21 = vcombine.high %v1754_v8, %v1758_v13  ;;  %v10261_v32 = vcombine.low %v1754_v8, %v1758_v13  ;;  %v1809_v13 = vld [vmem:[%s11797_s10 + $0x1490] sm:$0xff] }
 0x501   : > { %8222 = vmatpush1.bf16.msra.mxu0 %v10203_v23  ;;  %8550 = vmatpush1.bf16.msra.mxu1 %v10205_v27  ;;  %v1765_v23 = vld [vmem:[%s11797_s10 + $0x1330] sm:$0xff]  ;;  %v1762_v27 = vld [vmem:[%s11797_s10 + $0x1318] sm:$0xff] }
 0x502   : > { %8223 = vmatprep.subr.bf16.mxu0 %v10212_v28  ;;  %8551 = vmatprep.subr.bf16.mxu1 %v10214_v31  ;;  %v1766_v28 = vld [vmem:[%s11797_s10 + $0x1338] sm:$0xff]  ;;  %v10259_v31 = vcombine.low %v1753_v17, %v1757_v9  ;;  %v10268_v33 = vcombine.high %v1761_v22, %v1765_v23 }
 0x503   : > { %v10270_v35 = vcombine.high %v1762_v27, %v1766_v28  ;;  %v10269_v39 = vcombine.low %v1762_v27, %v1766_v28  ;;  %v1817_v28 = vld [vmem:[%s11797_s10 + $0x14d0] sm:$0xff] }
 0x505   : > { %8224 = vmatpush1.bf16.msra.mxu0 %v10211_v37  ;;  %8552 = vmatpush1.bf16.msra.mxu1 %v10213_v19  ;;  %v1773_v37 = vld [vmem:[%s11797_s10 + $0x1370] sm:$0xff]  ;;  %v1770_v19 = vld [vmem:[%s11797_s10 + $0x1358] sm:$0xff] }
 0x506   : > { %8225 = vmatprep.subr.bf16.mxu0 %v10220_v24  ;;  %8553 = vmatprep.subr.bf16.mxu1 %v10222_v25  ;;  %v1774_v24 = vld [vmem:[%s11797_s10 + $0x1378] sm:$0xff]  ;;  %v10267_v25 = vcombine.low %v1761_v22, %v1765_v23  ;;  %v10276_v52 = vcombine.high %v1769_v6, %v1773_v37 }
 0x507   : > { %v10278_v30 = vcombine.high %v1770_v19, %v1774_v24  ;;  %v10277_v45 = vcombine.low %v1770_v19, %v1774_v24  ;;  %v1825_v19 = vld [vmem:[%s11797_s10 + $0x1510] sm:$0xff] }
 0x508   : > { %v1829_v24 = vld [vmem:[%s11797_s10 + $0x1530] sm:$0xff] }
 0x509   : > { %8226 = vmatpush1.bf16.msra.mxu0 %v10219_v0  ;;  %8554 = vmatpush1.bf16.msra.mxu1 %v10221_v42  ;;  %v1781_v0 = vld [vmem:[%s11797_s10 + $0x13b0] sm:$0xff]  ;;  %v1778_v42 = vld [vmem:[%s11797_s10 + $0x1398] sm:$0xff] }
 0x50a   : > { %8227 = vmatprep.subr.bf16.mxu0 %v10228_v43  ;;  %8555 = vmatprep.subr.bf16.mxu1 %v10230_v44  ;;  %v1782_v43 = vld [vmem:[%s11797_s10 + $0x13b8] sm:$0xff]  ;;  %v10275_v44 = vcombine.low %v1769_v6, %v1773_v37  ;;  %v10284_v46 = vcombine.high %v1777_v41, %v1781_v0 }
 0x50b   : > { %v10286_v47 = vcombine.high %v1778_v42, %v1782_v43  ;;  %v10285_v51 = vcombine.low %v1778_v42, %v1782_v43  ;;  %v1837_v42 = vld [vmem:[%s11797_s10 + $0x1570] sm:$0xff]  ;;  %v1834_v43 = vld [vmem:[%s11797_s10 + $0x1558] sm:$0xff] }
 0x50d   : > { %8228 = vmatpush1.bf16.msra.mxu0 %v10227_v48  ;;  %8556 = vmatpush1.bf16.msra.mxu1 %v10229_v34  ;;  %v1789_v48 = vld [vmem:[%s11797_s10 + $0x13f0] sm:$0xff]  ;;  %v1786_v34 = vld [vmem:[%s11797_s10 + $0x13d8] sm:$0xff] }
 0x50e   : > { %8229 = vmatprep.subr.bf16.mxu0 %v10236_v49  ;;  %8557 = vmatprep.subr.bf16.mxu1 %v10238_v50  ;;  %v1790_v49 = vld [vmem:[%s11797_s10 + $0x13f8] sm:$0xff]  ;;  %v10283_v50 = vcombine.low %v1777_v41, %v1781_v0  ;;  %v10292_v53 = vcombine.high %v1785_v63, %v1789_v48  ;;  %v1833_v0 = vld [vmem:[%s11797_s10 + $0x1550] sm:$0xff] }
 0x50f   : > { %v10294_v54 = vcombine.high %v1786_v34, %v1790_v49  ;;  %v10293_v4 = vcombine.low %v1786_v34, %v1790_v49  ;;  %v1845_v34 = vld [vmem:[%s11797_s10 + $0x15b0] sm:$0xff]  ;;  %v1842_v49 = vld [vmem:[%s11797_s10 + $0x1598] sm:$0xff] }
 0x511   : > { %8230 = vmatpush1.bf16.msra.mxu0 %v10235_v58  ;;  %8558 = vmatpush1.bf16.msra.mxu1 %v10237_v61  ;;  %v1797_v58 = vld [vmem:[%s11797_s10 + $0x1430] sm:$0xff]  ;;  %v1794_v61 = vld [vmem:[%s11797_s10 + $0x1418] sm:$0xff] }
 0x512   : > { %8231 = vmatprep.subr.bf16.mxu0 %v10244_v2  ;;  %8559 = vmatprep.subr.bf16.mxu1 %v10246_v3  ;;  %v1798_v2 = vld [vmem:[%s11797_s10 + $0x1438] sm:$0xff]  ;;  %v10291_v3 = vcombine.low %v1785_v63, %v1789_v48  ;;  %v10300_v36 = vcombine.high %v1793_v57, %v1797_v58  ;;  %v1841_v48 = vld [vmem:[%s11797_s10 + $0x1590] sm:$0xff] }
 0x513   : > { %v10302_v1 = vcombine.high %v1794_v61, %v1798_v2  ;;  %v10301_v17 = vcombine.low %v1794_v61, %v1798_v2  ;;  %v1853_v61 = vld [vmem:[%s11797_s10 + $0x15f0] sm:$0xff]  ;;  %v1850_v2 = vld [vmem:[%s11797_s10 + $0x15d8] sm:$0xff] }
 0x515   : > { %8232 = vmatpush1.bf16.msra.mxu0 %v10243_v14  ;;  %8560 = vmatpush1.bf16.msra.mxu1 %v10245_v15  ;;  %v1805_v14 = vld [vmem:[%s11797_s10 + $0x1470] sm:$0xff]  ;;  %v1802_v15 = vld [vmem:[%s11797_s10 + $0x1458] sm:$0xff] }
 0x516   : > { %8233 = vmatprep.subr.bf16.mxu0 %v10252_v5  ;;  %8561 = vmatprep.subr.bf16.mxu1 %v10254_v16  ;;  %v1806_v5 = vld [vmem:[%s11797_s10 + $0x1478] sm:$0xff]  ;;  %v10299_v16 = vcombine.low %v1793_v57, %v1797_v58  ;;  %v10308_v9 = vcombine.high %v1801_v12, %v1805_v14  ;;  %v1849_v58 = vld [vmem:[%s11797_s10 + $0x15d0] sm:$0xff] }
 0x517   : > { %v10310_v8 = vcombine.high %v1802_v15, %v1806_v5  ;;  %v10309_v22 = vcombine.low %v1802_v15, %v1806_v5  ;;  %v1861_v15 = vld [vmem:[%s11797_s10 + $0x1630] sm:$0xff]  ;;  %v1858_v5 = vld [vmem:[%s11797_s10 + $0x1618] sm:$0xff] }
 0x519   : > { %8234 = vmatpush1.bf16.msra.mxu0 %v10251_v10  ;;  %8562 = vmatpush1.bf16.msra.mxu1 %v10253_v18  ;;  %v1813_v10 = vld [vmem:[%s11797_s10 + $0x14b0] sm:$0xff]  ;;  %v1810_v18 = vld [vmem:[%s11797_s10 + $0x1498] sm:$0xff] }
 0x51a   : > { %8235 = vmatprep.subr.bf16.mxu0 %v10260_v20  ;;  %8563 = vmatprep.subr.bf16.mxu1 %v10262_v21  ;;  %v1814_v20 = vld [vmem:[%s11797_s10 + $0x14b8] sm:$0xff]  ;;  %v10307_v21 = vcombine.low %v1801_v12, %v1805_v14  ;;  %v10316_v23 = vcombine.high %v1809_v13, %v1813_v10  ;;  %v1857_v14 = vld [vmem:[%s11797_s10 + $0x1610] sm:$0xff] }
 0x51b   : > { %v10318_v27 = vcombine.high %v1810_v18, %v1814_v20 }
 0x51d   : > { %8236 = vmatpush1.bf16.msra.mxu0 %v10259_v31  ;;  %8564 = vmatpush1.bf16.msra.mxu1 %v10261_v32  ;;  %v1821_v31 = vld [vmem:[%s11797_s10 + $0x14f0] sm:$0xff]  ;;  %v1818_v32 = vld [vmem:[%s11797_s10 + $0x14d8] sm:$0xff] }
 0x51e   : > { %8237 = vmatprep.subr.bf16.mxu0 %v10268_v33  ;;  %8565 = vmatprep.subr.bf16.mxu1 %v10270_v35  ;;  %v1822_v33 = vld [vmem:[%s11797_s10 + $0x14f8] sm:$0xff]  ;;  %v10317_v35 = vcombine.low %v1810_v18, %v1814_v20  ;;  %v10324_v6 = vcombine.high %v1817_v28, %v1821_v31  ;;  %v1869_v18 = vld [vmem:[%s11797_s10 + $0x1670] sm:$0xff] }
 0x51f   : > { %v10326_v37 = vcombine.high %v1818_v32, %v1822_v33  ;;  %v1866_v20 = vld [vmem:[%s11797_s10 + $0x1658] sm:$0xff] }
 0x521   : > { %8238 = vmatpush1.bf16.msra.mxu0 %v10267_v25  ;;  %8566 = vmatpush1.bf16.msra.mxu1 %v10269_v39  ;;  %v1826_v25 = vld [vmem:[%s11797_s10 + $0x1518] sm:$0xff] }
 0x522   : > { %8239 = vmatprep.subr.bf16.mxu0 %v10276_v52  ;;  %8567 = vmatprep.subr.bf16.mxu1 %v10278_v30  ;;  %v1830_v39 = vld [vmem:[%s11797_s10 + $0x1538] sm:$0xff]  ;;  %v10323_v52 = vcombine.low %v1817_v28, %v1821_v31  ;;  %v10332_v30 = vcombine.high %v1825_v19, %v1829_v24  ;;  %v1873_v31 = vld [vmem:[%s11797_s10 + $0x1690] sm:$0xff] }
 0x523   : > { %v10334_v41 = vcombine.high %v1826_v25, %v1830_v39 }
 0x525   : > { %8240 = vmatpush1.bf16.msra.mxu0 %v10275_v44  ;;  %8568 = vmatpush1.bf16.msra.mxu1 %v10277_v45  ;;  %v1838_v44 = vld [vmem:[%s11797_s10 + $0x1578] sm:$0xff]  ;;  %v10331_v45 = vcombine.low %v1825_v19, %v1829_v24  ;;  %v1881_v24 = vld [vmem:[%s11797_s10 + $0x16d0] sm:$0xff] }
 0x526   : > { %8241 = vmatprep.subr.bf16.mxu0 %v10284_v46  ;;  %8569 = vmatprep.subr.bf16.mxu1 %v10286_v47  ;;  %v10333_v46 = vcombine.low %v1826_v25, %v1830_v39  ;;  %v10340_v47 = vcombine.high %v1833_v0, %v1837_v42  ;;  %v10342_v63 = vcombine.high %v1834_v43, %v1838_v44  ;;  %v1885_v25 = vld [vmem:[%s11797_s10 + $0x16f0] sm:$0xff]  ;;  %v1882_v39 = vld [vmem:[%s11797_s10 + $0x16d8] sm:$0xff] }
 0x529   : > { %8242 = vmatpush1.bf16.msra.mxu0 %v10283_v50  ;;  %8570 = vmatpush1.bf16.msra.mxu1 %v10285_v51  ;;  %v1846_v50 = vld [vmem:[%s11797_s10 + $0x15b8] sm:$0xff]  ;;  %v10339_v51 = vcombine.low %v1833_v0, %v1837_v42  ;;  %v1889_v42 = vld [vmem:[%s11797_s10 + $0x1710] sm:$0xff] }
 0x52a   : > { %8243 = vmatprep.subr.bf16.mxu0 %v10292_v53  ;;  %8571 = vmatprep.subr.bf16.mxu1 %v10294_v54  ;;  %v10341_v53 = vcombine.low %v1834_v43, %v1838_v44  ;;  %v10348_v54 = vcombine.high %v1841_v48, %v1845_v34  ;;  %v10350_v57 = vcombine.high %v1842_v49, %v1846_v50  ;;  %v1893_v43 = vld [vmem:[%s11797_s10 + $0x1730] sm:$0xff]  ;;  %v1890_v44 = vld [vmem:[%s11797_s10 + $0x1718] sm:$0xff] }
 0x52d   : > { %8244 = vmatpush1.bf16.msra.mxu0 %v10291_v3  ;;  %8572 = vmatpush1.bf16.msra.mxu1 %v10293_v4  ;;  %v1854_v3 = vld [vmem:[%s11797_s10 + $0x15f8] sm:$0xff]  ;;  %v10347_v4 = vcombine.low %v1841_v48, %v1845_v34  ;;  %v1897_v34 = vld [vmem:[%s11797_s10 + $0x1750] sm:$0xff] }
 0x52e   : > { %8254 = vmatprep.subr.bf16.mxu0 %v10300_v36  ;;  %8582 = vmatprep.subr.bf16.mxu1 %v10302_v1  ;;  %v10349_v36 = vcombine.low %v1842_v49, %v1846_v50  ;;  %v10356_v1 = vcombine.high %v1849_v58, %v1853_v61  ;;  %v10358_v12 = vcombine.high %v1850_v2, %v1854_v3  ;;  %v1901_v49 = vld [vmem:[%s11797_s10 + $0x1770] sm:$0xff]  ;;  %v1898_v50 = vld [vmem:[%s11797_s10 + $0x1758] sm:$0xff] }
 0x530   : > { %8246 = vmatmul.mubr.bf16.vlgmr.msra.gmra.mrb[4].mxu0 %v12248_v56  ;;  %8574 = vmatmul.mubr.bf16.vlgmr.msra.gmra.mrb[4].mxu1 %v12248_v56  ;;  %v10315_v56 = vcombine.low %v1809_v13, %v1813_v10  ;;  %v1865_v10 = vld [vmem:[%s11797_s10 + $0x1650] sm:$0xff] }
 0x531   : > { %8255 = vmatpush1.bf16.msra.mxu0 %v10299_v16  ;;  %8583 = vmatpush1.bf16.msra.mxu1 %v10301_v17  ;;  %v1862_v16 = vld [vmem:[%s11797_s10 + $0x1638] sm:$0xff]  ;;  %v10355_v17 = vcombine.low %v1849_v58, %v1853_v61  ;;  %v1905_v61 = vld [vmem:[%s11797_s10 + $0x1790] sm:$0xff] }
 0x532   : > { %8256 = vmatprep.subr.bf16.mxu0 %v10308_v9  ;;  %8584 = vmatprep.subr.bf16.mxu1 %v10310_v8  ;;  %v10357_v9 = vcombine.low %v1850_v2, %v1854_v3  ;;  %v10364_v8 = vcombine.high %v1857_v14, %v1861_v15  ;;  %v10366_v13 = vcombine.high %v1858_v5, %v1862_v16  ;;  %v1909_v2 = vld [vmem:[%s11797_s10 + $0x17b0] sm:$0xff]  ;;  %v1906_v3 = vld [vmem:[%s11797_s10 + $0x1798] sm:$0xff] }
 0x533   : > { %8286 = vmatprep.mubr.bf16.mxu0 %v12258_v38  ;;  %8614 = vmatprep.mubr.bf16.mxu1 %v12258_v38  ;;  %v10325_v38 = vcombine.low %v1818_v32, %v1822_v33  ;;  %v1877_v32 = vld [vmem:[%s11797_s10 + $0x16b0] sm:$0xff]  ;;  %v1874_v33 = vld [vmem:[%s11797_s10 + $0x1698] sm:$0xff] }
 0x535   : > { %8257 = vmatpush1.bf16.msra.mxu0 %v10307_v21  ;;  %8585 = vmatpush1.bf16.msra.mxu1 %v10309_v22  ;;  %v1870_v21 = vld [vmem:[%s11797_s10 + $0x1678] sm:$0xff]  ;;  %v10363_v22 = vcombine.low %v1857_v14, %v1861_v15  ;;  %v1913_v15 = vld [vmem:[%s11797_s10 + $0x17d0] sm:$0xff] }
 0x536   : > { %8258 = vmatprep.subr.bf16.mxu0 %v10316_v23  ;;  %8586 = vmatprep.subr.bf16.mxu1 %v10318_v27  ;;  %v10365_v23 = vcombine.low %v1858_v5, %v1862_v16  ;;  %v10372_v27 = vcombine.high %v1865_v10, %v1869_v18  ;;  %v10374_v28 = vcombine.high %v1866_v20, %v1870_v21  ;;  %v1917_v5 = vld [vmem:[%s11797_s10 + $0x17f0] sm:$0xff]  ;;  %v1914_v16 = vld [vmem:[%s11797_s10 + $0x17d8] sm:$0xff] }
 0x539   : > { %8259 = vmatpush1.bf16.msra.mxu0 %v10315_v56  ;;  %8587 = vmatpush1.bf16.msra.mxu1 %v10317_v35  ;;  %v1878_v56 = vld [vmem:[%s11797_s10 + $0x16b8] sm:$0xff]  ;;  %v10371_v35 = vcombine.low %v1865_v10, %v1869_v18  ;;  %v1921_v18 = vld [vmem:[%s11797_s10 + $0x1810] sm:$0xff] }
 0x53a   : > { %8260 = vmatprep.subr.bf16.mxu0 %v10324_v6  ;;  %8588 = vmatprep.subr.bf16.mxu1 %v10326_v37  ;;  %v10373_v6 = vcombine.low %v1866_v20, %v1870_v21  ;;  %v10380_v37 = vcombine.high %v1873_v31, %v1877_v32  ;;  %v10382_v19 = vcombine.high %v1874_v33, %v1878_v56  ;;  %v1925_v20 = vld [vmem:[%s11797_s10 + $0x1830] sm:$0xff]  ;;  %v1922_v21 = vld [vmem:[%s11797_s10 + $0x1818] sm:$0xff] }
 0x53d   : > { %8261 = vmatpush1.bf16.msra.mxu0 %v10323_v52  ;;  %8589 = vmatpush1.bf16.msra.mxu1 %v10325_v38  ;;  %v1886_v52 = vld [vmem:[%s11797_s10 + $0x16f8] sm:$0xff]  ;;  %v10379_v38 = vcombine.low %v1873_v31, %v1877_v32  ;;  %v1929_v32 = vld [vmem:[%s11797_s10 + $0x1850] sm:$0xff] }
 0x53e   : > { %8262 = vmatprep.subr.bf16.mxu0 %v10332_v30  ;;  %8590 = vmatprep.subr.bf16.mxu1 %v10334_v41  ;;  %v10381_v30 = vcombine.low %v1874_v33, %v1878_v56  ;;  %v10388_v41 = vcombine.high %v1881_v24, %v1885_v25  ;;  %v10390_v0 = vcombine.high %v1882_v39, %v1886_v52  ;;  %v1933_v33 = vld [vmem:[%s11797_s10 + $0x1870] sm:$0xff]  ;;  %v1930_v56 = vld [vmem:[%s11797_s10 + $0x1858] sm:$0xff] }
 0x541   : > { %8263 = vmatpush1.bf16.msra.mxu0 %v10331_v45  ;;  %8591 = vmatpush1.bf16.msra.mxu1 %v10333_v46  ;;  %v1894_v45 = vld [vmem:[%s11797_s10 + $0x1738] sm:$0xff]  ;;  %v10387_v46 = vcombine.low %v1881_v24, %v1885_v25  ;;  %v1937_v25 = vld [vmem:[%s11797_s10 + $0x1890] sm:$0xff] }
 0x542   : > { %8264 = vmatprep.subr.bf16.mxu0 %v10340_v47  ;;  %8592 = vmatprep.subr.bf16.mxu1 %v10342_v63  ;;  %v10389_v47 = vcombine.low %v1882_v39, %v1886_v52  ;;  %v10396_v63 = vcombine.high %v1889_v42, %v1893_v43  ;;  %v10398_v48 = vcombine.high %v1890_v44, %v1894_v45  ;;  %v1941_v39 = vld [vmem:[%s11797_s10 + $0x18b0] sm:$0xff]  ;;  %v1938_v52 = vld [vmem:[%s11797_s10 + $0x1898] sm:$0xff] }
 0x545   : > { %8265 = vmatpush1.bf16.msra.mxu0 %v10339_v51  ;;  %8593 = vmatpush1.bf16.msra.mxu1 %v10341_v53  ;;  %v1902_v51 = vld [vmem:[%s11797_s10 + $0x1778] sm:$0xff]  ;;  %v10395_v53 = vcombine.low %v1889_v42, %v1893_v43  ;;  %v1945_v43 = vld [vmem:[%s11797_s10 + $0x18d0] sm:$0xff] }
 0x546   : > { %8266 = vmatprep.subr.bf16.mxu0 %v10348_v54  ;;  %8594 = vmatprep.subr.bf16.mxu1 %v10350_v57  ;;  %v10397_v54 = vcombine.low %v1890_v44, %v1894_v45  ;;  %v10404_v57 = vcombine.high %v1897_v34, %v1901_v49  ;;  %v10406_v58 = vcombine.high %v1898_v50, %v1902_v51  ;;  %v1949_v44 = vld [vmem:[%s11797_s10 + $0x18f0] sm:$0xff]  ;;  %v1946_v45 = vld [vmem:[%s11797_s10 + $0x18d8] sm:$0xff] }
 0x549   : > { %8267 = vmatpush1.bf16.msra.mxu0 %v10347_v4  ;;  %8595 = vmatpush1.bf16.msra.mxu1 %v10349_v36  ;;  %v1910_v4 = vld [vmem:[%s11797_s10 + $0x17b8] sm:$0xff]  ;;  %v10403_v36 = vcombine.low %v1897_v34, %v1901_v49  ;;  %v1953_v34 = vld [vmem:[%s11797_s10 + $0x1910] sm:$0xff] }
 0x54a   : > { %8268 = vmatprep.subr.bf16.mxu0 %v10356_v1  ;;  %8596 = vmatprep.subr.bf16.mxu1 %v10358_v12  ;;  %v10405_v1 = vcombine.low %v1898_v50, %v1902_v51  ;;  %v10412_v12 = vcombine.high %v1905_v61, %v1909_v2  ;;  %v10414_v14 = vcombine.high %v1906_v3, %v1910_v4  ;;  %v1957_v49 = vld [vmem:[%s11797_s10 + $0x1930] sm:$0xff]  ;;  %v1954_v50 = vld [vmem:[%s11797_s10 + $0x1918] sm:$0xff] }
 0x54b   : > { %v1958_v51 = vld [vmem:[%s11797_s10 + $0x1938] sm:$0xff] }
 0x54d   : > { %8269 = vmatpush1.bf16.msra.mxu0 %v10355_v17  ;;  %8597 = vmatpush1.bf16.msra.mxu1 %v10357_v9  ;;  %v1918_v17 = vld [vmem:[%s11797_s10 + $0x17f8] sm:$0xff]  ;;  %v10411_v9 = vcombine.low %v1905_v61, %v1909_v2  ;;  %v1965_v61 = vld [vmem:[%s11797_s10 + $0x1970] sm:$0xff] }
 0x54e   : > { %8270 = vmatprep.subr.bf16.mxu0 %v10364_v8  ;;  %8598 = vmatprep.subr.bf16.mxu1 %v10366_v13  ;;  %v10413_v8 = vcombine.low %v1906_v3, %v1910_v4  ;;  %v10420_v13 = vcombine.high %v1913_v15, %v1917_v5  ;;  %v10422_v10 = vcombine.high %v1914_v16, %v1918_v17  ;;  %v1962_v2 = vld [vmem:[%s11797_s10 + $0x1958] sm:$0xff] }
 0x54f   : > { %v1966_v3 = vld [vmem:[%s11797_s10 + $0x1978] sm:$0xff]  ;;  %v10459_v4 = vcombine.low %v1953_v34, %v1957_v49 }
 0x551   : > { %8271 = vmatpush1.bf16.msra.mxu0 %v10363_v22  ;;  %8599 = vmatpush1.bf16.msra.mxu1 %v10365_v23  ;;  %v1926_v22 = vld [vmem:[%s11797_s10 + $0x1838] sm:$0xff]  ;;  %v10419_v23 = vcombine.low %v1913_v15, %v1917_v5  ;;  %v1973_v15 = vld [vmem:[%s11797_s10 + $0x19b0] sm:$0xff] }
 0x552   : > { %8272 = vmatprep.subr.bf16.mxu0 %v10372_v27  ;;  %8600 = vmatprep.subr.bf16.mxu1 %v10374_v28  ;;  %v10421_v27 = vcombine.low %v1914_v16, %v1918_v17  ;;  %v10428_v28 = vcombine.high %v1921_v18, %v1925_v20  ;;  %v10430_v31 = vcombine.high %v1922_v21, %v1926_v22  ;;  %v1970_v5 = vld [vmem:[%s11797_s10 + $0x1998] sm:$0xff] }
 0x553   : > { %v1974_v16 = vld [vmem:[%s11797_s10 + $0x19b8] sm:$0xff] }
 0x555   : > { %8273 = vmatpush1.bf16.msra.mxu0 %v10371_v35  ;;  %8601 = vmatpush1.bf16.msra.mxu1 %v10373_v6  ;;  %v1934_v35 = vld [vmem:[%s11797_s10 + $0x1878] sm:$0xff]  ;;  %v10427_v6 = vcombine.low %v1921_v18, %v1925_v20  ;;  %v1981_v18 = vld [vmem:[%s11797_s10 + $0x19f0] sm:$0xff] }
 0x556   : > { %8274 = vmatprep.subr.bf16.mxu0 %v10380_v37  ;;  %8602 = vmatprep.subr.bf16.mxu1 %v10382_v19  ;;  %v10429_v37 = vcombine.low %v1922_v21, %v1926_v22  ;;  %v10436_v19 = vcombine.high %v1929_v32, %v1933_v33  ;;  %v10438_v24 = vcombine.high %v1930_v56, %v1934_v35  ;;  %v1978_v20 = vld [vmem:[%s11797_s10 + $0x19d8] sm:$0xff] }
 0x557   : > { %v1982_v21 = vld [vmem:[%s11797_s10 + $0x19f8] sm:$0xff] }
 0x559   : > { %8275 = vmatpush1.bf16.msra.mxu0 %v10379_v38  ;;  %8603 = vmatpush1.bf16.msra.mxu1 %v10381_v30  ;;  %v1942_v38 = vld [vmem:[%s11797_s10 + $0x18b8] sm:$0xff]  ;;  %v10435_v30 = vcombine.low %v1929_v32, %v1933_v33  ;;  %v1989_v32 = vld [vmem:[%s11797_s10 + $0x1a30] sm:$0xff] }
 0x55a   : > { %8276 = vmatprep.subr.bf16.mxu0 %v10388_v41  ;;  %8604 = vmatprep.subr.bf16.mxu1 %v10390_v0  ;;  %v10437_v41 = vcombine.low %v1930_v56, %v1934_v35  ;;  %v10444_v0 = vcombine.high %v1937_v25, %v1941_v39  ;;  %v10446_v42 = vcombine.high %v1938_v52, %v1942_v38  ;;  %v1986_v33 = vld [vmem:[%s11797_s10 + $0x1a18] sm:$0xff] }
 0x55b   : > { %v1990_v56 = vld [vmem:[%s11797_s10 + $0x1a38] sm:$0xff] }
 0x55d   : > { %8277 = vmatpush1.bf16.msra.mxu0 %v10387_v46  ;;  %8605 = vmatpush1.bf16.msra.mxu1 %v10389_v47  ;;  %v1950_v46 = vld [vmem:[%s11797_s10 + $0x18f8] sm:$0xff]  ;;  %v10445_v47 = vcombine.low %v1938_v52, %v1942_v38 }
 0x55e   : > { %8278 = vmatprep.subr.bf16.mxu0 %v10396_v63  ;;  %8606 = vmatprep.subr.bf16.mxu1 %v10398_v48  ;;  %v10452_v63 = vcombine.high %v1945_v43, %v1949_v44  ;;  %v10454_v48 = vcombine.high %v1946_v45, %v1950_v46  ;;  %v1998_v52 = vld [vmem:[%s11797_s10 + $0x1a78] sm:$0xff] }
 0x561   : > { %8279 = vmatpush1.bf16.msra.mxu0 %v10395_v53  ;;  %8607 = vmatpush1.bf16.msra.mxu1 %v10397_v54  ;;  %v10451_v53 = vcombine.low %v1945_v43, %v1949_v44  ;;  %v10460_v54 = vcombine.high %v1953_v34, %v1957_v49  ;;  %v2005_v43 = vld [vmem:[%s11797_s10 + $0x1ab0] sm:$0xff]  ;;  %v2002_v44 = vld [vmem:[%s11797_s10 + $0x1a98] sm:$0xff] }
 0x562   : > { %8280 = vmatprep.subr.bf16.mxu0 %v10404_v57  ;;  %8608 = vmatprep.subr.bf16.mxu1 %v10406_v58  ;;  %v10462_v57 = vcombine.high %v1954_v50, %v1958_v51  ;;  %v1961_v58 = vld [vmem:[%s11797_s10 + $0x1950] sm:$0xff]  ;;  %v2010_v49 = vld [vmem:[%s11797_s10 + $0x1ad8] sm:$0xff] }
 0x563   : > { %v10467_v17 = vcombine.low %v1961_v58, %v1965_v61  ;;  %v2013_v34 = vld [vmem:[%s11797_s10 + $0x1af0] sm:$0xff] }
 0x565   : > { %8281 = vmatpush1.bf16.msra.mxu0 %v10403_v36  ;;  %8609 = vmatpush1.bf16.msra.mxu1 %v10405_v1  ;;  %v10461_v36 = vcombine.low %v1954_v50, %v1958_v51  ;;  %v10468_v1 = vcombine.high %v1961_v58, %v1965_v61  ;;  %v2014_v50 = vld [vmem:[%s11797_s10 + $0x1af8] sm:$0xff]  ;;  %v2021_v58 = vld [vmem:[%s11797_s10 + $0x1b30] sm:$0xff] }
 0x566   : > { %8282 = vmatprep.subr.bf16.mxu0 %v10412_v12  ;;  %8610 = vmatprep.subr.bf16.mxu1 %v10414_v14  ;;  %v10470_v12 = vcombine.high %v1962_v2, %v1966_v3  ;;  %v1969_v14 = vld [vmem:[%s11797_s10 + $0x1990] sm:$0xff]  ;;  %v2018_v61 = vld [vmem:[%s11797_s10 + $0x1b18] sm:$0xff] }
 0x567   : > { %v10475_v22 = vcombine.low %v1969_v14, %v1973_v15 }
 0x569   : > { %8283 = vmatpush1.bf16.msra.mxu0 %v10411_v9  ;;  %8611 = vmatpush1.bf16.msra.mxu1 %v10413_v8  ;;  %v10469_v9 = vcombine.low %v1962_v2, %v1966_v3  ;;  %v10476_v8 = vcombine.high %v1969_v14, %v1973_v15  ;;  %v2022_v2 = vld [vmem:[%s11797_s10 + $0x1b38] sm:$0xff]  ;;  %v2029_v14 = vld [vmem:[%s11797_s10 + $0x1b70] sm:$0xff] }
 0x56a   : > { %8284 = vmatprep.subr.bf16.mxu0 %v10420_v13  ;;  %8612 = vmatprep.subr.bf16.mxu1 %v10422_v10  ;;  %v10478_v13 = vcombine.high %v1970_v5, %v1974_v16  ;;  %v1977_v10 = vld [vmem:[%s11797_s10 + $0x19d0] sm:$0xff]  ;;  %v2026_v15 = vld [vmem:[%s11797_s10 + $0x1b58] sm:$0xff] }
 0x56b   : > { %v10483_v35 = vcombine.low %v1977_v10, %v1981_v18 }
 0x56d   : > { %8285 = vmatpush1.bf16.msra.mxu0 %v10419_v23  ;;  %8613 = vmatpush1.bf16.msra.mxu1 %v10421_v27  ;;  %v10477_v23 = vcombine.low %v1970_v5, %v1974_v16  ;;  %v10484_v27 = vcombine.high %v1977_v10, %v1981_v18  ;;  %v2030_v5 = vld [vmem:[%s11797_s10 + $0x1b78] sm:$0xff]  ;;  %v2037_v10 = vld [vmem:[%s11797_s10 + $0x1bb0] sm:$0xff] }
 0x56e   : > { %8295 = vmatprep.subr.bf16.mxu0 %v10428_v28  ;;  %8623 = vmatprep.subr.bf16.mxu1 %v10430_v31  ;;  %v10486_v28 = vcombine.high %v1978_v20, %v1982_v21  ;;  %v1985_v31 = vld [vmem:[%s11797_s10 + $0x1a10] sm:$0xff]  ;;  %v2034_v18 = vld [vmem:[%s11797_s10 + $0x1b98] sm:$0xff] }
 0x56f   : > { %v10491_v38 = vcombine.low %v1985_v31, %v1989_v32 }
 0x570   : > { %8287 = vmatmul.mubr.bf16.vlgmr.msra.gmra.mrb[4].mxu0 %v12326_v26  ;;  %8615 = vmatmul.mubr.bf16.vlgmr.msra.gmra.mrb[4].mxu1 %v12326_v26  ;;  %v10443_v26 = vcombine.low %v1937_v25, %v1941_v39  ;;  %v1997_v25 = vld [vmem:[%s11797_s10 + $0x1a70] sm:$0xff]  ;;  %v1994_v39 = vld [vmem:[%s11797_s10 + $0x1a58] sm:$0xff] }
 0x571   : > { %8296 = vmatpush1.bf16.msra.mxu0 %v10427_v6  ;;  %8624 = vmatpush1.bf16.msra.mxu1 %v10429_v37  ;;  %v10485_v6 = vcombine.low %v1978_v20, %v1982_v21  ;;  %v10492_v37 = vcombine.high %v1985_v31, %v1989_v32  ;;  %v2038_v20 = vld [vmem:[%s11797_s10 + $0x1bb8] sm:$0xff]  ;;  %v2045_v31 = vld [vmem:[%s11797_s10 + $0x1bf0] sm:$0xff] }
 0x572   : > { %8297 = vmatprep.subr.bf16.mxu0 %v10436_v19  ;;  %8625 = vmatprep.subr.bf16.mxu1 %v10438_v24  ;;  %v10494_v19 = vcombine.high %v1986_v33, %v1990_v56  ;;  %v1993_v24 = vld [vmem:[%s11797_s10 + $0x1a50] sm:$0xff]  ;;  %v2042_v32 = vld [vmem:[%s11797_s10 + $0x1bd8] sm:$0xff] }
 0x573   : > { %8327 = vmatprep.mubr.bf16.mxu0 %v12336_v59  ;;  %8655 = vmatprep.mubr.bf16.mxu1 %v12336_v59  ;;  %v10453_v59 = vcombine.low %v1946_v45, %v1950_v46  ;;  %v2006_v45 = vld [vmem:[%s11797_s10 + $0x1ab8] sm:$0xff]  ;;  %v10499_v46 = vcombine.low %v1993_v24, %v1997_v25 }
 0x575   : > { %8298 = vmatpush1.bf16.msra.mxu0 %v10435_v30  ;;  %8626 = vmatpush1.bf16.msra.mxu1 %v10437_v41  ;;  %v10493_v30 = vcombine.low %v1986_v33, %v1990_v56  ;;  %v10500_v41 = vcombine.high %v1993_v24, %v1997_v25  ;;  %v2046_v33 = vld [vmem:[%s11797_s10 + $0x1bf8] sm:$0xff]  ;;  %v2053_v24 = vld [vmem:[%s11797_s10 + $0x1c30] sm:$0xff] }
 0x576   : > { %8299 = vmatprep.subr.bf16.mxu0 %v10444_v0  ;;  %8627 = vmatprep.subr.bf16.mxu1 %v10446_v42  ;;  %v10502_v0 = vcombine.high %v1994_v39, %v1998_v52  ;;  %v2001_v42 = vld [vmem:[%s11797_s10 + $0x1a90] sm:$0xff]  ;;  %v2050_v25 = vld [vmem:[%s11797_s10 + $0x1c18] sm:$0xff] }
 0x577   : > { %v10507_v51 = vcombine.low %v2001_v42, %v2005_v43 }
 0x579   : > { %8300 = vmatpush1.bf16.msra.mxu0 %v10443_v26  ;;  %8628 = vmatpush1.bf16.msra.mxu1 %v10445_v47  ;;  %v10501_v26 = vcombine.low %v1994_v39, %v1998_v52  ;;  %v10508_v47 = vcombine.high %v2001_v42, %v2005_v43  ;;  %v2054_v39 = vld [vmem:[%s11797_s10 + $0x1c38] sm:$0xff]  ;;  %v2061_v42 = vld [vmem:[%s11797_s10 + $0x1c70] sm:$0xff] }
 0x57a   : > { %8301 = vmatprep.subr.bf16.mxu0 %v10452_v63  ;;  %8629 = vmatprep.subr.bf16.mxu1 %v10454_v48  ;;  %v10510_v63 = vcombine.high %v2002_v44, %v2006_v45  ;;  %v2009_v48 = vld [vmem:[%s11797_s10 + $0x1ad0] sm:$0xff]  ;;  %v2058_v43 = vld [vmem:[%s11797_s10 + $0x1c58] sm:$0xff] }
 0x57b   : > { %v10515_v3 = vcombine.low %v2009_v48, %v2013_v34 }
 0x57d   : > { %8302 = vmatpush1.bf16.msra.mxu0 %v10451_v53  ;;  %8630 = vmatpush1.bf16.msra.mxu1 %v10453_v59  ;;  %v10509_v53 = vcombine.low %v2002_v44, %v2006_v45  ;;  %v10516_v59 = vcombine.high %v2009_v48, %v2013_v34  ;;  %v2062_v44 = vld [vmem:[%s11797_s10 + $0x1c78] sm:$0xff]  ;;  %v2069_v48 = vld [vmem:[%s11797_s10 + $0x1cb0] sm:$0xff] }
 0x57e   : > { %8303 = vmatprep.subr.bf16.mxu0 %v10460_v54  ;;  %8631 = vmatprep.subr.bf16.mxu1 %v10462_v57  ;;  %v10518_v54 = vcombine.high %v2010_v49, %v2014_v50  ;;  %v2017_v57 = vld [vmem:[%s11797_s10 + $0x1b10] sm:$0xff]  ;;  %v2066_v34 = vld [vmem:[%s11797_s10 + $0x1c98] sm:$0xff] }
 0x57f   : > { %v10523_v16 = vcombine.low %v2017_v57, %v2021_v58 }
 0x581   : > { %8304 = vmatpush1.bf16.msra.mxu0 %v10459_v4  ;;  %8632 = vmatpush1.bf16.msra.mxu1 %v10461_v36  ;;  %v10517_v4 = vcombine.low %v2010_v49, %v2014_v50  ;;  %v10524_v36 = vcombine.high %v2017_v57, %v2021_v58  ;;  %v2070_v49 = vld [vmem:[%s11797_s10 + $0x1cb8] sm:$0xff]  ;;  %v2077_v57 = vld [vmem:[%s11797_s10 + $0x1cf0] sm:$0xff] }
 0x582   : > { %8305 = vmatprep.subr.bf16.mxu0 %v10468_v1  ;;  %8633 = vmatprep.subr.bf16.mxu1 %v10470_v12  ;;  %v10526_v1 = vcombine.high %v2018_v61, %v2022_v2  ;;  %v2025_v12 = vld [vmem:[%s11797_s10 + $0x1b50] sm:$0xff]  ;;  %v2074_v58 = vld [vmem:[%s11797_s10 + $0x1cd8] sm:$0xff] }
 0x583   : > { %v10531_v21 = vcombine.low %v2025_v12, %v2029_v14 }
 0x585   : > { %8306 = vmatpush1.bf16.msra.mxu0 %v10467_v17  ;;  %8634 = vmatpush1.bf16.msra.mxu1 %v10469_v9  ;;  %v10525_v17 = vcombine.low %v2018_v61, %v2022_v2  ;;  %v10532_v9 = vcombine.high %v2025_v12, %v2029_v14  ;;  %v2078_v61 = vld [vmem:[%s11797_s10 + $0x1cf8] sm:$0xff]  ;;  %v10573_v2 = vcombine.low %v2066_v34, %v2070_v49 }
 0x586   : > { %8307 = vmatprep.subr.bf16.mxu0 %v10476_v8  ;;  %8635 = vmatprep.subr.bf16.mxu1 %v10478_v13  ;;  %v10534_v8 = vcombine.high %v2026_v15, %v2030_v5  ;;  %v2033_v13 = vld [vmem:[%s11797_s10 + $0x1b90] sm:$0xff]  ;;  %v2082_v12 = vld [vmem:[%s11797_s10 + $0x1d18] sm:$0xff] }
 0x587   : > { %v10539_v56 = vcombine.low %v2033_v13, %v2037_v10  ;;  %v2086_v14 = vld [vmem:[%s11797_s10 + $0x1d38] sm:$0xff] }
 0x589   : > { %8308 = vmatpush1.bf16.msra.mxu0 %v10475_v22  ;;  %8636 = vmatpush1.bf16.msra.mxu1 %v10477_v23  ;;  %v10533_v22 = vcombine.low %v2026_v15, %v2030_v5  ;;  %v10540_v23 = vcombine.high %v2033_v13, %v2037_v10  ;;  %v2094_v13 = vld [vmem:[%s11797_s10 + $0x1d78] sm:$0xff] }
 0x58a   : > { %8309 = vmatprep.subr.bf16.mxu0 %v10484_v27  ;;  %8637 = vmatprep.subr.bf16.mxu1 %v10486_v28  ;;  %v10542_v27 = vcombine.high %v2034_v18, %v2038_v20  ;;  %v2041_v28 = vld [vmem:[%s11797_s10 + $0x1bd0] sm:$0xff] }
 0x58b   : > { %v10547_v52 = vcombine.low %v2041_v28, %v2045_v31 }
 0x58d   : > { %8310 = vmatpush1.bf16.msra.mxu0 %v10483_v35  ;;  %8638 = vmatpush1.bf16.msra.mxu1 %v10485_v6  ;;  %v10541_v35 = vcombine.low %v2034_v18, %v2038_v20  ;;  %v10548_v6 = vcombine.high %v2041_v28, %v2045_v31  ;;  %v10589_v18 = vcombine.low %v2082_v12, %v2086_v14  ;;  %v2102_v28 = vld [vmem:[%s11797_s10 + $0x1db8] sm:$0xff] }
 0x58e   : > { %8311 = vmatprep.subr.bf16.mxu0 %v10492_v37  ;;  %8639 = vmatprep.subr.bf16.mxu1 %v10494_v19  ;;  %v10550_v37 = vcombine.high %v2042_v32, %v2046_v33  ;;  %v2049_v19 = vld [vmem:[%s11797_s10 + $0x1c10] sm:$0xff] }
 0x58f   : > { %v10555_v45 = vcombine.low %v2049_v19, %v2053_v24 }
 0x591   : > { %8312 = vmatpush1.bf16.msra.mxu0 %v10491_v38  ;;  %8640 = vmatpush1.bf16.msra.mxu1 %v10493_v30  ;;  %v10549_v38 = vcombine.low %v2042_v32, %v2046_v33  ;;  %v10556_v30 = vcombine.high %v2049_v19, %v2053_v24  ;;  %v2110_v19 = vld [vmem:[%s11797_s10 + $0x1df8] sm:$0xff] }
 0x592   : > { %8313 = vmatprep.subr.bf16.mxu0 %v10500_v41  ;;  %8641 = vmatprep.subr.bf16.mxu1 %v10502_v0  ;;  %v10558_v41 = vcombine.high %v2050_v25, %v2054_v39  ;;  %v2057_v0 = vld [vmem:[%s11797_s10 + $0x1c50] sm:$0xff] }
 0x593   : > { %v10563_v50 = vcombine.low %v2057_v0, %v2061_v42 }
 0x595   : > { %8314 = vmatpush1.bf16.msra.mxu0 %v10499_v46  ;;  %8642 = vmatpush1.bf16.msra.mxu1 %v10501_v26  ;;  %v10557_v46 = vcombine.low %v2050_v25, %v2054_v39  ;;  %v10564_v26 = vcombine.high %v2057_v0, %v2061_v42  ;;  %v2118_v0 = vld [vmem:[%s11797_s10 + $0x1e38] sm:$0xff] }
 0x596   : > { %8315 = vmatprep.subr.bf16.mxu0 %v10508_v47  ;;  %8643 = vmatprep.subr.bf16.mxu1 %v10510_v63  ;;  %v10566_v47 = vcombine.high %v2058_v43, %v2062_v44  ;;  %v2065_v63 = vld [vmem:[%s11797_s10 + $0x1c90] sm:$0xff] }
 0x599   : > { %8316 = vmatpush1.bf16.msra.mxu0 %v10507_v51  ;;  %8644 = vmatpush1.bf16.msra.mxu1 %v10509_v53  ;;  %v10565_v51 = vcombine.low %v2058_v43, %v2062_v44  ;;  %v10572_v53 = vcombine.high %v2065_v63, %v2069_v48 }
 0x59a   : > { %8317 = vmatprep.subr.bf16.mxu0 %v10516_v59  ;;  %8645 = vmatprep.subr.bf16.mxu1 %v10518_v54  ;;  %v10574_v59 = vcombine.high %v2066_v34, %v2070_v49  ;;  %v2073_v54 = vld [vmem:[%s11797_s10 + $0x1cd0] sm:$0xff] }
 0x59b   : > { %v10579_v15 = vcombine.low %v2073_v54, %v2077_v57 }
 0x59d   : > { %8318 = vmatpush1.bf16.msra.mxu0 %v10515_v3  ;;  %8646 = vmatpush1.bf16.msra.mxu1 %v10517_v4  ;;  %v10580_v3 = vcombine.high %v2073_v54, %v2077_v57  ;;  %v10582_v4 = vcombine.high %v2074_v58, %v2078_v61  ;;  %v2134_v54 = vld [vmem:[%s11797_s10 + $0x1eb8] sm:$0xff] }
 0x59e   : > { %8319 = vmatprep.subr.bf16.mxu0 %v10524_v36  ;;  %8647 = vmatprep.subr.bf16.mxu1 %v10526_v1  ;;  %v2081_v36 = vld [vmem:[%s11797_s10 + $0x1d10] sm:$0xff] }
 0x59f   : > { %v2085_v1 = vld [vmem:[%s11797_s10 + $0x1d30] sm:$0xff] }
 0x5a0   : > { %v10588_v5 = vcombine.high %v2081_v36, %v2085_v1  ;;  %v10587_v10 = vcombine.low %v2081_v36, %v2085_v1  ;;  %v2142_v36 = vld [vmem:[%s11797_s10 + $0x1ef8] sm:$0xff] }
 0x5a1   : > { %8320 = vmatpush1.bf16.msra.mxu0 %v10523_v16  ;;  %8648 = vmatpush1.bf16.msra.mxu1 %v10525_v17  ;;  %v10590_v16 = vcombine.high %v2082_v12, %v2086_v14  ;;  %v2089_v17 = vld [vmem:[%s11797_s10 + $0x1d50] sm:$0xff] }
 0x5a2   : > { %8321 = vmatprep.subr.bf16.mxu0 %v10532_v9  ;;  %8649 = vmatprep.subr.bf16.mxu1 %v10534_v8  ;;  %v2093_v9 = vld [vmem:[%s11797_s10 + $0x1d70] sm:$0xff]  ;;  %v2090_v8 = vld [vmem:[%s11797_s10 + $0x1d58] sm:$0xff] }
 0x5a3   : > { %v10596_v20 = vcombine.high %v2089_v17, %v2093_v9  ;;  %v10595_v31 = vcombine.low %v2089_v17, %v2093_v9  ;;  %v10597_v32 = vcombine.low %v2090_v8, %v2094_v13  ;;  %v2146_v17 = vld [vmem:[%s11797_s10 + $0x1f18] sm:$0xff] }
 0x5a4   : > { %v2150_v9 = vld [vmem:[%s11797_s10 + $0x1f38] sm:$0xff] }
 0x5a5   : > { %8322 = vmatpush1.bf16.msra.mxu0 %v10531_v21  ;;  %8650 = vmatpush1.bf16.msra.mxu1 %v10533_v22  ;;  %v10598_v21 = vcombine.high %v2090_v8, %v2094_v13  ;;  %v2097_v22 = vld [vmem:[%s11797_s10 + $0x1d90] sm:$0xff] }
 0x5a6   : > { %8323 = vmatprep.subr.bf16.mxu0 %v10540_v23  ;;  %8651 = vmatprep.subr.bf16.mxu1 %v10542_v27  ;;  %v2101_v23 = vld [vmem:[%s11797_s10 + $0x1db0] sm:$0xff]  ;;  %v2098_v27 = vld [vmem:[%s11797_s10 + $0x1d98] sm:$0xff] }
 0x5a7   : > { %v10604_v33 = vcombine.high %v2097_v22, %v2101_v23  ;;  %v10603_v24 = vcombine.low %v2097_v22, %v2101_v23  ;;  %v10605_v25 = vcombine.low %v2098_v27, %v2102_v28  ;;  %v2154_v23 = vld [vmem:[%s11797_s10 + $0x1f58] sm:$0xff] }
 0x5a9   : > { %8324 = vmatpush1.bf16.msra.mxu0 %v10539_v56  ;;  %8652 = vmatpush1.bf16.msra.mxu1 %v10541_v35  ;;  %v10606_v56 = vcombine.high %v2098_v27, %v2102_v28  ;;  %v2105_v35 = vld [vmem:[%s11797_s10 + $0x1dd0] sm:$0xff]  ;;  %v2158_v27 = vld [vmem:[%s11797_s10 + $0x1f78] sm:$0xff] }
 0x5aa   : > { %8325 = vmatprep.subr.bf16.mxu0 %v10548_v6  ;;  %8653 = vmatprep.subr.bf16.mxu1 %v10550_v37  ;;  %v2109_v6 = vld [vmem:[%s11797_s10 + $0x1df0] sm:$0xff]  ;;  %v2106_v37 = vld [vmem:[%s11797_s10 + $0x1dd8] sm:$0xff] }
 0x5ab   : > { %v10612_v39 = vcombine.high %v2105_v35, %v2109_v6  ;;  %v10611_v42 = vcombine.low %v2105_v35, %v2109_v6  ;;  %v10613_v43 = vcombine.low %v2106_v37, %v2110_v19  ;;  %v2165_v35 = vld [vmem:[%s11797_s10 + $0x1fb0] sm:$0xff] }
 0x5ad   : > { %8326 = vmatpush1.bf16.msra.mxu0 %v10547_v52  ;;  %8654 = vmatpush1.bf16.msra.mxu1 %v10549_v38  ;;  %v10614_v52 = vcombine.high %v2106_v37, %v2110_v19  ;;  %v2113_v38 = vld [vmem:[%s11797_s10 + $0x1e10] sm:$0xff]  ;;  %v2162_v37 = vld [vmem:[%s11797_s10 + $0x1f98] sm:$0xff] }
 0x5ae   : > { %8336 = vmatprep.subr.bf16.mxu0 %v10556_v30  ;;  %8664 = vmatprep.subr.bf16.mxu1 %v10558_v41  ;;  %v2117_v30 = vld [vmem:[%s11797_s10 + $0x1e30] sm:$0xff]  ;;  %v2114_v41 = vld [vmem:[%s11797_s10 + $0x1e18] sm:$0xff] }
 0x5af   : > { %v10620_v44 = vcombine.high %v2113_v38, %v2117_v30  ;;  %v10621_v34 = vcombine.low %v2114_v41, %v2118_v0  ;;  %v2166_v19 = vld [vmem:[%s11797_s10 + $0x1fb8] sm:$0xff] }
 0x5b0   : > { %8328 = vmatmul.mubr.bf16.vlgmr.msra.gmra.mrb[4].mxu0 %v12404_v60  ;;  %8656 = vmatmul.mubr.bf16.vlgmr.msra.gmra.mrb[4].mxu1 %v12404_v60  ;;  %v10571_v60 = vcombine.low %v2065_v63, %v2069_v48  ;;  %v2126_v63 = vld [vmem:[%s11797_s10 + $0x1e78] sm:$0xff]  ;;  %v10619_v48 = vcombine.low %v2113_v38, %v2117_v30  ;;  %v10670_v30 = vcombine.high %v2162_v37, %v2166_v19 }
 0x5b1   : > { %8337 = vmatpush1.bf16.msra.mxu0 %v10555_v45  ;;  %8665 = vmatpush1.bf16.msra.mxu1 %v10557_v46  ;;  %v10622_v45 = vcombine.high %v2114_v41, %v2118_v0  ;;  %v2121_v46 = vld [vmem:[%s11797_s10 + $0x1e50] sm:$0xff] }
 0x5b2   : > { %8338 = vmatprep.subr.bf16.mxu0 %v10564_v26  ;;  %8666 = vmatprep.subr.bf16.mxu1 %v10566_v47  ;;  %v2125_v26 = vld [vmem:[%s11797_s10 + $0x1e70] sm:$0xff]  ;;  %v2122_v47 = vld [vmem:[%s11797_s10 + $0x1e58] sm:$0xff] }
 0x5b3   : > { %8368 = vmatprep.mubr.bf16.mxu0 %v12414_v29  ;;  %8696 = vmatprep.mubr.bf16.mxu1 %v12414_v29  ;;  %v10581_v29 = vcombine.low %v2074_v58, %v2078_v61  ;;  %v10628_v49 = vcombine.high %v2121_v46, %v2125_v26  ;;  %v10627_v57 = vcombine.low %v2121_v46, %v2125_v26  ;;  %v2169_v41 = vld [vmem:[%s11797_s10 + $0x1fd0] sm:$0xff] }
 0x5b4   : > { %v10629_v58 = vcombine.low %v2122_v47, %v2126_v63  ;;  %v2173_v0 = vld [vmem:[%s11797_s10 + $0x1ff0] sm:$0xff]  ;;  %v10669_v26 = vcombine.low %v2162_v37, %v2166_v19  ;;  %v11133_v37 = vld [vmem:[%s11805_s17 + $0xf8] sm:$0xff]  }
 0x5b5   : > { %8339 = vmatpush1.bf16.msra.mxu0 %v10563_v50  ;;  %8667 = vmatpush1.bf16.msra.mxu1 %v10565_v51  ;;  %v10630_v50 = vcombine.high %v2122_v47, %v2126_v63  ;;  %v2129_v51 = vld [vmem:[%s11797_s10 + $0x1e90] sm:$0xff]  ;;  %v10676_v47 = vcombine.high %v2169_v41, %v2173_v0  ;;  %v11134_v19 = vld [vmem:[%s11805_s17 + $0x38] sm:$0xff]  }
 0x5b6   : > { %8340 = vmatprep.subr.bf16.mxu0 %v10572_v53  ;;  %8668 = vmatprep.subr.bf16.mxu1 %v10574_v59  ;;  %v2133_v53 = vld [vmem:[%s11797_s10 + $0x1eb0] sm:$0xff]  ;;  %v2130_v59 = vld [vmem:[%s11797_s10 + $0x1e98] sm:$0xff] }
 0x5b7   : > { %v10636_v61 = vcombine.high %v2129_v51, %v2133_v53  ;;  %v10635_v1 = vcombine.low %v2129_v51, %v2133_v53  ;;  %v10637_v12 = vcombine.low %v2130_v59, %v2134_v54  ;;  %v11104_v51 = vld [vmem:[%s11805_s17 + $0x40] sm:$0xff]  }
 0x5b8   : > { %v11105_v53 = vld [vmem:[%s11805_s17 + $0xc0] sm:$0xff]  }
 0x5b9   : > { %8341 = vmatpush1.bf16.msra.mxu0 %v10571_v60  ;;  %8669 = vmatpush1.bf16.msra.mxu1 %v10573_v2  ;;  %v10638_v60 = vcombine.high %v2130_v59, %v2134_v54  ;;  %v2137_v2 = vld [vmem:[%s11797_s10 + $0x1ed0] sm:$0xff] }
 0x5ba   : > { %8342 = vmatprep.subr.bf16.mxu0 %v10580_v3  ;;  %8670 = vmatprep.subr.bf16.mxu1 %v10582_v4  ;;  %v2141_v3 = vld [vmem:[%s11797_s10 + $0x1ef0] sm:$0xff]  ;;  %v2138_v4 = vld [vmem:[%s11797_s10 + $0x1ed8] sm:$0xff] }
 0x5bb   : > { %v10644_v14 = vcombine.high %v2137_v2, %v2141_v3  ;;  %v10643_v8 = vcombine.low %v2137_v2, %v2141_v3  ;;  %v10645_v13 = vcombine.low %v2138_v4, %v2142_v36  ;;  %v11110_v2 = vld [vmem:[%s11805_s17 + $0x8] sm:$0xff]  }
 0x5bc   : > { %v11111_v3 = vld [vmem:[%s11805_s17 + $0x88] sm:$0xff]  }
 0x5bd   : > { %8343 = vmatpush1.bf16.msra.mxu0 %v10579_v15  ;;  %8671 = vmatpush1.bf16.msra.mxu1 %v10581_v29  ;;  %v10646_v15 = vcombine.high %v2138_v4, %v2142_v36  ;;  %v2145_v29 = vld [vmem:[%s11797_s10 + $0x1f10] sm:$0xff]  ;;  %v11112_v4 = vld [vmem:[%s11805_s17 + $0x50] sm:$0xff]  }
 0x5be   : > { %8344 = vmatprep.subr.bf16.mxu0 %v10588_v5  ;;  %8672 = vmatprep.subr.bf16.mxu1 %v10590_v16  ;;  %v2149_v5 = vld [vmem:[%s11797_s10 + $0x1f30] sm:$0xff]  ;;  %v2177_v16 = vlaneseq  ;;  %v11113_v36 = vld [vmem:[%s11805_s17 + $0xd0] sm:$0xff]  }
 0x5bf   : > { %v10651_v28 = vcombine.low %v2145_v29, %v2149_v5 }
 0x5c0   : > { %v13020_v22 = vshrl.u32 %v2177_v16, 7  ;;  %v11121_v16 = vld [vmem:[%s11805_s17 + $0xe0] sm:$0xff]  }
 0x5c1   : > { %8345 = vmatpush1.bf16.msra.mxu0 %v10587_v10  ;;  %8673 = vmatpush1.bf16.msra.mxu1 %v10589_v18  ;;  %v10652_v10 = vcombine.high %v2145_v29, %v2149_v5  ;;  %v10654_v18 = vcombine.high %v2146_v17, %v2150_v9  ;;  %v11119_v29 = vld [vmem:[%s11805_s17 + $0x98] sm:$0xff]   ;;  %v11120_v5 = vld [vmem:[%s11805_s17 + $0x60] sm:$0xff]  }
 0x5c2   : > { %8346 = vmatprep.subr.bf16.mxu0 %v10596_v20  ;;  %8674 = vmatprep.subr.bf16.mxu1 %v10598_v21  ;;  %v2153_v20 = vld [vmem:[%s11797_s10 + $0x1f50] sm:$0xff]  ;;  %v2183_v6 = vsub.s32 1, %v13020_v22 }
 0x5c3   : > { %v2157_v21 = vld [vmem:[%s11797_s10 + $0x1f70] sm:$0xff] }
 0x5c5   : > { %8347 = vmatpush1.bf16.msra.mxu0 %v10595_v31  ;;  %8675 = vmatpush1.bf16.msra.mxu1 %v10597_v32  ;;  %v10653_v31 = vcombine.low %v2146_v17, %v2150_v9  ;;  %v10660_v32 = vcombine.high %v2153_v20, %v2157_v21  ;;  %v11122_v17 = vld [vmem:[%s11805_s17 + $0x20] sm:$0xff]   ;;  %v2179_v9 = vsub.s32 0, %v13020_v22 }
 0x5c6   : > { %8348 = vmatprep.subr.bf16.mxu0 %v10604_v33  ;;  %8676 = vmatprep.subr.bf16.mxu1 %v10606_v56  ;;  %v10662_v33 = vcombine.high %v2154_v23, %v2158_v27  ;;  %v2161_v56 = vld [vmem:[%s11797_s10 + $0x1f90] sm:$0xff] }
 0x5c7   : > { %v10668_v38 = vcombine.high %v2161_v56, %v2165_v35  ;;  %v10667_v46 = vcombine.low %v2161_v56, %v2165_v35  ;;  %v11131_v56 = vld [vmem:[%s11805_s17 + $0xb0] sm:$0xff]   ;;  %v11132_v35 = vld [vmem:[%s11805_s17 + $0x78] sm:$0xff]  }
 0x5c9   : > { %8349 = vmatpush1.bf16.msra.mxu0 %v10603_v24  ;;  %8677 = vmatpush1.bf16.msra.mxu1 %v10605_v25  ;;  %v13030_v24 = vld [vmem:[%s11803_s23] sm:$0xff]  ;;  %v2191_v25 = vsub.s32 3, %v13020_v22 }
 0x5ca   : > { %8350 = vmatprep.subr.bf16.mxu0 %v10612_v39  ;;  %8678 = vmatprep.subr.bf16.mxu1 %v10614_v52  ;;  %v10659_v39 = vcombine.low %v2153_v20, %v2157_v21  ;;  %v10661_v52 = vcombine.low %v2154_v23, %v2158_v27  ;;  %v11126_v20 = vld [vmem:[%s11805_s17 + $0x28] sm:$0xff]   ;;  %v2180_v21 = vrot.slane %v13030_v24, %v2179_v9  ;;  %v11128_v27 = vld [vmem:[%s11805_s17 + $0x70] sm:$0xff]  }
 0x5cb   : > { %v11127_v23 = vld [vmem:[%s11805_s17 + $0xa8] sm:$0xff]  }
 0x5cd   : > { %8351 = vmatpush1.bf16.msra.mxu0 %v10611_v42  ;;  %8679 = vmatpush1.bf16.msra.mxu1 %v10613_v43  ;;  %v2184_v42 = vrot.slane %v13030_v24, %v2183_v6  ;;  %v2170_v43 = vld [vmem:[%s11797_s10 + $0x1fd8] sm:$0xff] }
 0x5ce   : > { %8352 = vmatprep.subr.bf16.mxu0 %v10620_v44  ;;  %8680 = vmatprep.subr.bf16.mxu1 %v10622_v45  ;;  %v2174_v44 = vld [vmem:[%s11797_s10 + $0x1ff8] sm:$0xff]  ;;  %v2192_v45 = vrot.slane %v13030_v24, %v2191_v25 }
 0x5cf   : > { %v10678_v63 = vcombine.high %v2170_v43, %v2174_v44 }
 0x5d1   : > { %8353 = vmatpush1.bf16.msra.mxu0 %v10619_v48  ;;  %8681 = vmatpush1.bf16.msra.mxu1 %v10621_v34  ;;  %v10849_v48 = vadd.f32 %v12720_v11, %v2184_v42  ;;  %v10851_v34 = vadd.f32 %v12724_v55, %v2192_v45  ;;  %v11107_v11 = vld [vmem:[%s11805_s17 + $0x80] sm:$0xff]   ;;  %v11108_v55 = vld [vmem:[%s11805_s17 + $0x48] sm:$0xff]  }
 0x5d2   : > { %8354 = vmatprep.subr.bf16.mxu0 %v10628_v49  ;;  %8682 = vmatprep.subr.bf16.mxu1 %v10630_v50  ;;  %v10675_v49 = vcombine.low %v2169_v41, %v2173_v0  ;;  %v10677_v50 = vcombine.low %v2170_v43, %v2174_v44  ;;  %v11139_v41 = vld [vmem:[%s11805_s17 + $0x180] sm:$0xff]   ;;  %v11140_v0 = vld [vmem:[%s11805_s17 + $0x148] sm:$0xff]  }
 0x5d3   : > { %v8706_v59 = vmax.f32 %v10849_v48, 0.0  ;;  %v8708_v54 = vmax.f32 %v10851_v34, 0.0  ;;  %v11141_v43 = vld [vmem:[%s11805_s17 + $0x1c8] sm:$0xff]   ;;  %v11148_v48 = vld [vmem:[%s11805_s17 + $0x158] sm:$0xff]  }
 0x5d4   : > { %v11142_v44 = vld [vmem:[%s11805_s17 + $0x108] sm:$0xff]   ;;  %v11149_v34 = vld [vmem:[%s11805_s17 + $0x1d8] sm:$0xff]  }
 0x5d5   : > { %8355 = vmatpush1.bf16.msra.mxu0 %v10627_v57  ;;  %8683 = vmatpush1.bf16.msra.mxu1 %v10629_v58  ;;  %v11106_v57 = vld [vmem:[%s11805_s17] sm:$0xff]   ;;  %v8715_v58 = vpack.c.bf16 %v8706_v59, %v8706_v59  ;;  %v11143_v45 = vld [vmem:[%s11805_s17 + $0x188] sm:$0xff]  }
 0x5d6   : > { %8356 = vmatprep.subr.bf16.mxu0 %v10636_v61  ;;  %8684 = vmatprep.subr.bf16.mxu1 %v10638_v60  ;;  %v11109_v61 = vld [vmem:[%s11805_s17 + $0xc8] sm:$0xff]   ;;  %v8717_v60 = vpack.c.bf16 %v8708_v54, %v8708_v54  ;;  %v11154_v59 = vld [vmem:[%s11805_s17 + $0x120] sm:$0xff]  }
 0x5d7   : > { %v11155_v54 = vld [vmem:[%s11805_s17 + $0x1a0] sm:$0xff]  }
 0x5d9   : > { %8357 = vmatpush1.bf16.msra.mxu0 %v10635_v1  ;;  %8685 = vmatpush1.bf16.msra.mxu1 %v10637_v12  ;;  %v11114_v1 = vld [vmem:[%s11805_s17 + $0x10] sm:$0xff]   ;;  %v11116_v12 = vld [vmem:[%s11805_s17 + $0x58] sm:$0xff]  }
 0x5da   : > { %8358 = vmatprep.subr.bf16.mxu0 %v10644_v14  ;;  %8686 = vmatprep.subr.bf16.mxu1 %v10646_v15  ;;  %v11117_v14 = vld [vmem:[%s11805_s17 + $0xd8] sm:$0xff]  }
 0x5db   : > { %v11118_v15 = vld [vmem:[%s11805_s17 + $0x18] sm:$0xff]  }
 0x5dd   : > { %8359 = vmatpush1.bf16.msra.mxu0 %v10643_v8  ;;  %8687 = vmatpush1.bf16.msra.mxu1 %v10645_v13  ;;  %v11123_v8 = vld [vmem:[%s11805_s17 + $0xa0] sm:$0xff]   ;;  %v11124_v13 = vld [vmem:[%s11805_s17 + $0x68] sm:$0xff]  }
 0x5de   : > { %8360 = vmatprep.subr.bf16.mxu0 %v10652_v10  ;;  %8688 = vmatprep.subr.bf16.mxu1 %v10654_v18  ;;  %v2187_v10 = vsub.s32 2, %v13020_v22  ;;  %v11125_v18 = vld [vmem:[%s11805_s17 + $0xe8] sm:$0xff]  }
 0x5e1   : > { %8361 = vmatpush1.bf16.msra.mxu0 %v10651_v28  ;;  %8689 = vmatpush1.bf16.msra.mxu1 %v10653_v31  ;;  %v2188_v28 = vrot.slane %v13030_v24, %v2187_v10  ;;  %v11129_v31 = vld [vmem:[%s11805_s17 + $0xf0] sm:$0xff]  }
 0x5e2   : > { %8362 = vmatprep.subr.bf16.mxu0 %v10660_v32  ;;  %8690 = vmatprep.subr.bf16.mxu1 %v10662_v33  ;;  %v11130_v32 = vld [vmem:[%s11805_s17 + $0x30] sm:$0xff]   ;;  %v10848_v33 = vadd.f32 %v12714_v62, %v2180_v21  ;;  %v11136_v62 = vld [vmem:[%s11805_s17 + $0x140] sm:$0xff]  }
 0x5e3   : > { %v10850_v6 = vadd.f32 %v12718_v7, %v2188_v28 }
 0x5e4   : > { %v8705_v25 = vmax.f32 %v10848_v33, 0.0 }
 0x5e5   : > { %8363 = vmatpush1.bf16.msra.mxu0 %v10659_v39  ;;  %8691 = vmatpush1.bf16.msra.mxu1 %v10661_v52  ;;  %v11135_v39 = vld [vmem:[%s11805_s17 + $0xb8] sm:$0xff]   ;;  %v8707_v52 = vmax.f32 %v10850_v6, 0.0 }
 0x5e6   : > { %8364 = vmatprep.subr.bf16.mxu0 %v10668_v38  ;;  %8692 = vmatprep.subr.bf16.mxu1 %v10670_v30  ;;  %v11137_v38 = vld [vmem:[%s11805_s17 + $0x1c0] sm:$0xff]   ;;  %v8714_v7 = vpack.c.bf16 %v8705_v25, %v8705_v25 }
 0x5e7   : > { %v11138_v30 = vld [vmem:[%s11805_s17 + $0x100] sm:$0xff]   ;;  %v8716_v42 = vpack.c.bf16 %v8707_v52, %v8707_v52 }
 0x5e9   : > { %8365 = vmatpush1.bf16.msra.mxu0 %v10667_v46  ;;  %8693 = vmatpush1.bf16.msra.mxu1 %v10669_v26  ;;  %v11144_v46 = vld [vmem:[%s11805_s17 + $0x150] sm:$0xff]  }
 0x5ea   : > { %8366 = vmatprep.subr.bf16.mxu0 %v10676_v47  ;;  %8694 = vmatprep.subr.bf16.mxu1 %v10678_v63  ;;  %v11145_v26 = vld [vmem:[%s11805_s17 + $0x1d0] sm:$0xff]  }
 0x5eb   : > { %v11146_v47 = vld [vmem:[%s11805_s17 + $0x110] sm:$0xff]  }
 0x5ec   : > { %v11147_v63 = vld [vmem:[%s11805_s17 + $0x190] sm:$0xff]  }
 0x5ed   : > { %8367 = vmatpush1.bf16.msra.mxu0 %v10675_v49  ;;  %8695 = vmatpush1.bf16.msra.mxu1 %v10677_v50  ;;  %v11150_v49 = vld [vmem:[%s11805_s17 + $0x118] sm:$0xff]  }
 0x5ee   : > { %10760 = vmatprep.subr.bf16.mxu0 %v11104_v51  ;;  %10782 = vmatprep.subr.bf16.mxu1 %v11105_v53  ;;  %v11151_v50 = vld [vmem:[%s11805_s17 + $0x198] sm:$0xff]   ;;  %v11152_v51 = vld [vmem:[%s11805_s17 + $0x160] sm:$0xff]  }
 0x5ef   : > { %v11153_v53 = vld [vmem:[%s11805_s17 + $0x1e0] sm:$0xff]  }
 0x5f0   : > { %8369 = vmatmul.mubr.bf16.vlgmr.msra.gmra.mrb[4].mxu0 %v12482_v40  ;;  %8697 = vmatmul.mubr.bf16.vlgmr.msra.gmra.mrb[4].mxu1 %v12482_v40  ;;  %v11115_v40 = vld [vmem:[%s11805_s17 + $0x90] sm:$0xff]  }
 0x5f1   : > { %10761 = vmatpush3.bf16.msra.mxu0 %v11106_v57  ;;  %9266 = vmatprep.mubr.bf16.mxu0 %v8715_v58  ;;  %v11156_v57 = vld [vmem:[%s11805_s17 + $0x168] sm:$0xff]  }
 0x5f2   : > { %10783 = vmatpush3.bf16.msra.mxu1 %v11107_v11  ;;  %9306 = vmatprep.mubr.bf16.mxu1 %v8717_v60  ;;  %v11157_v11 = vld [vmem:[%s11805_s17 + $0x1e8] sm:$0xff]   ;;  %v11161_v60 = vld [vmem:[%s11805_s17 + $0x1f0] sm:$0xff]  }
 0x5f3   : > { %10762 = vmatprep.subr.bf16.mxu0 %v11108_v55  ;;  %10784 = vmatprep.subr.bf16.mxu1 %v11109_v61  ;;  %v11158_v55 = vld [vmem:[%s11805_s17 + $0x128] sm:$0xff]   ;;  %v11160_v61 = vld [vmem:[%s11805_s17 + $0x170] sm:$0xff]  }
 0x5f4   : > { %v11159_v58 = vld [vmem:[%s11805_s17 + $0x1a8] sm:$0xff]  }
 0x5f5   : > { %10763 = vmatpush3.bf16.msra.mxu0 %v11110_v2  ;;  %v11162_v2 = vld [vmem:[%s11805_s17 + $0x130] sm:$0xff]  }
 0x5f6   : > { %10785 = vmatpush3.bf16.msra.mxu1 %v11111_v3  ;;  %10764 = vmatprep.subr.bf16.mxu0 %v11112_v4  ;;  %v11163_v3 = vld [vmem:[%s11805_s17 + $0x1b0] sm:$0xff]   ;;  %v11164_v4 = vld [vmem:[%s11805_s17 + $0x178] sm:$0xff]  }
 0x5f7   : > { %10786 = vmatprep.subr.bf16.mxu1 %v11113_v36  ;;  %v11165_v36 = vld [vmem:[%s11805_s17 + $0x1f8] sm:$0xff]  }
 0x5f9   : > { %10765 = vmatpush3.bf16.msra.mxu0 %v11114_v1  ;;  %v11166_v1 = vld [vmem:[%s11805_s17 + $0x138] sm:$0xff]  }
 0x5fa   : > { %10787 = vmatpush3.bf16.msra.mxu1 %v11115_v40  ;;  %10766 = vmatprep.subr.bf16.mxu0 %v11116_v12  ;;  %v11167_v40 = vld [vmem:[%s11805_s17 + $0x1b8] sm:$0xff]   ;;  %v2195_v12 = vsub.s32 4, %v13020_v22 }
 0x5fb   : > { %10788 = vmatprep.subr.bf16.mxu1 %v11117_v14  ;;  %v2203_v14 = vsub.s32 6, %v13020_v22 }
 0x5fd   : > { %10767 = vmatpush3.bf16.msra.mxu0 %v11118_v15  ;;  %v2199_v15 = vsub.s32 5, %v13020_v22 }
 0x5fe   : > { %10789 = vmatpush3.bf16.msra.mxu1 %v11119_v29  ;;  %10768 = vmatprep.subr.bf16.mxu0 %v11120_v5  ;;  %v2207_v29 = vsub.s32 7, %v13020_v22  ;;  %v2196_v5 = vrot.slane %v13030_v24, %v2195_v12 }
 0x5ff   : > { %10790 = vmatprep.subr.bf16.mxu1 %v11121_v16  ;;  %v2204_v16 = vrot.slane %v13030_v24, %v2203_v14 }
 0x600   : > { %v2208_v9 = vrot.slane %v13030_v24, %v2207_v29 }
 0x601   : > { %10769 = vmatpush3.bf16.msra.mxu0 %v11122_v17  ;;  %v2200_v17 = vrot.slane %v13030_v24, %v2199_v15 }
 0x602   : > { %10791 = vmatpush3.bf16.msra.mxu1 %v11123_v8  ;;  %10770 = vmatprep.subr.bf16.mxu0 %v11124_v13 }
 0x603   : > { %10792 = vmatprep.subr.bf16.mxu1 %v11125_v18 }
 0x605   : > { %10771 = vmatpush3.bf16.msra.mxu0 %v11126_v20 }
 0x606   : > { %10793 = vmatpush3.bf16.msra.mxu1 %v11127_v23  ;;  %10772 = vmatprep.subr.bf16.mxu0 %v11128_v27 }
 0x607   : > { %10794 = vmatprep.subr.bf16.mxu1 %v11129_v31 }
 0x609   : > { %10773 = vmatpush3.bf16.msra.mxu0 %v11130_v32 }
 0x60a   : > { %10795 = vmatpush3.bf16.msra.mxu1 %v11131_v56  ;;  %10774 = vmatprep.subr.bf16.mxu0 %v11132_v35 }
 0x60b   : > { %10796 = vmatprep.subr.bf16.mxu1 %v11133_v37 }
 0x60d   : > { %10775 = vmatpush3.bf16.msra.mxu0 %v11134_v19 }
 0x60e   : > { %10797 = vmatpush3.bf16.msra.mxu1 %v11135_v39  ;;  %10804 = vmatprep.subr.bf16.mxu0 %v11136_v62 }
 0x60f   : > { %10826 = vmatprep.subr.bf16.mxu1 %v11137_v38 }
 0x610   : > { %9267 = vmatmul.mubr.bf16.vlgmr.msra.gmra.mrb[8].mxu0 %v8714_v7 }
 0x611   : > { %9307 = vmatmul.mubr.bf16.vlgmr.msra.gmra.mrb[8].mxu1 %v8716_v42  ;;  %10805 = vmatpush3.bf16.msra.mxu0 %v11138_v30 }
 0x612   : > { %10827 = vmatpush3.bf16.msra.mxu1 %v11139_v41  ;;  %10806 = vmatprep.subr.bf16.mxu0 %v11140_v0 }
 0x613   : > { %10828 = vmatprep.subr.bf16.mxu1 %v11141_v43 }
 0x615   : > { %10807 = vmatpush3.bf16.msra.mxu0 %v11142_v44 }
 0x616   : > { %10829 = vmatpush3.bf16.msra.mxu1 %v11143_v45  ;;  %10808 = vmatprep.subr.bf16.mxu0 %v11144_v46 }
 0x617   : > { %10830 = vmatprep.subr.bf16.mxu1 %v11145_v26 }
 0x619   : > { %10809 = vmatpush3.bf16.msra.mxu0 %v11146_v47 }
 0x61a   : > { %10831 = vmatpush3.bf16.msra.mxu1 %v11147_v63  ;;  %10810 = vmatprep.subr.bf16.mxu0 %v11148_v48 }
 0x61b   : > { %10832 = vmatprep.subr.bf16.mxu1 %v11149_v34 }
 0x61d   : > { %10811 = vmatpush3.bf16.msra.mxu0 %v11150_v49 }
 0x61e   : > { %10833 = vmatpush3.bf16.msra.mxu1 %v11151_v50  ;;  %10812 = vmatprep.subr.bf16.mxu0 %v11152_v51 }
 0x61f   : > { %10834 = vmatprep.subr.bf16.mxu1 %v11153_v53 }
 0x621   : > { %10813 = vmatpush3.bf16.msra.mxu0 %v11154_v59  ;;  %v8713_v59 = vld [vmem:[#allocation3] sm:$0xff] }
 0x622   : > { %10835 = vmatpush3.bf16.msra.mxu1 %v11155_v54  ;;  %10814 = vmatprep.subr.bf16.mxu0 %v11156_v57 }
 0x623   : > { %10836 = vmatprep.subr.bf16.mxu1 %v11157_v11 }
 0x625   : > { %10815 = vmatpush3.bf16.msra.mxu0 %v11158_v55  ;;  %v10744_v55 = vld [vmem:[#allocation15] ss:$0 sm:$0xff] (!%p10743_p4) }
 0x626   : > { %10837 = vmatpush3.bf16.msra.mxu1 %v11159_v58  ;;  %10816 = vmatprep.subr.bf16.mxu0 %v11160_v61 }
 0x627   : > { %10838 = vmatprep.subr.bf16.mxu1 %v11161_v60 }
 0x629   : > { %10817 = vmatpush3.bf16.msra.mxu0 %v11162_v2 }
 0x62a   : > { %10839 = vmatpush3.bf16.msra.mxu1 %v11163_v3  ;;  %10818 = vmatprep.subr.bf16.mxu0 %v11164_v4 }
 0x62b   : > { %10840 = vmatprep.subr.bf16.mxu1 %v11165_v36 }
 0x62d   : > { %10819 = vmatpush3.bf16.msra.mxu0 %v11166_v1 }
 0x62e   : > { %10841 = vmatpush3.bf16.msra.mxu1 %v11167_v40 }
 0x6c3   : > { %v8370_v8 = vpop.f32.mrb[4].mxu0  ;;  %v8698_v10 = vpop.f32.mrb[4].mxu1 }
 0x6c4   : > { %v10852_v13 = vadd.f32 %v8370_v8, %v2196_v5  ;;  %v8372_v18 = vpop.f32.mrb[5].mxu0  ;;  %v10854_v20 = vadd.f32 %v8698_v10, %v2204_v16  ;;  %v8700_v23 = vpop.f32.mrb[5].mxu1 }
 0x6c5   : > { %v10853_v21 = vadd.f32 %v8372_v18, %v2200_v17  ;;  %v8374_v27 = vpop.f32.mrb[6].mxu0  ;;  %v10855_v31 = vadd.f32 %v8700_v23, %v2208_v9  ;;  %v8702_v32 = vpop.f32.mrb[6].mxu1 }
 0x6c6   : > { %v8709_v28 = vmax.f32 %v10852_v13, 0.0  ;;  %v8375_v22 = vpop.f32.mrb[7].mxu0  ;;  %v8711_v33 = vmax.f32 %v10854_v20, 0.0  ;;  %v8703_v35 = vpop.f32.mrb[7].mxu1 }
 0x6c7   : > { %v8710_v56 = vmax.f32 %v10853_v21, 0.0  ;;  %v8712_v6 = vmax.f32 %v10855_v31, 0.0 }
 0x6c8   : > { %v8718_v19 = vpack.c.bf16 %v8709_v28, %v8709_v28  ;;  %v8720_v24 = vpack.c.bf16 %v8711_v33, %v8711_v33 }
 0x6c9   : > { %v8719_v37 = vpack.c.bf16 %v8710_v56, %v8710_v56  ;;  %v8721_v25 = vpack.c.bf16 %v8712_v6, %v8712_v6 }
 0x6cb   : > { %9346 = vmatprep.mubr.bf16.mxu0 %v8719_v37  ;;  %9386 = vmatprep.mubr.bf16.mxu1 %v8721_v25 }
 0x6cc   : > { %9347 = vmatmul.mubr.bf16.vlgmr.msra.gmra.mrb[12].mxu0 %v8718_v19  ;;  %9387 = vmatmul.mubr.bf16.vlgmr.msra.gmra.mrb[12].mxu1 %v8720_v24 }
 0x6e3   : > { %v10776_v39 = vpop.f32.mrb[8].mxu0 }
 0x6e4   : > { %v10798_v62 = vpop.f32.mrb[8].mxu1  ;;  %v10777_v52 = vpop.f32.mrb[9].mxu0 }
 0x6e5   : > { %v10778_v38 = vadd.f32 %v10777_v52, %v10776_v39  ;;  %v10799_v30 = vpop.f32.mrb[9].mxu1  ;;  %v10779_v7 = vpop.f32.mrb[10].mxu0 }
 0x6e6   : > { %v10800_v41 = vadd.f32 %v10799_v30, %v10798_v62  ;;  %v10801_v0 = vpop.f32.mrb[10].mxu1  ;;  %v10780_v42 = vpop.f32.mrb[11].mxu0 }
 0x6e7   : > { %v10802_v43 = vpop.f32.mrb[11].mxu1 }
 0x6e8   : > { %v9309_v44 = vadd.f32 %v10800_v41, %v10778_v38 }
 0x79f   : > { %v10820_v45 = vpop.f32.mrb[12].mxu0  ;;  %v10842_v46 = vpop.f32.mrb[12].mxu1 }
 0x7a0   : > { %v10821_v26 = vpop.f32.mrb[13].mxu0  ;;  %v10843_v63 = vpop.f32.mrb[13].mxu1 }
 0x7a1   : > { %v10822_v47 = vadd.f32 %v10821_v26, %v10820_v45  ;;  %v10823_v48 = vpop.f32.mrb[14].mxu0  ;;  %v10844_v34 = vadd.f32 %v10843_v63, %v10842_v46  ;;  %v10845_v49 = vpop.f32.mrb[14].mxu1 }
 0x7a2   : > { %v10824_v50 = vpop.f32.mrb[15].mxu0  ;;  %v10846_v53 = vpop.f32.mrb[15].mxu1 }
 0x7a3   : > { %v9349_v51 = vadd.f32 %v10822_v47, %v9309_v44  ;;  %9399 = sbr.rel (%p10743_p4) target bundleno = 1974 (0x7b6), region = 84 }
 0x7a5   : > { %v9389_v54 = vadd.f32 %v10844_v34, %v9349_v51 }
 0x7a7   : > { %v9394_v57 = vadd.f32 %v9389_v54, %v8713_v59 }
 0x7a9   : > { %9395 = vst [vmem:[#allocation3] sm:$0xff] %v9394_v57 }
 0x7b0   : > { %v9400_v11 = vld [vmem:[#allocation3] sm:$0xff] }
 0x7b1   : > { %v9408_v58 = vadd.f32 %v10744_v55, %v9400_v11 }
 0x7b3   : > { %v9409_v61 = vmax.f32 %v9408_v58, 0.0 }
 0x7b5   : > { %9410 = vst [vmem:[#allocation16] sm:$0xff] %v9409_v61 }
 0x7b6 PF: > { %p11026_p3 = scmp.eq.s32.totalorder %s11552_s30, 1  ;;  %s11482_s8 = smov [#allocation16]  }
 0x7b7   : > { %s9420_s22 = sshll.u32 %s11482_s8, 4  ;;  %s9421_s22 = int_to_ptr.vmem [resolvable:$true] %s9420_s22 }
 0x7b8   : > { %s11370_s18 = scalar_lea.vmem %s9421_s22, 128  ;;  %p11377_p12 = scmp.lt.s32.totalorder %s9421_s22, %s9421_s22 }
 0x7b9   : > { %p11371_p5 = scmp.ne.s32.totalorder %s9421_s22, %s11370_s18  ;;  %p11378_p8 = scmp.lt.s32.totalorder %s11370_s18, %s11370_s18 }
 0x7bb   : > { %p11372_p10 = pnand %p11371_p5, %p11026_p3  ;;  %p11379_p13 = por %p11378_p8, %p11377_p12 }
 0x7bd   : > { %p11373_p11 = pneg %p11372_p10 }
 0x7bf   : > { %p11380_p2 = pnand %p11379_p13, %p11373_p11 }
 0x7c1   : > { %11383 = shalt.err (!%p11380_p2)
}
 0x7c2   : > { %s13219_s15 = sld [smem:[#allocation29_spill]] }
 0x7c8   : > { %s11384_s26 = scalar_lea.hbm %s13219_s15, 128 }
 0x7c9   : > { %p11385_p6 = scmp.ne.s32.totalorder %s13219_s15, %s11384_s26  ;;  %p11390_p9 = scmp.lt.u32.totalorder %s11384_s26, %s13219_s15 }
 0x7cb   : > { %p11386_p7 = pnand %p11385_p6, %p11026_p3 }
 0x7cd   : > { %p11387_p1 = pneg %p11386_p7 }
 0x7cf   : > { %p11392_p0 = pnand %p11390_p9, %p11387_p1 }
 0x7d1   : > { %11395 = shalt.err (!%p11392_p0)
}
 0x7d2   : > { %10991 = dma.vmem_to_hbm [thread:$0]  (%p11026_p3), %s9421_s22, 128, %s13219_s15, [#allocation6]  }
 0x7d3   : > { %11441 = dma.done.wait (%p11026_p3), [#allocation6], 128  }
 0x7d4   : > { %11443 = vsyncadd (%p11026_p3), [#allocation6], 4294967168 }
 0x7d5 PF: > { %s26_s29 = sadd.s32 1, %s11466_s29   ;;  %s13220_s21 = sld [smem:[#allocation23_spill]] }
 0x7d6   : > { %p23_p4 = scmp.ge.s32.totalorder %s26_s29, 4   ;;  %s13221_s26 = sld [smem:[#allocation25_spill]] }
 0x7d7   : > { %s13222_s14 = sld [smem:[#allocation24_spill]]  ;;  %s13223_s24 = smov %s11450_s25 }
 0x7d8   : > { %s13225_s27 = smov %s11462_s28  ;;  %25 = sbr.rel (!%p23_p4) target bundleno = 14 (0xe), region = 136 }
 0x7db   : > { %s13224_s25 = smov %s13220_s21 }
 0x7dd   : > { %s13226_s28 = smov %s13222_s14 }
 0x7df   :  { %9433 = vsyncpa [#allocation5], 1 }
 0x7e0   :  { %9435 = vsyncpa [#allocation5 + $0x1], 1 }
 0x7e1   :  { %9436 = vsyncpa [#allocation8], 1 }
 0x7e2   :  { %9437 = vsyncpa [#allocation11], 1 }
 0x7e3   :  { %9439 = vsyncpa [#allocation11 + $0x1], 1 }
 0x7e4   :  { %9440 = vsyncpa [#allocation14], 1 }
 0x7e5   :  { %9442 = vsyncpa [#allocation14 + $0x1], 1 }
 0x7e6   :  { %9443 = vsyncpa [#allocation6], 1 }
 0x7e7   :  { %9445 = vsyncpa [#allocation6 + $0x1], 1 }

</bundles_post_ra>
